<compile_context>
chip_gen: v7x
topology: tpu7x:2x2x1
jax: 0.10.0
libtpu: 0.0.40
codegen_flags: <defaults>
</compile_context>

<pallas_src>
import jax
import jax.numpy as jnp
from jax.experimental import pallas as pl
from jax.experimental.pallas import tpu as pltpu

# Module hyper-parameters (in_features must equal heads*out_features for the
# torch `.view(-1, heads, out_features)` to be valid).
HEADS = 2
OUT_F = 32
HF = HEADS * OUT_F
IN_F = HF

EPS = 1e-6
MAX_TANH_ARG = 1.0 - 1e-5
_PREC = jax.lax.Precision.HIGHEST  # exact one-hot gathers / f32-accurate scores on MXU


# ----------------------------------------------------------------------------
# Poincare-ball helpers, last-axis (row) layout: used by wrapper + reference.
# ----------------------------------------------------------------------------
def _artanh(x):
    x = jnp.clip(x, -MAX_TANH_ARG, MAX_TANH_ARG)
    return 0.5 * jnp.log((1.0 + x) / (1.0 - x))


def _norm_last(x):
    return jnp.sqrt(jnp.sum(x * x, axis=-1, keepdims=True))


def _expmap0(u):
    n = _norm_last(u)
    return jnp.tanh(n) * u / jnp.maximum(n, EPS)


def _logmap0(x):
    n = _norm_last(x)
    return _artanh(n) * x / jnp.maximum(n, EPS)


def _mobius_add(x, y):
    xy = jnp.sum(x * y, axis=-1, keepdims=True)
    x2 = jnp.sum(x * x, axis=-1, keepdims=True)
    y2 = jnp.sum(y * y, axis=-1, keepdims=True)
    num = (1.0 + 2.0 * xy + y2) * x + (1.0 - x2) * y
    den = 1.0 + 2.0 * xy + x2 * y2
    return num / jnp.maximum(den, EPS)


def _mobius_scalar_mul(r, x):
    n = _norm_last(x)
    return jnp.tanh(r * _artanh(n)) * x / jnp.maximum(n, EPS)


def _mobius_add_cols(x, y):
    """mobius_add with the vector axis on sublanes (axis 0), batch on lanes."""
    xy = jnp.sum(x * y, axis=0, keepdims=True)
    x2 = jnp.sum(x * x, axis=0, keepdims=True)
    y2 = jnp.sum(y * y, axis=0, keepdims=True)
    num = (1.0 + 2.0 * xy + y2) * x + (1.0 - x2) * y
    den = 1.0 + 2.0 * xy + x2 * y2
    return num / jnp.maximum(den, EPS)


# ----------------------------------------------------------------------------
# Fused kernel: gather + scores + hyperbolic softmax + mobius combine + bias.
# All per-edge tensors are transposed (edges on lanes) for lane-dense EUP work.
# ----------------------------------------------------------------------------
def _fused_edge_kernel(idx_ref, xT_ref, wi_ref, wj_ref, sel_ref, bias_ref, out_ref):
    te = idx_ref.shape[1]          # edges in this tile
    n_pad = xT_ref.shape[1]        # padded node count (VMEM-resident table)
    teh = te // HEADS              # output rows in this tile

    idx = idx_ref[...]                                   # (2, TE) int32
    src = idx[0:1, :]                                    # edge_index[0]
    dst = idx[1:2, :]                                    # edge_index[1]

    # one-hot selection matrices (nodes on sublanes, edges on lanes)
    node_iota = jax.lax.broadcasted_iota(jnp.int32, (n_pad, te), 0)
    oh_src = (node_iota == src).astype(jnp.float32)      # (N_pad, TE)
    oh_dst = (node_iota == dst).astype(jnp.float32)

    xT = xT_ref[...]                                     # (HF, N_pad)

    # per-node attention projections + per-head squared norms (tiny matmuls)
    si_node = jnp.dot(wi_ref[...], xT, precision=_PREC,
                      preferred_element_type=jnp.float32)          # (H, N_pad)
    sj_node = jnp.dot(wj_ref[...], xT, precision=_PREC,
                      preferred_element_type=jnp.float32)          # (H, N_pad)
    n2_node = jnp.dot(sel_ref[...], xT * xT, precision=_PREC,
                      preferred_element_type=jnp.float32)          # (H, N_pad)

    # MXU one-hot gathers: per-edge features and per-edge per-head scalars
    xjT = jnp.dot(xT, oh_src, precision=_PREC,
                  preferred_element_type=jnp.float32)              # (HF, TE)
    s_i = jnp.dot(si_node, oh_dst, precision=_PREC,
                  preferred_element_type=jnp.float32)              # (H, TE)
    s_j = jnp.dot(sj_node, oh_src, precision=_PREC,
                  preferred_element_type=jnp.float32)              # (H, TE)
    n2 = jnp.dot(n2_node, oh_src, precision=_PREC,
                 preferred_element_type=jnp.float32)               # (H, TE)

    # manifold.inner(cat(x_i, x_j), expmap0(att))
    scores = s_i + s_j                                             # (H, TE)

    # hyperbolic softmax over heads: expmap0(softmax(logmap0(scores)))
    sn = jnp.sqrt(jnp.sum(scores * scores, axis=0, keepdims=True))  # (1, TE)
    lg = _artanh(sn) * scores / jnp.maximum(sn, EPS)
    m = jnp.max(lg, axis=0, keepdims=True)
    ex = jnp.exp(lg - m)
    p = ex / jnp.sum(ex, axis=0, keepdims=True)
    pn = jnp.sqrt(jnp.sum(p * p, axis=0, keepdims=True))
    alpha = jnp.tanh(pn) * p / jnp.maximum(pn, EPS)                 # (H, TE)

    # mobius_scalar_mul(alpha_h, v_h) == scale_h * v_h
    n = jnp.sqrt(jnp.maximum(n2, 0.0))
    scale = jnp.tanh(alpha * _artanh(n)) / jnp.maximum(n, EPS)      # (H, TE)

    # mobius-weighted sum over heads (feature axis on sublanes, edges on lanes)
    acc = jnp.zeros((OUT_F, te), dtype=jnp.float32)
    for h in range(HEADS):
        v_h = xjT[h * OUT_F:(h + 1) * OUT_F, :]                     # (F, TE)
        acc = _mobius_add_cols(acc, scale[h:h + 1, :] * v_h)

    # torch `out.view(-1, heads * out_features)`: the wrapper pre-interleaves the
    # edge order per tile so that row r is the concat of the HEADS column slabs.
    y = jnp.concatenate(
        [acc[:, g * teh:(g + 1) * teh] for g in range(HEADS)], axis=0)  # (HF, TEH)

    # fused bias: mobius_add(out, expmap0(bias))  (bias already expmapped)
    y = _mobius_add_cols(y, bias_ref[...])                          # (HF, TEH)

    out_ref[...] = y.T.astype(out_ref.dtype)                        # (TEH, HF)


# ----------------------------------------------------------------------------
# Wrapper: parameter hoisting, padding, per-tile edge interleave, pallas_call.
# ----------------------------------------------------------------------------
def hyperbolic_attention_forward(x, edge_index, att, bias, *, edge_tile=512):
    N, F_in = x.shape
    E = edge_index.shape[1]
    assert F_in == HF, "in_features must equal heads*out_features"
    assert E % HEADS == 0, "edge count must be divisible by heads (torch .view)"
    te = edge_tile
    assert te % (HEADS * 128) == 0

    # node table (transposed, zero-padded to a sublane-friendly count), VMEM-resident
    n_pad = max(8, ((N + 7) // 8) * 8)
    x_t = jnp.pad(x.astype(jnp.float32), ((0, n_pad - N), (0, 0))).T      # (HF, N_pad)

    # pad edges to a tile multiple (tail handled by padding, not asserts)
    e_pad = ((E + te - 1) // te) * te
    ei = jnp.pad(edge_index.astype(jnp.int32), ((0, 0), (0, e_pad - E)))  # (2, E_pad)

    # per-tile interleave: within each tile, group edges by (position mod HEADS)
    # so the kernel's HEADS column slabs concatenate into torch's view(-1, H*F) rows.
    n_tiles = e_pad // te
    base = jnp.arange(e_pad, dtype=jnp.int32).reshape(n_tiles, te // HEADS, HEADS)
    perm = base.transpose(0, 2, 1).reshape(e_pad)
    ei_perm = ei[:, perm]                                                  # (2, E_pad)

    # hoisted parameter maps (computed once, not per grid step)
    att_e = _expmap0(att.reshape(HEADS, 2 * OUT_F).astype(jnp.float32))    # (H, 2F)
    a_i, a_j = att_e[:, :OUT_F], att_e[:, OUT_F:]
    eye = jnp.eye(HEADS, dtype=jnp.float32)
    wi_t = jnp.einsum("hg,gf->hgf", eye, a_i).reshape(HEADS, HF)           # (H, HF)
    wj_t = jnp.einsum("hg,gf->hgf", eye, a_j).reshape(HEADS, HF)
    sel = jnp.repeat(eye, OUT_F, axis=1)                                   # (H, HF)
    bias_t = _expmap0(bias.reshape(1, HF).astype(jnp.float32)).T           # (HF, 1)

    rows_per_tile = te // HEADS
    out_rows_pad = e_pad // HEADS

    out = pl.pallas_call(
        _fused_edge_kernel,
        out_shape=jax.ShapeDtypeStruct((out_rows_pad, HF), jnp.float32),
        grid=(n_tiles,),
        in_specs=[
            pl.BlockSpec((2, te), lambda i: (0, i)),          # edge indices (per tile)
            pl.BlockSpec((HF, n_pad), lambda i: (0, 0)),      # node features^T (resident)
            pl.BlockSpec((HEADS, HF), lambda i: (0, 0)),      # Wi^T  (expmap0(att) a_i blocks)
            pl.BlockSpec((HEADS, HF), lambda i: (0, 0)),      # Wj^T  (expmap0(att) a_j blocks)
            pl.BlockSpec((HEADS, HF), lambda i: (0, 0)),      # per-head block mask
            pl.BlockSpec((HF, 1), lambda i: (0, 0)),          # expmap0(bias)^T
        ],
        out_specs=pl.BlockSpec((rows_per_tile, HF), lambda i: (i, 0)),
        compiler_params=pltpu.CompilerParams(dimension_semantics=("parallel",)),
    )(ei_perm, x_t, wi_t, wj_t, sel, bias_t)

    return out[: E // HEADS]


# ----------------------------------------------------------------------------
# Pure-JAX reference of the torch forward (same manifold math)
# ----------------------------------------------------------------------------
def reference_forward(x, edge_index, att, bias):
    x_i = x[edge_index[1]].reshape(-1, HEADS, OUT_F)
    x_j = x[edge_index[0]].reshape(-1, HEADS, OUT_F)
    alpha_in = jnp.concatenate([x_i, x_j], axis=-1)          # (E, H, 2F)
    att_e = _expmap0(att)                                    # (1, H, 2F)
    scores = jnp.sum(alpha_in * att_e, axis=-1)              # (E, H)
    alpha = _expmap0(jax.nn.softmax(_logmap0(scores), axis=-1))
    out = jnp.zeros_like(x_j[:, 0])
    for h in range(HEADS):
        out = _mobius_add(out, _mobius_scalar_mul(alpha[:, h:h + 1], x_j[:, h]))
    out = out.reshape(-1, HF)
    out = _mobius_add(out, _expmap0(bias.reshape(1, HF)))
    return out


if __name__ == "__main__":
    key = jax.random.PRNGKey(0)
    k_x, k_e, k_att, k_b = jax.random.split(key, 4)

    # small graph; E is NOT a multiple of the tile on purpose (exercises padding)
    N, E = 40, 1800
    raw = jax.random.normal(k_x, (N, IN_F), dtype=jnp.float32)
    # keep node features strictly inside the Poincare ball
    x = 0.7 * raw / (1.0 + jnp.linalg.norm(raw, axis=-1, keepdims=True))
    edge_index = jax.random.randint(k_e, (2, E), 0, N, dtype=jnp.int32)

    # deterministic parameter init matching reset_parameters(): U(-bound, bound)
    bound = 1.0 / (IN_F ** 0.5)
    att = jax.random.uniform(k_att, (1, HEADS, 2 * OUT_F), jnp.float32, -bound, bound)
    bias = jax.random.uniform(k_b, (HEADS * OUT_F,), jnp.float32, -bound, bound)

    fwd = jax.jit(hyperbolic_attention_forward)
    out = jax.block_until_ready(fwd(x, edge_index, att, bias))

    ref = reference_forward(x, edge_index, att, bias)
    assert out.shape == ref.shape == (E // HEADS, HF), (out.shape, ref.shape)
    max_err = float(jnp.max(jnp.abs(out - ref)))
    assert jnp.allclose(out, ref, atol=2e-4, rtol=2e-4), f"max abs err {max_err}"

    print("KERNEL_OK")
</pallas_src>

<mosaic_0001>
module attributes {stable_mosaic.version = 11 : i64} {
  func.func private @main(%arg0: i32) attributes {dimension_semantics = [#tpu.dimension_semantics<core_parallel>], iteration_bounds = array<i64: 2>, tpu.core_type = #tpu.core_type<sc_scalar_subcore>, window_params = []} {
    return
  }
}

module attributes {stable_mosaic.version = 11 : i64} {
  func.func private @main(%arg0: i32) attributes {dimension_semantics = [#tpu.dimension_semantics<core_parallel>], iteration_bounds = array<i64: 2>, tpu.core_type = #tpu.core_type<sc_scalar_subcore>, window_params = []} {
    return
  }
}

module attributes {stable_mosaic.version = 11 : i64} {
  func.func @_fused_edge_kernel(%arg0: i32, %arg1: memref<2x512xi32, #tpu.memory_space<vmem>>, %arg2: memref<64x40xf32, #tpu.memory_space<vmem>>, %arg3: memref<2x64xf32, #tpu.memory_space<vmem>>, %arg4: memref<2x64xf32, #tpu.memory_space<vmem>>, %arg5: memref<2x64xf32, #tpu.memory_space<vmem>>, %arg6: memref<64x1xf32, #tpu.memory_space<vmem>>, %arg7: memref<256x64xf32, #tpu.memory_space<vmem>>) attributes {dimension_semantics = [#tpu.dimension_semantics<parallel>], iteration_bounds = array<i64: 4>, scalar_prefetch = 0 : i64, scratch_operands = 0 : i64, tpu.core_type = #tpu.core_type<tc>, window_params = [{transform_indices = @transform_0, window_bounds = array<i64: 2, 512>}, {pipeline_mode = #tpu.pipeline_mode<synchronous>, transform_indices = @transform_1, window_bounds = array<i64: 64, 40>}, {pipeline_mode = #tpu.pipeline_mode<synchronous>, transform_indices = @transform_2, window_bounds = array<i64: 2, 64>}, {pipeline_mode = #tpu.pipeline_mode<synchronous>, transform_indices = @transform_3, window_bounds = array<i64: 2, 64>}, {pipeline_mode = #tpu.pipeline_mode<synchronous>, transform_indices = @transform_4, window_bounds = array<i64: 2, 64>}, {pipeline_mode = #tpu.pipeline_mode<synchronous>, transform_indices = @transform_5, window_bounds = array<i64: 64, 1>}, {transform_indices = @transform_6, window_bounds = array<i64: 256, 64>}]} {
    %c0 = arith.constant 0 : index
    %c0_0 = arith.constant 0 : index
    %0 = vector.load %arg1[%c0, %c0_0] : memref<2x512xi32, #tpu.memory_space<vmem>>, vector<2x512xi32>
    %1 = vector.extract_strided_slice %0 {offsets = [0, 0], sizes = [1, 512], strides = [1, 1]} : vector<2x512xi32> to vector<1x512xi32>
    %2 = vector.extract_strided_slice %0 {offsets = [1, 0], sizes = [1, 512], strides = [1, 1]} : vector<2x512xi32> to vector<1x512xi32>
    %3 = tpu.iota {dimensions = array<i32: 0>} : vector<40x512xi32>
    %4 = vector.broadcast %1 : vector<1x512xi32> to vector<40x512xi32>
    %5 = arith.cmpi eq, %3, %4 : vector<40x512xi32>
    %6 = arith.extui %5 : vector<40x512xi1> to vector<40x512xi32>
    %7 = arith.sitofp %6 : vector<40x512xi32> to vector<40x512xf32>
    %8 = vector.broadcast %2 : vector<1x512xi32> to vector<40x512xi32>
    %9 = arith.cmpi eq, %3, %8 : vector<40x512xi32>
    %10 = arith.extui %9 : vector<40x512xi1> to vector<40x512xi32>
    %11 = arith.sitofp %10 : vector<40x512xi32> to vector<40x512xf32>
    %c0_1 = arith.constant 0 : index
    %c0_2 = arith.constant 0 : index
    %12 = vector.load %arg2[%c0_1, %c0_2] : memref<64x40xf32, #tpu.memory_space<vmem>>, vector<64x40xf32>
    %c0_3 = arith.constant 0 : index
    %c0_4 = arith.constant 0 : index
    %13 = vector.load %arg3[%c0_3, %c0_4] : memref<2x64xf32, #tpu.memory_space<vmem>>, vector<2x64xf32>
    %cst = arith.constant dense<0.000000e+00> : vector<2x40xf32>
    %14 = tpu.matmul %13, %12, %cst {dimension_numbers = #tpu.dot_dimension_numbers<[1], [0], [0], [1], [0, 0, 1, 1], [], []>, precision = #tpu.contract_precision<fp32>} : vector<2x64xf32>, vector<64x40xf32>, vector<2x40xf32> -> vector<2x40xf32>
    %c0_5 = arith.constant 0 : index
    %c0_6 = arith.constant 0 : index
    %15 = vector.load %arg4[%c0_5, %c0_6] : memref<2x64xf32, #tpu.memory_space<vmem>>, vector<2x64xf32>
    %cst_7 = arith.constant dense<0.000000e+00> : vector<2x40xf32>
    %16 = tpu.matmul %15, %12, %cst_7 {dimension_numbers = #tpu.dot_dimension_numbers<[1], [0], [0], [1], [0, 0, 1, 1], [], []>, precision = #tpu.contract_precision<fp32>} : vector<2x64xf32>, vector<64x40xf32>, vector<2x40xf32> -> vector<2x40xf32>
    %c0_8 = arith.constant 0 : index
    %c0_9 = arith.constant 0 : index
    %17 = vector.load %arg5[%c0_8, %c0_9] : memref<2x64xf32, #tpu.memory_space<vmem>>, vector<2x64xf32>
    %18 = arith.mulf %12, %12 : vector<64x40xf32>
    %cst_10 = arith.constant dense<0.000000e+00> : vector<2x40xf32>
    %19 = tpu.matmul %17, %18, %cst_10 {dimension_numbers = #tpu.dot_dimension_numbers<[1], [0], [0], [1], [0, 0, 1, 1], [], []>, precision = #tpu.contract_precision<fp32>} : vector<2x64xf32>, vector<64x40xf32>, vector<2x40xf32> -> vector<2x40xf32>
    %cst_11 = arith.constant dense<0.000000e+00> : vector<64x512xf32>
    %20 = tpu.matmul %12, %7, %cst_11 {dimension_numbers = #tpu.dot_dimension_numbers<[1], [0], [0], [1], [0, 0, 1, 1], [], []>, precision = #tpu.contract_precision<fp32>} : vector<64x40xf32>, vector<40x512xf32>, vector<64x512xf32> -> vector<64x512xf32>
    %cst_12 = arith.constant dense<0.000000e+00> : vector<2x512xf32>
    %21 = tpu.matmul %14, %11, %cst_12 {dimension_numbers = #tpu.dot_dimension_numbers<[1], [0], [0], [1], [0, 0, 1, 1], [], []>, precision = #tpu.contract_precision<fp32>} : vector<2x40xf32>, vector<40x512xf32>, vector<2x512xf32> -> vector<2x512xf32>
    %cst_13 = arith.constant dense<0.000000e+00> : vector<2x512xf32>
    %22 = tpu.matmul %16, %7, %cst_13 {dimension_numbers = #tpu.dot_dimension_numbers<[1], [0], [0], [1], [0, 0, 1, 1], [], []>, precision = #tpu.contract_precision<fp32>} : vector<2x40xf32>, vector<40x512xf32>, vector<2x512xf32> -> vector<2x512xf32>
    %cst_14 = arith.constant dense<0.000000e+00> : vector<2x512xf32>
    %23 = tpu.matmul %19, %7, %cst_14 {dimension_numbers = #tpu.dot_dimension_numbers<[1], [0], [0], [1], [0, 0, 1, 1], [], []>, precision = #tpu.contract_precision<fp32>} : vector<2x40xf32>, vector<40x512xf32>, vector<2x512xf32> -> vector<2x512xf32>
    %24 = arith.addf %21, %22 : vector<2x512xf32>
    %25 = arith.mulf %24, %24 : vector<2x512xf32>
    %cst_15 = arith.constant dense<0.000000e+00> : vector<512xf32>
    %26 = vector.multi_reduction <add>, %25, %cst_15 [0] : vector<2x512xf32> to vector<512xf32>
    %27 = vector.shape_cast %26 : vector<512xf32> to vector<1x512xf32>
    %28 = math.sqrt %27 : vector<1x512xf32>
    %cst_16 = arith.constant -0.999989986 : f32
    %cst_17 = arith.constant 0.999989986 : f32
    %29 = vector.broadcast %cst_16 : f32 to vector<1x512xf32>
    %30 = arith.maximumf %29, %28 : vector<1x512xf32>
    %31 = vector.broadcast %cst_17 : f32 to vector<1x512xf32>
    %32 = arith.minimumf %31, %30 : vector<1x512xf32>
    %cst_18 = arith.constant 1.000000e+00 : f32
    %33 = vector.broadcast %cst_18 : f32 to vector<1x512xf32>
    %34 = arith.addf %33, %32 : vector<1x512xf32>
    %cst_19 = arith.constant 1.000000e+00 : f32
    %35 = vector.broadcast %cst_19 : f32 to vector<1x512xf32>
    %36 = arith.subf %35, %32 : vector<1x512xf32>
    %37 = arith.divf %34, %36 : vector<1x512xf32>
    %38 = math.log %37 : vector<1x512xf32>
    %cst_20 = arith.constant 5.000000e-01 : f32
    %39 = vector.broadcast %cst_20 : f32 to vector<1x512xf32>
    %40 = arith.mulf %39, %38 : vector<1x512xf32>
    %41 = vector.broadcast %40 : vector<1x512xf32> to vector<2x512xf32>
    %42 = arith.mulf %41, %24 : vector<2x512xf32>
    %cst_21 = arith.constant 9.99999997E-7 : f32
    %43 = vector.broadcast %cst_21 : f32 to vector<1x512xf32>
    %44 = arith.maximumf %28, %43 : vector<1x512xf32>
    %45 = vector.broadcast %44 : vector<1x512xf32> to vector<2x512xf32>
    %46 = arith.divf %42, %45 : vector<2x512xf32>
    %cst_22 = arith.constant dense<0xFF800000> : vector<512xf32>
    %47 = vector.multi_reduction <maximumf>, %46, %cst_22 [0] : vector<2x512xf32> to vector<512xf32>
    %48 = vector.shape_cast %47 : vector<512xf32> to vector<1x512xf32>
    %49 = vector.broadcast %48 : vector<1x512xf32> to vector<2x512xf32>
    %50 = arith.subf %46, %49 : vector<2x512xf32>
    %51 = math.exp %50 : vector<2x512xf32>
    %cst_23 = arith.constant dense<0.000000e+00> : vector<512xf32>
    %52 = vector.multi_reduction <add>, %51, %cst_23 [0] : vector<2x512xf32> to vector<512xf32>
    %53 = vector.shape_cast %52 : vector<512xf32> to vector<1x512xf32>
    %54 = vector.broadcast %53 : vector<1x512xf32> to vector<2x512xf32>
    %55 = arith.divf %51, %54 : vector<2x512xf32>
    %56 = arith.mulf %55, %55 : vector<2x512xf32>
    %cst_24 = arith.constant dense<0.000000e+00> : vector<512xf32>
    %57 = vector.multi_reduction <add>, %56, %cst_24 [0] : vector<2x512xf32> to vector<512xf32>
    %58 = vector.shape_cast %57 : vector<512xf32> to vector<1x512xf32>
    %59 = math.sqrt %58 : vector<1x512xf32>
    %60 = math.tanh %59 : vector<1x512xf32>
    %61 = vector.broadcast %60 : vector<1x512xf32> to vector<2x512xf32>
    %62 = arith.mulf %61, %55 : vector<2x512xf32>
    %cst_25 = arith.constant 9.99999997E-7 : f32
    %63 = vector.broadcast %cst_25 : f32 to vector<1x512xf32>
    %64 = arith.maximumf %59, %63 : vector<1x512xf32>
    %65 = vector.broadcast %64 : vector<1x512xf32> to vector<2x512xf32>
    %66 = arith.divf %62, %65 : vector<2x512xf32>
    %cst_26 = arith.constant 0.000000e+00 : f32
    %67 = vector.broadcast %cst_26 : f32 to vector<2x512xf32>
    %68 = arith.maximumf %23, %67 : vector<2x512xf32>
    %69 = math.sqrt %68 : vector<2x512xf32>
    %cst_27 = arith.constant -0.999989986 : f32
    %cst_28 = arith.constant 0.999989986 : f32
    %70 = vector.broadcast %cst_27 : f32 to vector<2x512xf32>
    %71 = arith.maximumf %70, %69 : vector<2x512xf32>
    %72 = vector.broadcast %cst_28 : f32 to vector<2x512xf32>
    %73 = arith.minimumf %72, %71 : vector<2x512xf32>
    %cst_29 = arith.constant 1.000000e+00 : f32
    %74 = vector.broadcast %cst_29 : f32 to vector<2x512xf32>
    %75 = arith.addf %74, %73 : vector<2x512xf32>
    %cst_30 = arith.constant 1.000000e+00 : f32
    %76 = vector.broadcast %cst_30 : f32 to vector<2x512xf32>
    %77 = arith.subf %76, %73 : vector<2x512xf32>
    %78 = arith.divf %75, %77 : vector<2x512xf32>
    %79 = math.log %78 : vector<2x512xf32>
    %cst_31 = arith.constant 5.000000e-01 : f32
    %80 = vector.broadcast %cst_31 : f32 to vector<2x512xf32>
    %81 = arith.mulf %80, %79 : vector<2x512xf32>
    %82 = arith.mulf %66, %81 : vector<2x512xf32>
    %83 = math.tanh %82 : vector<2x512xf32>
    %cst_32 = arith.constant 9.99999997E-7 : f32
    %84 = vector.broadcast %cst_32 : f32 to vector<2x512xf32>
    %85 = arith.maximumf %69, %84 : vector<2x512xf32>
    %86 = arith.divf %83, %85 : vector<2x512xf32>
    %cst_33 = arith.constant 0.000000e+00 : f32
    %87 = vector.broadcast %cst_33 : f32 to vector<32x512xf32>
    %88 = vector.extract_strided_slice %20 {offsets = [0, 0], sizes = [32, 512], strides = [1, 1]} : vector<64x512xf32> to vector<32x512xf32>
    %89 = vector.extract_strided_slice %86 {offsets = [0, 0], sizes = [1, 512], strides = [1, 1]} : vector<2x512xf32> to vector<1x512xf32>
    %90 = vector.broadcast %89 : vector<1x512xf32> to vector<32x512xf32>
    %91 = arith.mulf %90, %88 : vector<32x512xf32>
    %92 = arith.mulf %87, %91 : vector<32x512xf32>
    %cst_34 = arith.constant dense<0.000000e+00> : vector<512xf32>
    %93 = vector.multi_reduction <add>, %92, %cst_34 [0] : vector<32x512xf32> to vector<512xf32>
    %94 = vector.shape_cast %93 : vector<512xf32> to vector<1x512xf32>
    %95 = arith.mulf %87, %87 : vector<32x512xf32>
    %cst_35 = arith.constant dense<0.000000e+00> : vector<512xf32>
    %96 = vector.multi_reduction <add>, %95, %cst_35 [0] : vector<32x512xf32> to vector<512xf32>
    %97 = vector.shape_cast %96 : vector<512xf32> to vector<1x512xf32>
    %98 = arith.mulf %91, %91 : vector<32x512xf32>
    %cst_36 = arith.constant dense<0.000000e+00> : vector<512xf32>
    %99 = vector.multi_reduction <add>, %98, %cst_36 [0] : vector<32x512xf32> to vector<512xf32>
    %100 = vector.shape_cast %99 : vector<512xf32> to vector<1x512xf32>
    %cst_37 = arith.constant 2.000000e+00 : f32
    %101 = vector.broadcast %cst_37 : f32 to vector<1x512xf32>
    %102 = arith.mulf %101, %94 : vector<1x512xf32>
    %cst_38 = arith.constant 1.000000e+00 : f32
    %103 = vector.broadcast %cst_38 : f32 to vector<1x512xf32>
    %104 = arith.addf %103, %102 : vector<1x512xf32>
    %105 = arith.addf %104, %100 : vector<1x512xf32>
    %106 = vector.broadcast %105 : vector<1x512xf32> to vector<32x512xf32>
    %107 = arith.mulf %106, %87 : vector<32x512xf32>
    %cst_39 = arith.constant 1.000000e+00 : f32
    %108 = vector.broadcast %cst_39 : f32 to vector<1x512xf32>
    %109 = arith.subf %108, %97 : vector<1x512xf32>
    %110 = vector.broadcast %109 : vector<1x512xf32> to vector<32x512xf32>
    %111 = arith.mulf %110, %91 : vector<32x512xf32>
    %112 = arith.addf %107, %111 : vector<32x512xf32>
    %cst_40 = arith.constant 2.000000e+00 : f32
    %113 = vector.broadcast %cst_40 : f32 to vector<1x512xf32>
    %114 = arith.mulf %113, %94 : vector<1x512xf32>
    %cst_41 = arith.constant 1.000000e+00 : f32
    %115 = vector.broadcast %cst_41 : f32 to vector<1x512xf32>
    %116 = arith.addf %115, %114 : vector<1x512xf32>
    %117 = arith.mulf %97, %100 : vector<1x512xf32>
    %118 = arith.addf %116, %117 : vector<1x512xf32>
    %cst_42 = arith.constant 9.99999997E-7 : f32
    %119 = vector.broadcast %cst_42 : f32 to vector<1x512xf32>
    %120 = arith.maximumf %118, %119 : vector<1x512xf32>
    %121 = vector.broadcast %120 : vector<1x512xf32> to vector<32x512xf32>
    %122 = arith.divf %112, %121 : vector<32x512xf32>
    %123 = vector.extract_strided_slice %20 {offsets = [32, 0], sizes = [32, 512], strides = [1, 1]} : vector<64x512xf32> to vector<32x512xf32>
    %124 = vector.extract_strided_slice %86 {offsets = [1, 0], sizes = [1, 512], strides = [1, 1]} : vector<2x512xf32> to vector<1x512xf32>
    %125 = vector.broadcast %124 : vector<1x512xf32> to vector<32x512xf32>
    %126 = arith.mulf %125, %123 : vector<32x512xf32>
    %127 = arith.mulf %122, %126 : vector<32x512xf32>
    %cst_43 = arith.constant dense<0.000000e+00> : vector<512xf32>
    %128 = vector.multi_reduction <add>, %127, %cst_43 [0] : vector<32x512xf32> to vector<512xf32>
    %129 = vector.shape_cast %128 : vector<512xf32> to vector<1x512xf32>
    %130 = arith.mulf %122, %122 : vector<32x512xf32>
    %cst_44 = arith.constant dense<0.000000e+00> : vector<512xf32>
    %131 = vector.multi_reduction <add>, %130, %cst_44 [0] : vector<32x512xf32> to vector<512xf32>
    %132 = vector.shape_cast %131 : vector<512xf32> to vector<1x512xf32>
    %133 = arith.mulf %126, %126 : vector<32x512xf32>
    %cst_45 = arith.constant dense<0.000000e+00> : vector<512xf32>
    %134 = vector.multi_reduction <add>, %133, %cst_45 [0] : vector<32x512xf32> to vector<512xf32>
    %135 = vector.shape_cast %134 : vector<512xf32> to vector<1x512xf32>
    %cst_46 = arith.constant 2.000000e+00 : f32
    %136 = vector.broadcast %cst_46 : f32 to vector<1x512xf32>
    %137 = arith.mulf %136, %129 : vector<1x512xf32>
    %cst_47 = arith.constant 1.000000e+00 : f32
    %138 = vector.broadcast %cst_47 : f32 to vector<1x512xf32>
    %139 = arith.addf %138, %137 : vector<1x512xf32>
    %140 = arith.addf %139, %135 : vector<1x512xf32>
    %141 = vector.broadcast %140 : vector<1x512xf32> to vector<32x512xf32>
    %142 = arith.mulf %141, %122 : vector<32x512xf32>
    %cst_48 = arith.constant 1.000000e+00 : f32
    %143 = vector.broadcast %cst_48 : f32 to vector<1x512xf32>
    %144 = arith.subf %143, %132 : vector<1x512xf32>
    %145 = vector.broadcast %144 : vector<1x512xf32> to vector<32x512xf32>
    %146 = arith.mulf %145, %126 : vector<32x512xf32>
    %147 = arith.addf %142, %146 : vector<32x512xf32>
    %cst_49 = arith.constant 2.000000e+00 : f32
    %148 = vector.broadcast %cst_49 : f32 to vector<1x512xf32>
    %149 = arith.mulf %148, %129 : vector<1x512xf32>
    %cst_50 = arith.constant 1.000000e+00 : f32
    %150 = vector.broadcast %cst_50 : f32 to vector<1x512xf32>
    %151 = arith.addf %150, %149 : vector<1x512xf32>
    %152 = arith.mulf %132, %135 : vector<1x512xf32>
    %153 = arith.addf %151, %152 : vector<1x512xf32>
    %cst_51 = arith.constant 9.99999997E-7 : f32
    %154 = vector.broadcast %cst_51 : f32 to vector<1x512xf32>
    %155 = arith.maximumf %153, %154 : vector<1x512xf32>
    %156 = vector.broadcast %155 : vector<1x512xf32> to vector<32x512xf32>
    %157 = arith.divf %147, %156 : vector<32x512xf32>
    %158 = vector.extract_strided_slice %157 {offsets = [0, 0], sizes = [32, 256], strides = [1, 1]} : vector<32x512xf32> to vector<32x256xf32>
    %159 = vector.extract_strided_slice %157 {offsets = [0, 256], sizes = [32, 256], strides = [1, 1]} : vector<32x512xf32> to vector<32x256xf32>
    %160 = tpu.concatenate %158, %159 in 0 : vector<32x256xf32>, vector<32x256xf32> -> vector<64x256xf32>
    %c0_52 = arith.constant 0 : index
    %c0_53 = arith.constant 0 : index
    %161 = vector.load %arg6[%c0_52, %c0_53] : memref<64x1xf32, #tpu.memory_space<vmem>>, vector<64x1xf32>
    %162 = vector.broadcast %161 : vector<64x1xf32> to vector<64x256xf32>
    %163 = arith.mulf %160, %162 : vector<64x256xf32>
    %cst_54 = arith.constant dense<0.000000e+00> : vector<256xf32>
    %164 = vector.multi_reduction <add>, %163, %cst_54 [0] : vector<64x256xf32> to vector<256xf32>
    %165 = vector.shape_cast %164 : vector<256xf32> to vector<1x256xf32>
    %166 = arith.mulf %160, %160 : vector<64x256xf32>
    %cst_55 = arith.constant dense<0.000000e+00> : vector<256xf32>
    %167 = vector.multi_reduction <add>, %166, %cst_55 [0] : vector<64x256xf32> to vector<256xf32>
    %168 = vector.shape_cast %167 : vector<256xf32> to vector<1x256xf32>
    %169 = arith.mulf %161, %161 : vector<64x1xf32>
    %cst_56 = arith.constant dense<0.000000e+00> : vector<1xf32>
    %170 = vector.multi_reduction <add>, %169, %cst_56 [0] : vector<64x1xf32> to vector<1xf32>
    %171 = vector.shape_cast %170 : vector<1xf32> to vector<1x1xf32>
    %cst_57 = arith.constant 2.000000e+00 : f32
    %172 = vector.broadcast %cst_57 : f32 to vector<1x256xf32>
    %173 = arith.mulf %172, %165 : vector<1x256xf32>
    %cst_58 = arith.constant 1.000000e+00 : f32
    %174 = vector.broadcast %cst_58 : f32 to vector<1x256xf32>
    %175 = arith.addf %174, %173 : vector<1x256xf32>
    %176 = vector.broadcast %171 : vector<1x1xf32> to vector<1x256xf32>
    %177 = arith.addf %175, %176 : vector<1x256xf32>
    %178 = vector.broadcast %177 : vector<1x256xf32> to vector<64x256xf32>
    %179 = arith.mulf %178, %160 : vector<64x256xf32>
    %cst_59 = arith.constant 1.000000e+00 : f32
    %180 = vector.broadcast %cst_59 : f32 to vector<1x256xf32>
    %181 = arith.subf %180, %168 : vector<1x256xf32>
    %182 = vector.broadcast %181 : vector<1x256xf32> to vector<64x256xf32>
    %183 = vector.broadcast %161 : vector<64x1xf32> to vector<64x256xf32>
    %184 = arith.mulf %182, %183 : vector<64x256xf32>
    %185 = arith.addf %179, %184 : vector<64x256xf32>
    %cst_60 = arith.constant 2.000000e+00 : f32
    %186 = vector.broadcast %cst_60 : f32 to vector<1x256xf32>
    %187 = arith.mulf %186, %165 : vector<1x256xf32>
    %cst_61 = arith.constant 1.000000e+00 : f32
    %188 = vector.broadcast %cst_61 : f32 to vector<1x256xf32>
    %189 = arith.addf %188, %187 : vector<1x256xf32>
    %190 = vector.broadcast %171 : vector<1x1xf32> to vector<1x256xf32>
    %191 = arith.mulf %168, %190 : vector<1x256xf32>
    %192 = arith.addf %189, %191 : vector<1x256xf32>
    %cst_62 = arith.constant 9.99999997E-7 : f32
    %193 = vector.broadcast %cst_62 : f32 to vector<1x256xf32>
    %194 = arith.maximumf %192, %193 : vector<1x256xf32>
    %195 = vector.broadcast %194 : vector<1x256xf32> to vector<64x256xf32>
    %196 = arith.divf %185, %195 : vector<64x256xf32>
    %197 = tpu.transpose %196, [1, 0] : vector<64x256xf32> -> vector<256x64xf32>
    %c0_63 = arith.constant 0 : index
    %c0_64 = arith.constant 0 : index
    %198 = vector.load %arg7[%c0_63, %c0_64] : memref<256x64xf32, #tpu.memory_space<vmem>>, vector<256x64xf32>
    tpu.vector_store %arg7[%c0_63, %c0_64], %197 {strides = array<i32>} : memref<256x64xf32, #tpu.memory_space<vmem>>, vector<256x64xf32>,
    return
  }
  func.func @transform_0(%arg0: i32) -> (i32, i32) {
    %c0_i32 = arith.constant 0 : i32
    %c0_i32_0 = arith.constant 0 : i32
    return %c0_i32, %arg0 : i32, i32
  }
  func.func @transform_1(%arg0: i32) -> (i32, i32) {
    %c0_i32 = arith.constant 0 : i32
    %c0_i32_0 = arith.constant 0 : i32
    %c0_i32_1 = arith.constant 0 : i32
    return %c0_i32, %c0_i32_0 : i32, i32
  }
  func.func @transform_2(%arg0: i32) -> (i32, i32) {
    %c0_i32 = arith.constant 0 : i32
    %c0_i32_0 = arith.constant 0 : i32
    %c0_i32_1 = arith.constant 0 : i32
    return %c0_i32, %c0_i32_0 : i32, i32
  }
  func.func @transform_3(%arg0: i32) -> (i32, i32) {
    %c0_i32 = arith.constant 0 : i32
    %c0_i32_0 = arith.constant 0 : i32
    %c0_i32_1 = arith.constant 0 : i32
    return %c0_i32, %c0_i32_0 : i32, i32
  }
  func.func @transform_4(%arg0: i32) -> (i32, i32) {
    %c0_i32 = arith.constant 0 : i32
    %c0_i32_0 = arith.constant 0 : i32
    %c0_i32_1 = arith.constant 0 : i32
    return %c0_i32, %c0_i32_0 : i32, i32
  }
  func.func @transform_5(%arg0: i32) -> (i32, i32) {
    %c0_i32 = arith.constant 0 : i32
    %c0_i32_0 = arith.constant 0 : i32
    %c0_i32_1 = arith.constant 0 : i32
    return %c0_i32, %c0_i32_0 : i32, i32
  }
  func.func @transform_6(%arg0: i32) -> (i32, i32) {
    %c0_i32 = arith.constant 0 : i32
    %c0_i32_0 = arith.constant 0 : i32
    return %arg0, %c0_i32 : i32, i32
  }
}

</mosaic_0001>

<bundles_post_ra>
// kernel: hyperbolic_attention_forward.1
= control target key start
LH: loop header
LB: loop body
LE: loop exit
PB: predicated region body
PF: predicated region fallthrough
CT: control target
= control target key end

     0   :  { %s10470_s21 = smov 0   ;;  %s13672_s0 = inlined_call_operand.vmem [shape: s32[2,2048], index: 0, kind: input, shape index: {}]   ;;  %s13673_s1 = inlined_call_operand.vmem [shape: f32[64,40], index: 1, kind: input, shape index: {}]   ;;  %s13674_s2 = inlined_call_operand.vmem [shape: f32[2,64], index: 2, kind: input, shape index: {}]   ;;  %s13675_s3 = inlined_call_operand.vmem [shape: f32[2,64], index: 3, kind: input, shape index: {}]   ;;  %s13676_s4 = inlined_call_operand.vmem [shape: f32[2,64], index: 4, kind: input, shape index: {}]   ;;  %s13677_s5 = inlined_call_operand.vmem [shape: f32[64,1], index: 5, kind: input, shape index: {}]   ;;  %s13678_s6 = inlined_call_operand.vmem [shape: f32[1024,64], index: 6, kind: output, shape index: {}]  }
   0x1 LB: > { %s8615_s22 = sadd.s32 4294967295, %s10427_s21   ;;  %p8619_p0 = scmp.ge.s32.totalorder %s10427_s21, 1  ;;  %s10427_s21 = sphi %s10470_s21, %s16_s21  }
   0x2   : > { %p213_p1 = scmp.lt.s32.totalorder %s10427_s21, 5 }
   0x4   : > { %p214_p2 = pnand %p8619_p0, %p213_p1 }
   0x6   : > { %217 = sbr.rel (%p214_p2) target bundleno = 1343 (0x53f), region = 44 }
   0xd   : > { %v10481_v0 = vld [vmem:[%s13673_s1] sm:$0xff]  ;;  %v10486_v1 = vld [vmem:[%s13673_s1 + $0x8] sm:$0xff]  ;;  %v10491_v2 = vld [vmem:[%s13673_s1 + $0x10] sm:$0xff]  ;;  %v10429_v3 = vmov 0.0|0.0   ;;  %vm10430_vm0 = vmmov 0   ;;  %v13690_v11 = vmov 0.0  }
   0xe   : > { %9418 = vmatprep.subr.bf16.mxu0 %v10429_v3  ;;  %9490 = vmatprep.subr.bf16.mxu1 %v10429_v3  ;;  %v460_v4 = vand.u32 4294901760, %v10481_v0  ;;  %v463_v5 = vand.u32 4294901760, %v10486_v1  ;;  %v10500_v6 = vld [vmem:[%s13673_s1 + $0x18] sm:$0xff]  ;;  %v466_v7 = vand.u32 4294901760, %v10491_v2  ;;  %v10506_v8 = vld [vmem:[%s13673_s1 + $0x20] sm:$0xff]  ;;  %v10511_v9 = vld [vmem:[%s13673_s1 + $0x28] sm:$0xff]  ;;  %v1538_v54 = vmul.f32 %v10481_v0, %v10481_v0 }
   0xf   : > { %v469_v10 = vand.u32 4294901760, %v10500_v6  ;;  %9092 = vmatprep.mubr.msk.f32.mxu0 %vm10430_vm0, %v13690_v11  ;;  %9206 = vmatprep.mubr.msk.f32.mxu1 %vm10430_vm0, %v13690_v11  ;;  %vm13721_vm1 = vcmask 523264   ;;  %v454_v13 = vld [vmem:[%s13674_s2] sm:$0x3]  ;;  %v472_v16 = vand.u32 4294901760, %v10506_v8  ;;  %v475_v17 = vand.u32 4294901760, %v10511_v9 }
  0x10   : > { %v10518_v12 = vpack.c.bf16 %v463_v5, %v460_v4  ;;  %v10524_v14 = vsub.f32 %v10481_v0, %v460_v4  ;;  %v996_v15 = vld [vmem:[%s13675_s3] sm:$0x3]  ;;  %v10534_v18 = vld [vmem:[%s13673_s1 + $0x30] sm:$0xff]  ;;  %v457_v19 = vsel %vm13721_vm1, %v454_v13, 0  ;;  %v10538_v20 = vsub.f32 %v10486_v1, %v463_v5  ;;  %v10547_v22 = vld [vmem:[%s13673_s1 + $0x38] sm:$0xff]  ;;  %s8620_s19 = sshll.u32 %s8615_s22, 2 }
  0x11   : > { %v10542_v21 = vpack.c.bf16 %v469_v10, %v466_v7  ;;  %v10549_v23 = vand.u32 4294901760, %v457_v19  ;;  %v998_v25 = vsel %vm13721_vm1, %v996_v15, 0  ;;  %v10559_v28 = vsub.f32 %v10491_v2, %v466_v7  ;;  %p244_p3 = scmp.lt.s32.totalorder %s8620_s19, 15 }
  0x12   : > { %9420 = vmatpush3.bf16.msra.mxu0 %v10518_v12  ;;  %9492 = vmatpush3.bf16.msra.mxu1 %v10518_v12  ;;  %v545_v24 = vand.u32 4294901760, %v10524_v14  ;;  %v552_v26 = vand.u32 4294901760, %v10538_v20  ;;  %v10556_v27 = vand.u32 4294901760, %v998_v25  ;;  %v10562_v29 = vsub.f32 %v10500_v6, %v469_v10 }
  0x13   : > { %9421 = vmatprep.subr.bf16.mxu0 %v10429_v3  ;;  %9493 = vmatprep.subr.bf16.mxu1 %v10429_v3  ;;  %v478_v30 = vand.u32 4294901760, %v10534_v18  ;;  %v10566_v31 = vsub.f32 %v457_v19, %v10549_v23  ;;  %v10569_v32 = vsub.f32 %v10506_v8, %v472_v16  ;;  %v10572_v33 = vsub.f32 %v10511_v9, %v475_v17  ;;  %s14048_s19 = smov (!%p244_p3, %s8620_s19), 15 }
  0x14   : > { %v481_v34 = vand.u32 4294901760, %v10547_v22  ;;  %v10576_v35 = vsub.f32 %v998_v25, %v10556_v27  ;;  %v13684_v36 = vand.u32 4294901760, %v10559_v28  ;;  %v13683_v37 = vand.u32 4294901760, %v10562_v29  ;;  %s8621_s20 = sshll.u32 %s14048_s19, 1 }
  0x15   : > { %v10582_v38 = vpack.c.bf16 %v475_v17, %v472_v16  ;;  %v534_v39 = vand.u32 4294901760, %v10566_v31  ;;  %v546_v40 = vsub.f32 %v10524_v14, %v545_v24  ;;  %v553_v41 = vsub.f32 %v10538_v20, %v552_v26  ;;  %s10795_s25 = scalar_lea.vmem %s13672_s0, %s8621_s20  ;;  %s8622_s20 = sshll.u32 %s8615_s22, 5 }
  0x16   : > { %9423 = vmatpush3.bf16.msra.mxu0 %v10542_v21  ;;  %9495 = vmatpush3.bf16.msra.mxu1 %v10542_v21  ;;  %v1075_v42 = vand.u32 4294901760, %v10576_v35  ;;  %v560_v43 = vsub.f32 %v10559_v28, %v13684_v36  ;;  %v13682_v44 = vand.u32 4294901760, %v10569_v32  ;;  %v13681_v45 = vand.u32 4294901760, %v10572_v33  ;;  %p250_p4 = scmp.lt.s32.totalorder %s8622_s20, 127 }
  0x17   : > { %9424 = vmatprep.subr.bf16.mxu0 %v10429_v3  ;;  %9496 = vmatprep.subr.bf16.mxu1 %v10429_v3  ;;  %v535_v46 = vsub.f32 %v10566_v31, %v534_v39  ;;  %v567_v48 = vsub.f32 %v10562_v29, %v13683_v37  ;;  %v10609_v49 = vsub.f32 %v10534_v18, %v478_v30  ;;  %v547_v51 = vand.u32 4294901760, %v546_v40 }
  0x18   : > { %v1076_v47 = vsub.f32 %v10576_v35, %v1075_v42  ;;  %v10613_v50 = vpack.c.bf16 %v481_v34, %v478_v30  ;;  %v554_v52 = vand.u32 4294901760, %v553_v41  ;;  %v10618_v53 = vsub.f32 %v10547_v22, %v481_v34  ;;  %s14050_s20 = smov (!%p250_p4, %s8622_s20), 127 }
  0x19   : > { %v561_v55 = vand.u32 4294901760, %v560_v43  ;;  %v574_v56 = vsub.f32 %v10569_v32, %v13682_v44  ;;  %v581_v57 = vsub.f32 %v10572_v33, %v13681_v45  ;;  %v536_v58 = vand.u32 4294901760, %v535_v46  ;;  %s8623_s23 = sshll.u32 %s14050_s20, 3 }
  0x1a   : > { %9426 = vmatpush3.bf16.msra.mxu0 %v10582_v38  ;;  %9498 = vmatpush3.bf16.msra.mxu1 %v10582_v38  ;;  %v1077_v59 = vand.u32 4294901760, %v1076_v47  ;;  %v568_v60 = vand.u32 4294901760, %v567_v48  ;;  %v13680_v61 = vand.u32 4294901760, %v10609_v49  ;;  %v9431_v62 = vpack.c.bf16 %v554_v52, %v547_v51  ;;  %s13603_s26 = scalar_lea.vmem %s13678_s6, %s8623_s23 }
  0x1b   : > { %9427 = vmatprep.subr.bf16.mxu0 %v10429_v3  ;;  %9499 = vmatprep.subr.bf16.mxu1 %v10429_v3  ;;  %v13679_v63 = vand.u32 4294901760, %v10618_v53  ;;  %v1539_v4 = vmul.f32 %v10486_v1, %v10486_v1  ;;  %v1550_v5 = vand.u32 4294901760, %v1538_v54  ;;  %v575_v7 = vand.u32 4294901760, %v574_v56 }
  0x1c   : > { %v9434_v10 = vpack.c.bf16 %v568_v60, %v561_v55  ;;  %v582_v13 = vand.u32 4294901760, %v581_v57  ;;  %v588_v15 = vsub.f32 %v10609_v49, %v13680_v61  ;;  %v1540_v19 = vmul.f32 %v10491_v2, %v10491_v2 }
  0x1d   : > { %v1553_v16 = vand.u32 4294901760, %v1539_v4  ;;  %v595_v17 = vsub.f32 %v10618_v53, %v13679_v63  ;;  %v1541_v25 = vmul.f32 %v10500_v6, %v10500_v6  ;;  %v1542_v47 = vmul.f32 %v10506_v8, %v10506_v8 }
  0x1e   : > { %9429 = vmatpush3.bf16.msra.mxu0 %v10613_v50  ;;  %9501 = vmatpush3.bf16.msra.mxu1 %v10613_v50  ;;  %v9437_v34 = vpack.c.bf16 %v582_v13, %v575_v7  ;;  %v589_v40 = vand.u32 4294901760, %v588_v15  ;;  %v1556_v43 = vand.u32 4294901760, %v1540_v19  ;;  %v1543_v48 = vmul.f32 %v10511_v9, %v10511_v9 }
  0x1f   : > { %9430 = vmatprep.subr.bf16.mxu0 %v10429_v3  ;;  %9502 = vmatprep.subr.bf16.mxu1 %v10429_v3  ;;  %v10648_v30 = vpack.c.bf16 %v1553_v16, %v1550_v5  ;;  %v596_v41 = vand.u32 4294901760, %v595_v17  ;;  %v1559_v46 = vand.u32 4294901760, %v1541_v25  ;;  %v1562_v55 = vand.u32 4294901760, %v1542_v47 }
  0x20   : > { %v1544_v56 = vmul.f32 %v10534_v18, %v10534_v18  ;;  %v1565_v57 = vand.u32 4294901760, %v1543_v48  ;;  %v10672_v60 = vsub.f32 %v1539_v4, %v1553_v16  ;;  %v9452_v44 = vpack.c.bf16 %v10618_v53, %v10609_v49 }
  0x21   : > { %9093 = vmatmul.mubr.f32.vlgmr.msra.gmra.mrb[0].mxu0 %v536_v58  ;;  %9207 = vmatmul.mubr.f32.vlgmr.msra.gmra.mrb[0].mxu1 %v1077_v59  ;;  %v9440_v51 = vpack.c.bf16 %v596_v41, %v589_v40  ;;  %v10660_v52 = vpack.c.bf16 %v1559_v46, %v1556_v43  ;;  %v9443_v58 = vpack.c.bf16 %v10538_v20, %v10524_v14  ;;  %v13783_v14 = vand.u32 4294901760, %v10559_v28 }
  0x22   : > { %9432 = vmatpush3.bf16.msra.mxu0 %v9431_v62  ;;  %9504 = vmatpush3.bf16.msra.mxu1 %v9431_v62  ;;  %v10668_v59 = vsub.f32 %v1538_v54, %v1550_v5  ;;  %v10674_v62 = vsub.f32 %v1540_v19, %v1556_v43  ;;  %v10676_v7 = vpack.c.bf16 %v1565_v57, %v1562_v55  ;;  %v1568_v13 = vand.u32 4294901760, %v1544_v56 }
  0x23   : > { %9433 = vmatprep.subr.bf16.mxu0 %v10429_v3  ;;  %9505 = vmatprep.subr.bf16.mxu1 %v10429_v3  ;;  %v9446_v54 = vpack.c.bf16 %v10562_v29, %v10559_v28  ;;  %v10684_v5 = vsub.f32 %v1541_v25, %v1559_v46  ;;  %v10686_v4 = vsub.f32 %v1542_v47, %v1562_v55  ;;  %v1642_v17 = vand.u32 4294901760, %v10672_v60 }
  0x24   : > { %9111 = vmatprep.mubr.msk.f32.mxu0 %vm10430_vm0, %v13690_v11  ;;  %9225 = vmatprep.mubr.msk.f32.mxu1 %vm10430_vm0, %v13690_v11  ;;  %v1635_v16 = vand.u32 4294901760, %v10668_v59  ;;  %v1649_v19 = vand.u32 4294901760, %v10674_v62  ;;  %v10697_v25 = vsub.f32 %v1543_v48, %v1565_v57  ;;  %v10701_v40 = vsub.f32 %v1544_v56, %v1568_v13 }
  0x25   : > { %v1643_v43 = vsub.f32 %v10672_v60, %v1642_v17  ;;  %v9449_v47 = vpack.c.bf16 %v10572_v33, %v10569_v32  ;;  %v1663_v48 = vand.u32 4294901760, %v10686_v4  ;;  %v13784_v20 = vand.u32 4294901760, %v10562_v29 }
  0x26   : > { %9435 = vmatpush3.bf16.msra.mxu0 %v9434_v10  ;;  %9507 = vmatpush3.bf16.msra.mxu1 %v9434_v10  ;;  %v1545_v10 = vmul.f32 %v10547_v22, %v10547_v22  ;;  %v1636_v41 = vsub.f32 %v10668_v59, %v1635_v16  ;;  %v1650_v46 = vsub.f32 %v10674_v62, %v1649_v19  ;;  %v1670_v63 = vand.u32 4294901760, %v10697_v25 }
  0x27   : > { %9436 = vmatprep.subr.bf16.mxu0 %v10429_v3  ;;  %9508 = vmatprep.subr.bf16.mxu1 %v10429_v3  ;;  %v1644_v57 = vand.u32 4294901760, %v1643_v43  ;;  %v1677_v45 = vand.u32 4294901760, %v10701_v40  ;;  %v13785_v28 = vand.u32 4294901760, %v10569_v32  ;;  %v13786_v29 = vand.u32 4294901760, %v10572_v33 }
  0x28   : > { %v1571_v15 = vand.u32 4294901760, %v1545_v10  ;;  %v1637_v56 = vand.u32 4294901760, %v1636_v41  ;;  %v1671_v41 = vsub.f32 %v10697_v25, %v1670_v63  ;;  %v13789_v32 = vand.u32 4294901760, %v10618_v53 }
  0x29   : > { %v1678_v43 = vsub.f32 %v10701_v40, %v1677_v45  ;;  %vm13722_vm11 = vcmask 326656  }
  0x2a   : > { %9438 = vmatpush3.bf16.msra.mxu0 %v9437_v34  ;;  %9510 = vmatpush3.bf16.msra.mxu1 %v9437_v34  ;;  %v10699_v34 = vpack.c.bf16 %v1571_v15, %v1568_v13  ;;  %v10712_v55 = vsub.f32 %v1545_v10, %v1571_v15  ;;  %v10717_v61 = vpack.c.bf16 %v1644_v57, %v1637_v56  ;;  %v1672_v57 = vand.u32 4294901760, %v1671_v41 }
  0x2b   : > { %9439 = vmatprep.subr.bf16.mxu0 %v10429_v3  ;;  %9511 = vmatprep.subr.bf16.mxu1 %v10429_v3  ;;  %v1679_v37 = vand.u32 4294901760, %v1678_v43  ;;  %v10750_v41 = vpack.c.bf16 %v1642_v17, %v1635_v16  ;;  %v10764_v16 = vpack.c.bf16 %v1670_v63, %v1663_v48 }
  0x2e   : > { %9441 = vmatpush3.bf16.msra.mxu0 %v9440_v51  ;;  %9513 = vmatpush3.bf16.msra.mxu1 %v9440_v51  ;;  %v1656_v51 = vand.u32 4294901760, %v10684_v5 }
  0x2f   : > { %9442 = vmatprep.subr.bf16.mxu0 %v10429_v3  ;;  %9514 = vmatprep.subr.bf16.mxu1 %v10429_v3 }
  0x30   : > { %v1657_v13 = vsub.f32 %v10684_v5, %v1656_v51 }
  0x31   : > { %9112 = vmatmul.mubr.f32.vlgmr.msra.gmra.mrb[0].mxu0 %v10549_v23  ;;  %9226 = vmatmul.mubr.f32.vlgmr.msra.gmra.mrb[0].mxu1 %v10556_v27 }
  0x32   : > { %9444 = vmatpush3.bf16.msra.mxu0 %v9443_v58  ;;  %9516 = vmatpush3.bf16.msra.mxu1 %v9443_v58  ;;  %v1651_v58 = vand.u32 4294901760, %v1650_v46  ;;  %v1658_v10 = vand.u32 4294901760, %v1657_v13  ;;  %v1684_v46 = vand.u32 4294901760, %v10712_v55 }
  0x33   : > { %9445 = vmatprep.subr.bf16.mxu0 %v10429_v3  ;;  %9517 = vmatprep.subr.bf16.mxu1 %v10429_v3 }
  0x34   : > { %9130 = vmatprep.mubr.msk.f32.mxu0 %vm10430_vm0, %v13690_v11  ;;  %9244 = vmatprep.mubr.msk.f32.mxu1 %vm10430_vm0, %v13690_v11  ;;  %v10727_v56 = vpack.c.bf16 %v1658_v10, %v1651_v58  ;;  %v10766_v17 = vpack.c.bf16 %v1684_v46, %v1677_v45  ;;  %v9467_v45 = vpack.c.bf16 %v552_v26, %v545_v24 }
  0x35   : > { %v9470_v24 = vpack.c.bf16 %v13784_v20, %v13783_v14  ;;  %v1537_v14 = vld [vmem:[%s13676_s4] sm:$0x3] }
  0x36   : > { %9447 = vmatpush3.bf16.msra.mxu0 %v9446_v54  ;;  %9519 = vmatpush3.bf16.msra.mxu1 %v9446_v54  ;;  %v1664_v54 = vsub.f32 %v10686_v4, %v1663_v48 }
  0x37   : > { %9448 = vmatprep.subr.bf16.mxu0 %v10429_v3  ;;  %9520 = vmatprep.subr.bf16.mxu1 %v10429_v3 }
  0x38   : > { %v1665_v15 = vand.u32 4294901760, %v1664_v54 }
  0x3a   : > { %9450 = vmatpush3.bf16.msra.mxu0 %v9449_v47  ;;  %9522 = vmatpush3.bf16.msra.mxu1 %v9449_v47  ;;  %v1685_v47 = vsub.f32 %v10712_v55, %v1684_v46  ;;  %v10730_v13 = vpack.c.bf16 %v1672_v57, %v1665_v15 }
  0x3b   : > { %9451 = vmatprep.subr.bf16.mxu0 %v10429_v3  ;;  %9523 = vmatprep.subr.bf16.mxu1 %v10429_v3 }
  0x3c   : > { %v1686_v58 = vand.u32 4294901760, %v1685_v47 }
  0x3e   : > { %9453 = vmatpush3.bf16.msra.mxu0 %v9452_v44  ;;  %9525 = vmatpush3.bf16.msra.mxu1 %v9452_v44  ;;  %v10742_v44 = vpack.c.bf16 %v1686_v58, %v1679_v37  ;;  %v10758_v37 = vpack.c.bf16 %v1656_v51, %v1649_v19  ;;  %v256_v19 = vlaneseq  ;;  %v13788_v51 = vand.u32 4294901760, %v10609_v49 }
  0x3f   : > { %9454 = vmatprep.subr.bf16.mxu0 %v10429_v3  ;;  %9526 = vmatprep.subr.bf16.mxu1 %v10429_v3 }
  0x40   : > { %v10784_v63 = vshrl.u32 %v256_v19, 7  ;;  %v9476_v48 = vpack.c.bf16 %v13789_v32, %v13788_v51  ;;  %v1547_v51 = vsel %vm13721_vm1, %v1537_v14, 0 }
  0x41   : > { %9131 = vmatmul.mubr.f32.vlgmr.msra.gmra.mrb[0].mxu0 %v10566_v31  ;;  %9245 = vmatmul.mubr.f32.vlgmr.msra.gmra.mrb[0].mxu1 %v10576_v35  ;;  %v9473_v31 = vpack.c.bf16 %v13786_v29, %v13785_v28  ;;  %v10807_v35 = vld [vmem:[%s10795_s25] sm:$0xff] }
  0x42   : > { %9456 = vmatpush3.bf16.msra.mxu0 %v10518_v12  ;;  %9528 = vmatpush3.bf16.msra.mxu1 %v10518_v12  ;;  %13782 = vst [vmem:[#allocation2_spill] sm:$0xff] %v10784_v63  ;;  %v268_v26 = vsub.s32 2, %v10784_v63  ;;  %v10824_v43 = vadd.s32 8, %v10784_v63  ;;  %v10841_v53 = vadd.s32 16, %v10784_v63  ;;  %v10844_v57 = vadd.s32 24, %v10784_v63 }
  0x43   : > { %9457 = vmatprep.subr.bf16.mxu0 %v10429_v3  ;;  %9529 = vmatprep.subr.bf16.mxu1 %v10429_v3  ;;  %v10894_v20 = vadd.s32 32, %v10784_v63 }
  0x44   : > { %9149 = vmatprep.mubr.msk.f32.mxu0 %vm10430_vm0, %v13690_v11  ;;  %9263 = vmatprep.mubr.msk.f32.mxu1 %vm10430_vm0, %v13690_v11  ;;  %13790 = vst [vmem:[#allocation4_spill] sm:$0xff] %v10824_v43  ;;  %13791 = vst [vmem:[#allocation5_spill] sm:$0xff] %v10841_v53 }
  0x45   : > { %13792 = vst [vmem:[#allocation6_spill] sm:$0xff] %v10844_v57  ;;  %13793 = vst [vmem:[#allocation7_spill] sm:$0xff] %v10894_v20 }
  0x46   : > { %9459 = vmatpush3.bf16.msra.mxu0 %v10542_v21  ;;  %9531 = vmatpush3.bf16.msra.mxu1 %v10542_v21 }
  0x47   : > { %9460 = vmatprep.subr.bf16.mxu0 %v10429_v3  ;;  %9532 = vmatprep.subr.bf16.mxu1 %v10429_v3 }
  0x4a   : > { %9462 = vmatpush3.bf16.msra.mxu0 %v10582_v38  ;;  %9534 = vmatpush3.bf16.msra.mxu1 %v10582_v38 }
  0x4b   : > { %9463 = vmatprep.subr.bf16.mxu0 %v10429_v3  ;;  %9535 = vmatprep.subr.bf16.mxu1 %v10429_v3 }
  0x4e   : > { %9465 = vmatpush3.bf16.msra.mxu0 %v10613_v50  ;;  %9537 = vmatpush3.bf16.msra.mxu1 %v10613_v50 }
  0x4f   : > { %9466 = vmatprep.subr.bf16.mxu0 %v10429_v3  ;;  %9538 = vmatprep.subr.bf16.mxu1 %v10429_v3 }
  0x51   : > { %9150 = vmatmul.mubr.f32.vlgmr.msra.gmra.mrb[0].mxu0 %v534_v39  ;;  %9264 = vmatmul.mubr.f32.vlgmr.msra.gmra.mrb[0].mxu1 %v1075_v42  ;;  %v10812_v39 = vsub.s32 0, %v10784_v63  ;;  %v269_v42 = vrot.slane %v10807_v35, %v268_v26 }
  0x52   : > { %9468 = vmatpush3.bf16.msra.mxu0 %v9467_v45  ;;  %9540 = vmatpush3.bf16.msra.mxu1 %v9467_v45 }
  0x53   : > { %9469 = vmatprep.subr.bf16.mxu0 %v10429_v3  ;;  %9541 = vmatprep.subr.bf16.mxu1 %v10429_v3  ;;  %13787 = vst [vmem:[#allocation3_spill] sm:$0xff] %v10812_v39  ;;  %v265_v33 = vrot.slane %v10807_v35, %v10812_v39  ;;  %v10827_v46 = vrot.slane %v269_v42, %v10812_v39 }
  0x54   : > { %9168 = vmatprep.mubr.msk.f32.mxu0 %vm10430_vm0, %v13690_v11  ;;  %9282 = vmatprep.mubr.msk.f32.mxu1 %vm10430_vm0, %v13690_v11 }
  0x55   : > { %v10832_v49 = vrot.slane %v265_v33, %v10812_v39  ;;  %vm295_vm2 = vcmp.eq.s32.totalorder %v10784_v63, %v10827_v46  ;;  %vm299_vm3 = vcmp.eq.s32.totalorder %v10824_v43, %v10827_v46  ;;  %vm303_vm6 = vcmp.eq.s32.totalorder %v10841_v53, %v10827_v46 }
  0x56   : > { %9471 = vmatpush3.bf16.msra.mxu0 %v9470_v24  ;;  %9543 = vmatpush3.bf16.msra.mxu1 %v9470_v24  ;;  %v8625_v47 = vsel %vm295_vm2, 1.0, %v13690_v11  ;;  %vm307_vm7 = vcmp.eq.s32.totalorder %v10844_v57, %v10827_v46  ;;  %v8633_v24 = vsel %vm303_vm6, 1.0, %v13690_v11  ;;  %vm10931_vm10 = vcmp.eq.s32.totalorder %v10894_v20, %v10827_v46  ;;  %vm11019_vm13 = vmpackc.low %vm299_vm3, %vm295_vm2 }
  0x57   : > { %9472 = vmatprep.subr.bf16.mxu0 %v10429_v3  ;;  %9544 = vmatprep.subr.bf16.mxu1 %v10429_v3  ;;  %vm294_vm4 = vcmp.eq.s32.totalorder %v10784_v63, %v10832_v49  ;;  %vm298_vm5 = vcmp.eq.s32.totalorder %v10824_v43, %v10832_v49  ;;  %vm302_vm8 = vcmp.eq.s32.totalorder %v10841_v53, %v10832_v49  ;;  %v8637_v26 = vsel %vm307_vm7, 1.0, %v13690_v11  ;;  %vm11044_vm15 = vmpackc.low %vm307_vm7, %vm303_vm6 }
  0x58   : > { %vm306_vm9 = vcmp.eq.s32.totalorder %v10844_v57, %v10832_v49  ;;  %v10878_v58 = vsub.f32 %v8625_v47, %v8625_v47  ;;  %v8624_v45 = vsel %vm294_vm4, 1.0, %v13690_v11  ;;  %v8632_v28 = vsel %vm302_vm8, 1.0, %v13690_v11  ;;  %vm11032_vm14 = vmpackc.low %vm298_vm5, %vm294_vm4 }
  0x59   : > { %v8636_v29 = vsel %vm306_vm9, 1.0, %v13690_v11  ;;  %v10927_v33 = vsub.f32 %v8637_v26, %v8637_v26  ;;  %v10935_v47 = vsub.f32 %v8632_v28, %v8632_v28  ;;  %vm10960_vm12 = vcmp.eq.s32.totalorder %v10894_v20, %v10832_v49  ;;  %vm11070_vm2 = vmpackc.low %vm306_vm9, %vm302_vm8 }
  0x5a   : > { %9474 = vmatpush3.bf16.msra.mxu0 %v9473_v31  ;;  %9546 = vmatpush3.bf16.msra.mxu1 %v9473_v31  ;;  %v10914_v31 = vsub.f32 %v8624_v45, %v8624_v45  ;;  %v10939_v45 = vand.u32 4294901760, %v1547_v51  ;;  %v13702_v20 = vmov 1.0|1.0   ;;  %v2100_v53 = vsel %vm13722_vm11, %v10506_v8, 0 }
  0x5b   : > { %9475 = vmatprep.subr.bf16.mxu0 %v10429_v3  ;;  %9547 = vmatprep.subr.bf16.mxu1 %v10429_v3  ;;  %v13685_v14 = vand.u32 4294901760, %v10935_v47 }
  0x5c   : > { %v10975_v36 = vsub.f32 %v1547_v51, %v10939_v45 }
  0x5d   : > { %v2307_v15 = vsub.f32 %v10935_v47, %v13685_v14 }
  0x5e   : > { %9477 = vmatpush3.bf16.msra.mxu0 %v9476_v48  ;;  %9549 = vmatpush3.bf16.msra.mxu1 %v9476_v48  ;;  %v10925_v48 = vsub.f32 %v8633_v24, %v8633_v24 }
  0x5f   : > { %9478 = vmatprep.subr.bf16.mxu0 %v10429_v3  ;;  %9550 = vmatprep.subr.bf16.mxu1 %v10429_v3  ;;  %v2308_v14 = vand.u32 4294901760, %v2307_v15  ;;  %v13689_v15 = vand.u32 4294901760, %v10975_v36 }
  0x60   : > { %v10953_v26 = vpack.c.bf16 %v10927_v33, %v10925_v48 }
  0x61   : > { %9169 = vmatmul.mubr.f32.vlgmr.msra.gmra.mrb[0].mxu0 %v10549_v23  ;;  %9283 = vmatmul.mubr.f32.vlgmr.msra.gmra.mrb[0].mxu1 %v10556_v27 }
  0x62   : > { %9480 = vmatpush3.bf16.msra.mxu0 %v10518_v12  ;;  %9552 = vmatpush3.bf16.msra.mxu1 %v10518_v12  ;;  %v8629_v12 = vsel %vm299_vm3, 1.0, %v13690_v11  ;;  %13798 = vst [vmem:[#allocation10_spill] sm:$0xff] %v10953_v26 }
  0x63   : > { %9481 = vmatprep.subr.bf16.mxu0 %v10429_v3  ;;  %9553 = vmatprep.subr.bf16.mxu1 %v10429_v3  ;;  %v10880_v19 = vsub.f32 %v8629_v12, %v8629_v12  ;;  %v10937_v12 = vsub.f32 %v8636_v29, %v8636_v29  ;;  %v2088_v29 = vsel %vm13722_vm11, %v10481_v0, 0 }
  0x64   : > { %9187 = vmatprep.mubr.msk.f32.mxu0 %vm10430_vm0, %v13690_v11  ;;  %9301 = vmatprep.mubr.msk.f32.mxu1 %vm10430_vm0, %v13690_v11  ;;  %v10990_v51 = vand.u32 4294901760, %v2088_v29 }
  0x65   : > { %v10923_v32 = vpack.c.bf16 %v10880_v19, %v10878_v58  ;;  %v13686_v24 = vand.u32 4294901760, %v10937_v12  ;;  %v10981_v0 = vpack.c.bf16 %v10937_v12, %v10935_v47 }
  0x66   : > { %9483 = vmatpush3.bf16.msra.mxu0 %v10542_v21  ;;  %9555 = vmatpush3.bf16.msra.mxu1 %v10542_v21  ;;  %v8628_v21 = vsel %vm298_vm5, 1.0, %v13690_v11 }
  0x67   : > { %9484 = vmatprep.subr.bf16.mxu0 %v10429_v3  ;;  %9556 = vmatprep.subr.bf16.mxu1 %v10429_v3  ;;  %v10916_v42 = vsub.f32 %v8628_v21, %v8628_v21  ;;  %13794 = vst [vmem:[#allocation8_spill] sm:$0xff] %v10923_v32  ;;  %v2319_v10 = vsub.f32 %v10937_v12, %v13686_v24  ;;  %13801 = vst [vmem:[#allocation11_spill] sm:$0xff] %v10981_v0  ;;  %v2091_v24 = vsel %vm13722_vm11, %v10486_v1, 0 }
  0x68   : > { %v11009_v1 = vand.u32 4294901760, %v2091_v24 }
  0x69   : > { %v10945_v21 = vpack.c.bf16 %v10916_v42, %v10914_v31  ;;  %v2320_v54 = vand.u32 4294901760, %v2319_v10 }
  0x6a   : > { %9486 = vmatpush3.bf16.msra.mxu0 %v10582_v38  ;;  %9558 = vmatpush3.bf16.msra.mxu1 %v10582_v38  ;;  %v13968_v38 = vld [vmem:[#allocation5_spill] sm:$0xff] }
  0x6b   : > { %9487 = vmatprep.subr.bf16.mxu0 %v10429_v3  ;;  %9559 = vmatprep.subr.bf16.mxu1 %v10429_v3  ;;  %13797 = vst [vmem:[#allocation9_spill] sm:$0xff] %v10945_v21  ;;  %v10997_v10 = vpack.c.bf16 %v2320_v54, %v2308_v14  ;;  %v2094_v54 = vsel %vm13722_vm11, %v10491_v2, 0  ;;  %v13803_v14 = vmov 0 }
  0x6c   : > { %v13804_v14 = vsel %vm11019_vm13, 4294967295, %v13803_v14 }
  0x6d   : > { %13802 = vst [vmem:[#allocation12_spill] sm:$0xff] %v10997_v10 }
  0x6e   : > { %9489 = vmatpush3.bf16.msra.mxu0 %v10613_v50  ;;  %9561 = vmatpush3.bf16.msra.mxu1 %v10613_v50  ;;  %v8641_v50 = vsel %vm10931_vm10, 1.0, %v13690_v11 }
  0x6f   : > { %9562 = vmatprep.subr.bf16.mxu0 %v10429_v3  ;;  %9651 = vmatprep.subr.bf16.mxu1 %v10923_v32 }
  0x71   : > { %9188 = vmatmul.mubr.f32.vlgmr.msra.gmra.mrb[0].mxu0 %v10549_v23  ;;  %9302 = vmatmul.mubr.f32.vlgmr.msra.gmra.mrb[0].mxu1 %v10556_v27  ;;  %v10985_v23 = vsub.f32 %v8641_v50, %v8641_v50  ;;  %v8640_v27 = vsel %vm10960_vm12, 1.0, %v13690_v11 }
  0x72   : > { %9564 = vmatpush3.bf16.msra.mxu0 %v10648_v30  ;;  %9653 = vmatpush1.bf16.msra.mxu1 %v10945_v21  ;;  %v11002_v50 = vsub.f32 %v8640_v27, %v8640_v27  ;;  %v2097_v21 = vsel %vm13722_vm11, %v10500_v6, 0  ;;  %v13707_v6 = vand.u32 4294901760, %v10878_v58  ;;  %v13967_v27 = vld [vmem:[#allocation4_spill] sm:$0xff] }
  0x73   : > { %9565 = vmatprep.subr.bf16.mxu0 %v10429_v3  ;;  %9655 = vmatprep.subr.bf16.mxu1 %v10953_v26  ;;  %v11007_v26 = vsub.f32 %v2088_v29, %v10990_v51  ;;  %v1625_v29 = vsub.f32 %v10975_v36, %v13689_v15  ;;  %v11051_v15 = vsub.f32 %v2091_v24, %v11009_v1  ;;  %v11085_v57 = vand.u32 4294901760, %v2097_v21  ;;  %v13969_v24 = vld [vmem:[#allocation6_spill] sm:$0xff] }
  0x74   : > { %2529 = vmatprep.mubr.f32.mxu1 %v13690_v11  ;;  %9320 = vmatprep.mubr.msk.f32.mxu0 %vm10430_vm0, %v13690_v11  ;;  %v11053_v11 = vand.u32 4294901760, %v2094_v54 }
  0x75   : > { %v1626_v46 = vand.u32 4294901760, %v1625_v29  ;;  %v13704_v29 = vand.u32 4294901760, %v10880_v19  ;;  %v11105_v8 = vsub.f32 %v2097_v21, %v11085_v57 }
  0x76   : > { %9567 = vmatpush3.bf16.msra.mxu0 %v10660_v52  ;;  %9657 = vmatpush1.bf16.msra.mxu1 %v10981_v0  ;;  %v13809_v0 = vmov 0.0   ;;  %v11083_v49 = vsub.f32 %v2094_v54, %v11053_v11 }
  0x77   : > { %9568 = vmatprep.subr.bf16.mxu0 %v10429_v3  ;;  %2471 = vmatprep.subr.mxu1 %v10985_v23  ;;  %v11100_v54 = vpack.c.bf16 %v13704_v29, %v13707_v6  ;;  %13812 = vst [vmem:[#allocation13_spill] sm:$0xff] %v11105_v8  ;;  %v2106_v29 = vsel %vm13722_vm11, %v10534_v18, 0  ;;  %v13710_v6 = vand.u32 4294901760, %v10925_v48 }
  0x7a   : > { %9570 = vmatpush3.bf16.msra.mxu0 %v10676_v7  ;;  %2474 = vmatpush1.msra.mxu1 %v11002_v50 }
  0x7b   : > { %2532 = vmatmul.mubr.f32.vlgmr.msra.gmra.mrb[2].mxu1 %v11007_v26  ;;  %9571 = vmatprep.subr.bf16.mxu0 %v10429_v3 }
  0x7c   : > { %2537 = vmatprep.mubr.f32.mxu1 %v13809_v0  ;;  %9659 = vmatprep.subr.msk.bf16.mxu1 %vm11019_vm13, %v13702_v20 }
  0x7d   : > { %9661 = vmatpush1.bf16.msk.msra.mxu1 %vm11032_vm14, %v13702_v20 }
  0x7e   : > { %9573 = vmatpush3.bf16.msra.mxu0 %v10699_v34  ;;  %9663 = vmatprep.subr.msk.bf16.mxu1 %vm11044_vm15, %v13702_v20 }
  0x7f   : > { %2540 = vmatmul.mubr.f32.gmra.mrb[4].mxu1 %v11051_v15  ;;  %9574 = vmatprep.subr.bf16.mxu0 %v10429_v3 }
  0x80   : > { %2545 = vmatprep.mubr.f32.mxu1 %v13809_v0 }
  0x81   : > { %9321 = vmatmul.mubr.f32.vlgmr.msra.gmra.mrb[2].mxu0 %v1626_v46  ;;  %9665 = vmatpush1.bf16.msk.msra.mxu1 %vm11070_vm2, %v13702_v20  ;;  %v11107_v46 = vand.u32 4294901760, %v2100_v53  ;;  %v13705_v20 = vmov 1.0  }
  0x82   : > { %9576 = vmatpush3.bf16.msra.mxu0 %v10717_v61  ;;  %9339 = vmatprep.mubr.msk.f32.mxu0 %vm10430_vm0, %v13809_v0  ;;  %v2103_v61 = vsel %vm13722_vm11, %v10511_v9, 0 }
  0x83   : > { %2548 = vmatmul.mubr.f32.gmra.mrb[6].mxu1 %v11083_v49  ;;  %9577 = vmatprep.subr.bf16.mxu0 %v10429_v3  ;;  %v11123_v21 = vsub.f32 %v2100_v53, %v11107_v46  ;;  %v11125_v9 = vand.u32 4294901760, %v2103_v61  ;;  %v2109_v53 = vsel %vm13722_vm11, %v10547_v22, 0 }
  0x84   : > { %2553 = vmatprep.mubr.f32.mxu1 %v13809_v0  ;;  %8682 = vmatprep.subr.msk.mxu1 %vm10931_vm10, %v13705_v20 }
  0x85   : > { %8683 = vmatpush1.msk.msra.mxu1 %vm10960_vm12, %v13705_v20  ;;  %13813 = vst [vmem:[#allocation14_spill] sm:$0xff] %v11123_v21  ;;  %v11136_v20 = vand.u32 4294901760, %v2106_v29 }
  0x86   : > { %9579 = vmatpush3.bf16.msra.mxu0 %v10727_v56  ;;  %9667 = vmatprep.subr.bf16.mxu1 %v11100_v54  ;;  %v11134_v56 = vsub.f32 %v2103_v61, %v11125_v9  ;;  %v13816_v61 = vpack.c.bf16 %v10672_v60, %v10668_v59  ;;  %v13709_v59 = vand.u32 4294901760, %v10927_v33  ;;  %v13818_v60 = vpack.c.bf16 %v10684_v5, %v10674_v62 }
  0x87   : > { %2556 = vmatmul.mubr.f32.gmra.mrb[8].mxu1 %v11105_v8  ;;  %9580 = vmatprep.subr.bf16.mxu0 %v10429_v3  ;;  %v11145_v18 = vsub.f32 %v2106_v29, %v11136_v20  ;;  %v13708_v29 = vand.u32 4294901760, %v10916_v42  ;;  %v13820_v5 = vpack.c.bf16 %v10697_v25, %v10686_v4  ;;  %v11205_v4 = vand.u32 4294901760, %v10985_v23 }
  0x88   : > { %2561 = vmatprep.mubr.f32.mxu1 %v13809_v0  ;;  %13814 = vst [vmem:[#allocation15_spill] sm:$0xff] %v11134_v56  ;;  %v11185_v62 = vpack.c.bf16 %v13709_v59, %v13710_v6  ;;  %v13823_v59 = vand.u32 4294901760, %v10937_v12  ;;  %v13826_v25 = vpack.c.bf16 %v10712_v55, %v10701_v40  ;;  %v11228_v40 = vand.u32 4294901760, %v11105_v8 }
  0x89   : > { %13815 = vst [vmem:[#allocation16_spill] sm:$0xff] %v11145_v18  ;;  %13825 = vst [vmem:[#allocation21_spill] sm:$0xff] %v11205_v4  ;;  %v13830_v55 = vmov 1.0|1.0   ;;  %v11239_v12 = vand.u32 4294901760, %v11123_v21 }
  0x8a   : > { %9582 = vmatpush3.bf16.msra.mxu0 %v10730_v13  ;;  %v11147_v13 = vand.u32 4294901760, %v2109_v53  ;;  %13829 = vst [vmem:[#allocation24_spill] sm:$0xff] %v11228_v40 }
  0x8b   : > { %2564 = vmatmul.mubr.f32.gmra.mrb[10].mxu1 %v11123_v21  ;;  %9583 = vmatprep.subr.bf16.mxu0 %v10429_v3  ;;  %13831 = vst [vmem:[#allocation25_spill] sm:$0xff] %v11239_v12 }
  0x8c   : > { %2569 = vmatprep.mubr.f32.mxu1 %v13809_v0  ;;  %v11159_v22 = vsub.f32 %v2109_v53, %v11147_v13  ;;  %v11172_v53 = vand.u32 4294901760, %v11007_v26 }
  0x8e   : > { %9585 = vmatpush3.bf16.msra.mxu0 %v10742_v44  ;;  %13817 = vst [vmem:[#allocation17_spill] sm:$0xff] %v11159_v22  ;;  %v13711_v44 = vand.u32 4294901760, %v10914_v31  ;;  %13819 = vst [vmem:[#allocation18_spill] sm:$0xff] %v11172_v53 }
  0x8f   : > { %2572 = vmatmul.mubr.f32.gmra.mrb[12].mxu1 %v11134_v56  ;;  %9586 = vmatprep.subr.bf16.mxu0 %v10429_v3 }
  0x90   : > { %2577 = vmatprep.mubr.f32.mxu1 %v13809_v0 }
  0x91   : > { %9340 = vmatmul.mubr.f32.vlgmr.msra.gmra.mrb[2].mxu0 %v10939_v45 }
  0x92   : > { %9588 = vmatpush3.bf16.msra.mxu0 %v13816_v61  ;;  %9358 = vmatprep.mubr.msk.f32.mxu0 %vm10430_vm0, %v13809_v0  ;;  %v11179_v61 = vpack.c.bf16 %v13708_v29, %v13711_v44  ;;  %v13822_v29 = vand.u32 4294901760, %v10935_v47  ;;  %v11218_v47 = vand.u32 4294901760, %v11002_v50  ;;  %v11264_v44 = vand.u32 4294901760, %v11159_v22 }
  0x93   : > { %2580 = vmatmul.mubr.f32.gmra.mrb[14].mxu1 %v11145_v18  ;;  %9589 = vmatprep.subr.bf16.mxu0 %v10429_v3 }
  0x94   : > { %2585 = vmatprep.mubr.f32.mxu1 %v13809_v0  ;;  %v11201_v6 = vpack.c.bf16 %v13823_v59, %v13822_v29  ;;  %13828 = vst [vmem:[#allocation23_spill] sm:$0xff] %v11218_v47  ;;  %v11246_v29 = vand.u32 4294901760, %v11134_v56  ;;  %v11253_v59 = vand.u32 4294901760, %v11145_v18  ;;  %13835 = vst [vmem:[#allocation28_spill] sm:$0xff] %v11264_v44 }
  0x96   : > { %9591 = vmatpush3.bf16.msra.mxu0 %v13818_v60  ;;  %v11193_v60 = vand.u32 4294901760, %v11051_v15  ;;  %13824 = vst [vmem:[#allocation20_spill] sm:$0xff] %v11201_v6  ;;  %13832 = vst [vmem:[#allocation26_spill] sm:$0xff] %v11246_v29 }
  0x97   : > { %2588 = vmatmul.mubr.f32.gmra.mrb[16].mxu1 %v11159_v22  ;;  %9592 = vmatprep.subr.bf16.mxu0 %v10429_v3  ;;  %13833 = vst [vmem:[#allocation27_spill] sm:$0xff] %v11253_v59 }
  0x98   : > { %2668 = vmatprep.mubr.f32.mxu1 %v13809_v0  ;;  %13821 = vst [vmem:[#allocation19_spill] sm:$0xff] %v11193_v60 }
  0x9a   : > { %9594 = vmatpush3.bf16.msra.mxu0 %v13820_v5  ;;  %v11213_v5 = vand.u32 4294901760, %v11083_v49 }
  0x9b   : > { %2672 = vmatmul.mubr.f32.vlgmr.msra.gmra.mrb[2].mxu1 %v11172_v53  ;;  %9595 = vmatprep.subr.bf16.mxu0 %v10429_v3 }
  0x9c   : > { %2677 = vmatprep.mubr.f32.mxu1 %v13809_v0  ;;  %9669 = vmatpush1.bf16.msra.mxu1 %v11179_v61  ;;  %13827 = vst [vmem:[#allocation22_spill] sm:$0xff] %v11213_v5 }
  0x9d   : > { %9671 = vmatprep.subr.bf16.mxu1 %v11185_v62 }
  0x9e   : > { %9597 = vmatpush3.bf16.msra.mxu0 %v13826_v25  ;;  %v13834_v25 = vand.u32 4294901760, %v10975_v36 }
  0x9f   : > { %2681 = vmatmul.mubr.f32.gmra.mrb[4].mxu1 %v11193_v60  ;;  %9598 = vmatprep.subr.bf16.mxu0 %v10429_v3 }
  0xa0   : > { %2686 = vmatprep.mubr.f32.mxu1 %v13809_v0  ;;  %9673 = vmatpush1.bf16.msra.mxu1 %v11201_v6 }
  0xa1   : > { %9359 = vmatmul.mubr.f32.vlgmr.msra.gmra.mrb[2].mxu0 %v10975_v36  ;;  %2776 = vmatprep.subr.mxu1 %v11205_v4  ;;  %v13836_v36 = vand.u32 4294901760, %v10878_v58 }
  0xa2   : > { %9600 = vmatpush3.bf16.msra.mxu0 %v10648_v30  ;;  %9377 = vmatprep.mubr.msk.f32.mxu0 %vm10430_vm0, %v13809_v0 }
  0xa3   : > { %2690 = vmatmul.mubr.f32.gmra.mrb[6].mxu1 %v11213_v5  ;;  %9601 = vmatprep.subr.bf16.mxu0 %v10429_v3 }
  0xa4   : > { %2695 = vmatprep.mubr.f32.mxu1 %v13809_v0  ;;  %2780 = vmatpush1.msra.mxu1 %v11218_v47 }
  0xa5   : > { %9675 = vmatprep.subr.msk.bf16.mxu1 %vm11019_vm13, %v13830_v55 }
  0xa6   : > { %9603 = vmatpush3.bf16.msra.mxu0 %v10660_v52 }
  0xa7   : > { %2699 = vmatmul.mubr.f32.gmra.mrb[8].mxu1 %v11228_v40  ;;  %9604 = vmatprep.subr.bf16.mxu0 %v10429_v3 }
  0xa8   : > { %2704 = vmatprep.mubr.f32.mxu1 %v13809_v0 }
  0xaa   : > { %9606 = vmatpush3.bf16.msra.mxu0 %v10676_v7 }
  0xab   : > { %2708 = vmatmul.mubr.f32.gmra.mrb[10].mxu1 %v11239_v12  ;;  %9607 = vmatprep.subr.bf16.mxu0 %v10429_v3 }
  0xac   : > { %2713 = vmatprep.mubr.f32.mxu1 %v13809_v0 }
  0xae   : > { %9609 = vmatpush3.bf16.msra.mxu0 %v10699_v34 }
  0xaf   : > { %2717 = vmatmul.mubr.f32.gmra.mrb[12].mxu1 %v11246_v29  ;;  %9610 = vmatprep.subr.bf16.mxu0 %v10429_v3 }
  0xb0   : > { %2722 = vmatprep.mubr.f32.mxu1 %v13809_v0 }
  0xb1   : > { %9378 = vmatmul.mubr.f32.vlgmr.msra.gmra.mrb[2].mxu0 %v13834_v25  ;;  %v13837_v25 = vand.u32 4294901760, %v10880_v19 }
  0xb2   : > { %9612 = vmatpush3.bf16.msra.mxu0 %v10750_v41  ;;  %9396 = vmatprep.mubr.msk.f32.mxu0 %vm10430_vm0, %v13809_v0  ;;  %v2277_v41 = vsub.f32 %v10878_v58, %v13836_v36 }
  0xb3   : > { %2726 = vmatmul.mubr.f32.gmra.mrb[14].mxu1 %v11253_v59  ;;  %9613 = vmatprep.subr.bf16.mxu0 %v10429_v3 }
  0xb4   : > { %2731 = vmatprep.mubr.f32.mxu1 %v13809_v0 }
  0xb6   : > { %9615 = vmatpush3.bf16.msra.mxu0 %v10758_v37  ;;  %v2289_v37 = vsub.f32 %v10880_v19, %v13837_v25  ;;  %v13838_v19 = vmov 1.0  }
  0xb7   : > { %2735 = vmatmul.mubr.f32.gmra.mrb[16].mxu1 %v11264_v44  ;;  %9616 = vmatprep.subr.bf16.mxu0 %v10429_v3 }
  0xb8   : > { %2835 = vmatprep.mubr.f32.mxu1 %v13809_v0  ;;  %v2290_v58 = vand.u32 4294901760, %v2289_v37 }
  0xba   : > { %9618 = vmatpush3.bf16.msra.mxu0 %v10764_v16  ;;  %v2278_v16 = vand.u32 4294901760, %v2277_v41 }
  0xbb   : > { %2837 = vmatmul.mubr.f32.vlgmr.msra.gmra.mrb[2].mxu1 %v10990_v51  ;;  %9619 = vmatprep.subr.bf16.mxu0 %v10429_v3 }
  0xbc   : > { %2842 = vmatprep.mubr.f32.mxu1 %v13809_v0  ;;  %9677 = vmatpush1.bf16.msk.msra.mxu1 %vm11032_vm14, %v13830_v55 }
  0xbd   : > { %9679 = vmatprep.subr.msk.bf16.mxu1 %vm11044_vm15, %v13830_v55 }
  0xbe   : > { %9621 = vmatpush3.bf16.msra.mxu0 %v10766_v17  ;;  %v11303_v17 = vpack.c.bf16 %v2290_v58, %v2278_v16  ;;  %v276_v16 = vsub.s32 6, %v10784_v63 }
  0xbf   : > { %2844 = vmatmul.mubr.f32.gmra.mrb[4].mxu1 %v11009_v1  ;;  %9622 = vmatprep.subr.bf16.mxu0 %v10429_v3 }
  0xc0   : > { %2849 = vmatprep.mubr.f32.mxu1 %v13809_v0  ;;  %9681 = vmatpush1.bf16.msk.msra.mxu1 %vm11070_vm2, %v13830_v55  ;;  %13839 = vst [vmem:[#allocation29_spill] sm:$0xff] %v11303_v17 }
  0xc1   : > { %9397 = vmatmul.mubr.f32.vlgmr.msra.gmra.mrb[2].mxu0 %v10939_v45  ;;  %8692 = vmatprep.subr.msk.mxu1 %vm10931_vm10, %v13838_v19 }
  0xc2   : > { %9624 = vmatpush3.bf16.msra.mxu0 %v10648_v30  ;;  %9415 = vmatprep.mubr.msk.f32.mxu0 %vm10430_vm0, %v13809_v0 }
  0xc3   : > { %2851 = vmatmul.mubr.f32.gmra.mrb[6].mxu1 %v11053_v11  ;;  %9625 = vmatprep.subr.bf16.mxu0 %v10429_v3 }
  0xc4   : > { %2856 = vmatprep.mubr.f32.mxu1 %v13809_v0  ;;  %8693 = vmatpush1.msk.msra.mxu1 %vm10960_vm12, %v13838_v19 }
  0xc5   : > { %9739 = vmatprep.subr.bf16.mxu1 %v11303_v17 }
  0xc6   : > { %9627 = vmatpush3.bf16.msra.mxu0 %v10660_v52  ;;  %v13841_v52 = vand.u32 4294901760, %v10916_v42 }
  0xc7   : > { %2858 = vmatmul.mubr.f32.gmra.mrb[8].mxu1 %v11085_v57  ;;  %9628 = vmatprep.subr.bf16.mxu0 %v10429_v3 }
  0xc8   : > { %2863 = vmatprep.mubr.f32.mxu1 %v13809_v0 }
  0xca   : > { %9630 = vmatpush3.bf16.msra.mxu0 %v10676_v7  ;;  %v2295_v7 = vsub.f32 %v10916_v42, %v13841_v52  ;;  %v2211_v52 = vsub.f32 %v11083_v49, %v11213_v5 }
  0xcb   : > { %2865 = vmatmul.mubr.f32.gmra.mrb[10].mxu1 %v11107_v46  ;;  %9631 = vmatprep.subr.bf16.mxu0 %v10429_v3  ;;  %v13840_v3 = vand.u32 4294901760, %v10914_v31 }
  0xcc   : > { %2870 = vmatprep.mubr.f32.mxu1 %v13809_v0  ;;  %v2296_v25 = vand.u32 4294901760, %v2295_v7  ;;  %v277_v7 = vrot.slane %v10807_v35, %v276_v16 }
  0xcd   : > { %v2283_v30 = vsub.f32 %v10914_v31, %v13840_v3  ;;  %v13843_v31 = vand.u32 4294901760, %v10927_v33 }
  0xce   : > { %9633 = vmatpush3.bf16.msra.mxu0 %v10699_v34  ;;  %v2189_v34 = vsub.f32 %v11007_v26, %v11172_v53 }
  0xcf   : > { %2872 = vmatmul.mubr.f32.gmra.mrb[12].mxu1 %v11125_v9  ;;  %9635 = vmatprep.subr.msk.bf16.mxu0 %vm11019_vm13, %v13830_v55  ;;  %v2313_v41 = vsub.f32 %v10927_v33, %v13843_v31  ;;  %v2284_v42 = vand.u32 4294901760, %v2283_v30  ;;  %v11387_v31 = vand.u32 4294901760, %v2211_v52 }
  0xd0   : > { %2877 = vmatprep.mubr.f32.mxu1 %v13809_v0  ;;  %v11355_v37 = vand.u32 4294901760, %v2189_v34 }
  0xd1   : > { %9416 = vmatmul.mubr.f32.vlgmr.msra.gmra.mrb[2].mxu0 %v10939_v45  ;;  %v13842_v45 = vand.u32 4294901760, %v10925_v48  ;;  %v2314_v58 = vand.u32 4294901760, %v2313_v41  ;;  %v11364_v3 = vpack.c.bf16 %v2296_v25, %v2284_v42  ;;  %v2222_v41 = vsub.f32 %v11105_v8, %v11228_v40 }
  0xd2   : > { %9637 = vmatpush1.bf16.msk.msra.mxu0 %vm11032_vm14, %v13830_v55  ;;  %2185 = vmatprep.mubr.f32.mxu0 %v13809_v0  ;;  %v11392_v42 = vrot.slane %v277_v7, %v10812_v39  ;;  %v2244_v7 = vsub.f32 %v11134_v56, %v11246_v29  ;;  %v13860_v29 = vmov 0 }
  0xd3   : > { %2879 = vmatmul.mubr.f32.gmra.mrb[14].mxu1 %v11136_v20  ;;  %9639 = vmatprep.subr.msk.bf16.mxu0 %vm11044_vm15, %v13830_v55  ;;  %v2301_v36 = vsub.f32 %v10925_v48, %v13842_v45  ;;  %v2200_v48 = vsub.f32 %v11051_v15, %v11193_v60  ;;  %13844 = vst [vmem:[#allocation30_spill] sm:$0xff] %v11364_v3  ;;  %v11406_v16 = vand.u32 4294901760, %v2222_v41 }
  0xd4   : > { %2884 = vmatprep.mubr.f32.mxu1 %v13809_v0  ;;  %v2325_v45 = vsub.f32 %v10985_v23, %v11205_v4  ;;  %vm297_vm0 = vcmp.eq.s32.totalorder %v10784_v63, %v11392_v42  ;;  %vm301_vm3 = vcmp.eq.s32.totalorder %v10824_v43, %v11392_v42  ;;  %v2255_v41 = vsub.f32 %v11145_v18, %v11253_v59  ;;  %v13859_v59 = vld [vmem:[#allocation7_spill] sm:$0xff] }
  0xd5   : > { %v2302_v33 = vand.u32 4294901760, %v2301_v36  ;;  %v11368_v30 = vand.u32 4294901760, %v2200_v48  ;;  %v2331_v36 = vsub.f32 %v11002_v50, %v11218_v47  ;;  %vm11425_vm4 = vmpackc.low %vm301_vm3, %vm297_vm0 }
  0xd6   : > { %9641 = vmatpush1.bf16.msk.msra.mxu0 %vm11070_vm2, %v13830_v55  ;;  %v11396_v25 = vand.u32 4294901760, %v2325_v45  ;;  %v272_v45 = vsub.s32 4, %v10784_v63 }
  0xd7   : > { %2886 = vmatmul.mubr.f32.gmra.mrb[16].mxu1 %v11147_v13  ;;  %8672 = vmatprep.subr.msk.mxu0 %vm10931_vm10, %v13838_v19  ;;  %v11375_v34 = vpack.c.bf16 %v2314_v58, %v2302_v33  ;;  %v11401_v48 = vand.u32 4294901760, %v2331_v36  ;;  %v2233_v33 = vsub.f32 %v11123_v21, %v11239_v12  ;;  %v11444_v36 = vand.u32 4294901760, %v2244_v7 }
  0xd8   : > { %2966 = vmatprep.mubr.f32.mxu1 %v13809_v0  ;;  %13846 = vst [vmem:[#allocation32_spill] sm:$0xff] %v11396_v25  ;;  %v8631_v7 = vsel %vm301_vm3, 1.0, %v13809_v0 }
  0xd9   : > { %13845 = vst [vmem:[#allocation31_spill] sm:$0xff] %v11375_v34  ;;  %13847 = vst [vmem:[#allocation33_spill] sm:$0xff] %v11401_v48  ;;  %v11432_v52 = vand.u32 4294901760, %v2233_v33  ;;  %v273_v33 = vrot.slane %v10807_v35, %v272_v45  ;;  %v11469_v45 = vsub.f32 %v8631_v7, %v8631_v7 }
  0xda   : > { %8673 = vmatpush1.msk.msra.mxu0 %vm10960_vm12, %v13838_v19 }
  0xdb   : > { %2191 = vmatmul.mubr.f32.vlgmr.msra.gmra.mrb[4].mxu0 %v11355_v37  ;;  %2968 = vmatmul.mubr.f32.vlgmr.msra.gmra.mrb[2].mxu1 %v10990_v51 }
  0xdc   : > { %2196 = vmatprep.mubr.f32.mxu0 %v13809_v0  ;;  %2973 = vmatprep.mubr.f32.mxu1 %v13809_v0 }
  0xdd   : > { %9643 = vmatprep.subr.bf16.mxu0 %v11303_v17  ;;  %9741 = vmatpush1.bf16.msra.mxu1 %v11364_v3 }
  0xde   : > { %9645 = vmatpush1.bf16.msra.mxu0 %v11364_v3  ;;  %9743 = vmatprep.subr.bf16.mxu1 %v11375_v34  ;;  %v13723_v3 = vand.u32 4294901760, %v11469_v45 }
  0xdf   : > { %2202 = vmatmul.mubr.f32.gmra.mrb[6].mxu0 %v11368_v30  ;;  %2975 = vmatmul.mubr.f32.gmra.mrb[4].mxu1 %v11009_v1 }
  0xe0   : > { %2207 = vmatprep.mubr.f32.mxu0 %v13809_v0  ;;  %2980 = vmatprep.mubr.f32.mxu1 %v13809_v0 }
  0xe1   : > { %9647 = vmatprep.subr.bf16.mxu0 %v11375_v34  ;;  %9745 = vmatpush1.bf16.msra.mxu1 %v10997_v10 }
  0xe2   : > { %9649 = vmatpush1.bf16.msra.mxu0 %v10997_v10  ;;  %4077 = vmatprep.subr.mxu1 %v11396_v25  ;;  %v289_v10 = vrot.slane %v273_v33, %v10812_v39  ;;  %v3201_v39 = vsub.f32 %v11469_v45, %v13723_v3  ;;  %v13856_v3 = vmov 0 }
  0xe3   : > { %2213 = vmatmul.mubr.f32.gmra.mrb[8].mxu0 %v11387_v31  ;;  %2982 = vmatmul.mubr.f32.gmra.mrb[6].mxu1 %v11053_v11 }
  0xe4   : > { %2218 = vmatprep.mubr.f32.mxu0 %v13809_v0  ;;  %2987 = vmatprep.mubr.f32.mxu1 %v13809_v0  ;;  %vm296_vm5 = vcmp.eq.s32.totalorder %v10784_v63, %v289_v10  ;;  %vm300_vm6 = vcmp.eq.s32.totalorder %v10824_v43, %v289_v10 }
  0xe5   : > { %2327 = vmatprep.subr.mxu0 %v11396_v25  ;;  %4083 = vmatpush1.msra.mxu1 %v11401_v48  ;;  %v2266_v25 = vsub.f32 %v11159_v22, %v11264_v44  ;;  %vm11494_vm9 = vmpackc.low %vm300_vm6, %vm296_vm5  ;;  %v3202_v44 = vand.u32 4294901760, %v3201_v39  ;;  %v13863_v39 = vmov 0  ;;  %v8626_v12 = vsel %vm296_vm5, 1.0, %v13809_v0 }
  0xe6   : > { %2333 = vmatpush1.msra.mxu0 %v11401_v48  ;;  %9747 = vmatprep.subr.bf16.mxu1 %v10923_v32  ;;  %v8627_v32 = vsel %vm297_vm0, 1.0, %v13809_v0  ;;  %v11461_v48 = vand.u32 4294901760, %v2255_v41  ;;  %v11574_v63 = vsub.f32 %v8626_v12, %v8626_v12 }
  0xe7   : > { %2224 = vmatmul.mubr.f32.gmra.mrb[10].mxu0 %v11406_v16  ;;  %2989 = vmatmul.mubr.f32.gmra.mrb[8].mxu1 %v11085_v57  ;;  %v11467_v35 = vsub.f32 %v8627_v32, %v8627_v32  ;;  %v11474_v34 = vand.u32 4294901760, %v2266_v25  ;;  %v13850_v32 = vld [vmem:[#allocation5_spill] sm:$0xff]  ;;  %v13851_v25 = vld [vmem:[#allocation6_spill] sm:$0xff] }
  0xe8   : > { %2229 = vmatprep.mubr.f32.mxu0 %v13809_v0  ;;  %2994 = vmatprep.mubr.f32.mxu1 %v13809_v0  ;;  %vm305_vm7 = vcmp.eq.s32.totalorder %v13850_v32, %v11392_v42  ;;  %vm13727_vm8 = vcmp.eq.s32.totalorder %v13851_v25, %v11392_v42  ;;  %vm13732_vm3 = vcmp.eq.s32.totalorder %v13850_v32, %v289_v10  ;;  %v13748_v12 = vand.u32 4294901760, %v11574_v63 }
  0xe9   : > { %9683 = vmatprep.subr.msk.bf16.mxu0 %vm11425_vm4, %v13830_v55  ;;  %v13724_v41 = vand.u32 4294901760, %v11467_v35  ;;  %vm11510_vm0 = vmpackc.low %vm13727_vm8, %vm305_vm7  ;;  %vm13729_vm1 = vcmp.eq.s32.totalorder %v13851_v25, %v289_v10  ;;  %vm11534_vm8 = vcmp.eq.s32.totalorder %v13859_v59, %v11392_v42  ;;  %vm13868_vm5 = vcmp.eq.s32.totalorder %v13850_v32, %v289_v10 }
  0xea   : > { %vm11528_vm11 = vmpackc.low %vm13729_vm1, %vm13732_vm3  ;;  %v13861_v29 = vsel %vm11534_vm8, 4294967295, %v13860_v29  ;;  %vm11547_vm1 = vcmp.eq.s32.totalorder %v13859_v59, %v289_v10  ;;  %v8630_v59 = vsel %vm300_vm6, 1.0, %v13809_v0  ;;  %vm13867_vm3 = vcmp.eq.s32.totalorder %v13851_v25, %v11392_v42 }
  0xeb   : > { %2235 = vmatmul.mubr.f32.gmra.mrb[12].mxu0 %v11432_v52  ;;  %2996 = vmatmul.mubr.f32.gmra.mrb[10].mxu1 %v11107_v46  ;;  %v3189_v7 = vsub.f32 %v11467_v35, %v13724_v41  ;;  %v13857_v3 = vsel %vm11528_vm11, 4294967295, %v13856_v3  ;;  %13862 = vst [vmem:[#allocation35_spill] sm:$0xff] %v13861_v29  ;;  %v13864_v39 = vsel %vm11547_vm1, 4294967295, %v13863_v39  ;;  %v11577_v40 = vsub.f32 %v8630_v59, %v8630_v59 }
  0xec   : > { %2240 = vmatprep.mubr.f32.mxu0 %v13809_v0  ;;  %3001 = vmatprep.mubr.f32.mxu1 %v13809_v0  ;;  %13858 = vst [vmem:[#allocation34_spill] sm:$0xff] %v13857_v3  ;;  %13865 = vst [vmem:[#allocation36_spill] sm:$0xff] %v13864_v39  ;;  %v8634_v60 = vsel %vm13868_vm5, 1.0, %v13809_v0  ;;  %vm13869_vm6 = vcmp.eq.s32.totalorder %v13851_v25, %v289_v10  ;;  %v8643_v10 = vsel %vm11534_vm8, 1.0, %v13809_v0 }
  0xed   : > { %v3190_v41 = vand.u32 4294901760, %v3189_v7  ;;  %v8638_v42 = vsel %vm13869_vm6, 1.0, %v13809_v0  ;;  %v13749_v59 = vand.u32 4294901760, %v11577_v40  ;;  %v3195_v25 = vsub.f32 %v11574_v63, %v13748_v12 }
  0xee   : > { %v11618_v56 = vsub.f32 %v8643_v10, %v8643_v10  ;;  %v8642_v12 = vsel %vm11547_vm1, 1.0, %v13809_v0 }
  0xef   : > { %2246 = vmatmul.mubr.f32.gmra.mrb[14].mxu0 %v11444_v36  ;;  %3003 = vmatmul.mubr.f32.gmra.mrb[12].mxu1 %v11125_v9  ;;  %v11551_v7 = vpack.c.bf16 %v3202_v44, %v3190_v41  ;;  %v8635_v44 = vsel %vm305_vm7, 1.0, %v13809_v0  ;;  %v8639_v41 = vsel %vm13867_vm3, 1.0, %v13809_v0  ;;  %v11631_v10 = vsub.f32 %v8642_v12, %v8642_v12  ;;  %v13874_v12 = vld [vmem:[#allocation10_spill] sm:$0xff] }
  0xf0   : > { %2251 = vmatprep.mubr.f32.mxu0 %v13809_v0  ;;  %3008 = vmatprep.mubr.f32.mxu1 %v13809_v0  ;;  %v11579_v43 = vsub.f32 %v8635_v44, %v8635_v44  ;;  %v11581_v5 = vsub.f32 %v8639_v41, %v8639_v41  ;;  %v11593_v44 = vsub.f32 %v8634_v60, %v8634_v60  ;;  %v11634_v39 = vand.u32 4294901760, %v11618_v56 }
  0xf1   : > { %13866 = vst [vmem:[#allocation37_spill] sm:$0xff] %v11551_v7  ;;  %v11595_v41 = vsub.f32 %v8638_v42, %v8638_v42  ;;  %v3207_v60 = vsub.f32 %v11577_v40, %v13749_v59  ;;  %v3196_v59 = vand.u32 4294901760, %v3195_v25  ;;  %vm13872_vm7 = vcmask 326656  }
  0xf2   : > { %v13750_v53 = vand.u32 4294901760, %v11579_v43  ;;  %v13759_v42 = vand.u32 4294901760, %v11593_v44  ;;  %v13870_v22 = vand.u32 4294901760, %v11581_v5  ;;  %vm13902_vm3 = vmmov %vm13872_vm7 }
  0xf3   : > { %2257 = vmatmul.mubr.f32.gmra.mrb[16].mxu0 %v11461_v48  ;;  %3010 = vmatmul.mubr.f32.gmra.mrb[14].mxu1 %v11136_v20  ;;  %v3208_v32 = vand.u32 4294901760, %v3207_v60  ;;  %v13871_v21 = vand.u32 4294901760, %v11595_v41  ;;  %vm13913_vm5 = vmmov %vm13872_vm7 }
  0xf4   : > { %2262 = vmatprep.mubr.f32.mxu0 %v13809_v0  ;;  %3015 = vmatprep.mubr.f32.mxu1 %v13809_v0  ;;  %v3225_v18 = vsub.f32 %v11581_v5, %v13870_v22 }
  0xf5   : > { %v3231_v22 = vsub.f32 %v11595_v41, %v13871_v21  ;;  %v11638_v25 = vpack.c.bf16 %v3208_v32, %v3196_v59  ;;  %v3237_v21 = vsub.f32 %v11618_v56, %v11634_v39  ;;  %v13875_v59 = vld [vmem:[#allocation11_spill] sm:$0xff] }
  0xf6   : > { %v3226_v29 = vand.u32 4294901760, %v3225_v18 }
  0xf7   : > { %2268 = vmatmul.mubr.f32.gmra.mrb[18].mxu0 %v11474_v34  ;;  %3017 = vmatmul.mubr.f32.gmra.mrb[16].mxu1 %v11147_v13  ;;  %v3232_v47 = vand.u32 4294901760, %v3231_v22  ;;  %v11655_v32 = vand.u32 4294901760, %v3237_v21 }
  0xf8   : > { %2388 = vmatprep.mubr.f32.mxu0 %v13809_v0  ;;  %4138 = vmatprep.mubr.f32.mxu1 %v13809_v0 }
  0xfb   : > { %2390 = vmatmul.mubr.f32.vlgmr.msra.gmra.mrb[4].mxu0 %v10990_v51 }
  0xfc   : > { %2395 = vmatprep.mubr.f32.mxu0 %v13809_v0  ;;  %9685 = vmatpush1.bf16.msk.msra.mxu0 %vm11494_vm9, %v13830_v55 }
  0xfd   : > { %9687 = vmatprep.subr.msk.bf16.mxu0 %vm11510_vm0, %v13830_v55 }
  0xff   : > { %2397 = vmatmul.mubr.f32.gmra.mrb[6].mxu0 %v11009_v1 }
 0x100   : > { %2402 = vmatprep.mubr.f32.mxu0 %v13809_v0  ;;  %9689 = vmatpush1.bf16.msk.msra.mxu0 %vm11528_vm11, %v13830_v55 }
 0x101   : > { %8702 = vmatprep.subr.msk.mxu0 %vm11534_vm8, %v13838_v19 }
 0x103   : > { %2404 = vmatmul.mubr.f32.gmra.mrb[8].mxu0 %v11053_v11 }
 0x104   : > { %2409 = vmatprep.mubr.f32.mxu0 %v13809_v0  ;;  %8703 = vmatpush1.msk.msra.mxu0 %vm11547_vm1, %v13838_v19 }
 0x105   : > { %9691 = vmatprep.subr.bf16.mxu0 %v11551_v7  ;;  %v3213_v7 = vsub.f32 %v11579_v43, %v13750_v53  ;;  %v3219_v53 = vsub.f32 %v11593_v44, %v13759_v42  ;;  %v11641_v42 = vand.u32 4294901760, %v11631_v10 }
 0x107   : > { %2411 = vmatmul.mubr.f32.gmra.mrb[10].mxu0 %v11085_v57  ;;  %v3214_v8 = vand.u32 4294901760, %v3213_v7  ;;  %v3220_v60 = vand.u32 4294901760, %v3219_v53  ;;  %v3243_v53 = vsub.f32 %v11631_v10, %v11641_v42  ;;  %v13873_v7 = vld [vmem:[#allocation9_spill] sm:$0xff] }
 0x108   : > { %2416 = vmatprep.mubr.f32.mxu0 %v13809_v0 }
 0x109   : > { %v11643_v3 = vpack.c.bf16 %v3226_v29, %v3214_v8  ;;  %v11650_v18 = vpack.c.bf16 %v3232_v47, %v3220_v60  ;;  %v11660_v8 = vand.u32 4294901760, %v3243_v53  ;;  %v11665_v47 = vpack.c.bf16 %v11469_v45, %v11467_v35 }
 0x10a   : > { %v11683_v29 = vpack.c.bf16 %v11577_v40, %v11574_v63  ;;  %v13880_v53 = vand.u32 4294901760, %v11469_v45  ;;  %v13883_v45 = vld [vmem:[#allocation14_spill] sm:$0xff] }
 0x10b   : > { %2418 = vmatmul.mubr.f32.gmra.mrb[12].mxu0 %v11107_v46 }
 0x10c   : > { %2423 = vmatprep.mubr.f32.mxu0 %v13809_v0 }
 0x10f   : > { %2425 = vmatmul.mubr.f32.gmra.mrb[14].mxu0 %v11125_v9 }
 0x110   : > { %2430 = vmatprep.mubr.f32.mxu0 %v13809_v0 }
 0x113   : > { %2432 = vmatmul.mubr.f32.gmra.mrb[16].mxu0 %v11136_v20 }
 0x114   : > { %2437 = vmatprep.mubr.f32.mxu0 %v13809_v0 }
 0x117   : > { %2439 = vmatmul.mubr.f32.gmra.mrb[18].mxu0 %v11147_v13 }
 0x118   : > { %3097 = vmatprep.mubr.f32.mxu0 %v13809_v0 }
 0x11b   : > { %3103 = vmatmul.mubr.f32.vlgmr.msra.gmra.mrb[20].mxu0 %v11355_v37  ;;  %v11687_v37 = vpack.c.bf16 %v11581_v5, %v11579_v43 }
 0x11c   : > { %3108 = vmatprep.mubr.f32.mxu0 %v13809_v0  ;;  %9693 = vmatpush1.bf16.msra.mxu0 %v11638_v25 }
 0x11d   : > { %9695 = vmatprep.subr.bf16.mxu0 %v11643_v3 }
 0x11f   : > { %3114 = vmatmul.mubr.f32.gmra.mrb[22].mxu0 %v11368_v30  ;;  %v11694_v30 = vpack.c.bf16 %v11595_v41, %v11593_v44 }
 0x120   : > { %3119 = vmatprep.mubr.f32.mxu0 %v13809_v0  ;;  %9697 = vmatpush1.bf16.msra.mxu0 %v11650_v18 }
 0x121   : > { %3239 = vmatprep.subr.mxu0 %v11655_v32 }
 0x123   : > { %3125 = vmatmul.mubr.f32.gmra.mrb[24].mxu0 %v11387_v31 }
 0x124   : > { %3130 = vmatprep.mubr.f32.mxu0 %v13809_v0  ;;  %3245 = vmatpush1.msra.mxu0 %v11660_v8 }
 0x125   : > { %9699 = vmatprep.subr.bf16.mxu0 %v11665_v47 }
 0x127   : > { %3136 = vmatmul.mubr.f32.gmra.mrb[26].mxu0 %v11406_v16 }
 0x128   : > { %3141 = vmatprep.mubr.f32.mxu0 %v13809_v0 }
 0x12b   : > { %3147 = vmatmul.mubr.f32.gmra.mrb[28].mxu0 %v11432_v52 }
 0x12c   : > { %3152 = vmatprep.mubr.f32.mxu0 %v13809_v0 }
 0x12f   : > { %3158 = vmatmul.mubr.f32.gmra.mrb[30].mxu0 %v11444_v36 }
 0x130   : > { %3163 = vmatprep.mubr.f32.mxu0 %v13809_v0 }
 0x133   : > { %3169 = vmatmul.mubr.f32.gmra.mrb[32].mxu0 %v11461_v48 }
 0x134   : > { %3174 = vmatprep.mubr.f32.mxu0 %v13809_v0 }
 0x137   : > { %3180 = vmatmul.mubr.f32.gmra.mrb[34].mxu0 %v11474_v34 }
 0x138   : > { %3300 = vmatprep.mubr.f32.mxu0 %v13809_v0 }
 0x13b   : > { %3302 = vmatmul.mubr.f32.vlgmr.msra.gmra.mrb[20].mxu0 %v10990_v51 }
 0x13c   : > { %3307 = vmatprep.mubr.f32.mxu0 %v13809_v0  ;;  %9701 = vmatpush1.bf16.msra.mxu0 %v11683_v29 }
 0x13d   : > { %9703 = vmatprep.subr.bf16.mxu0 %v11687_v37 }
 0x13f   : > { %3309 = vmatmul.mubr.f32.gmra.mrb[22].mxu0 %v11009_v1 }
 0x140   : > { %3314 = vmatprep.mubr.f32.mxu0 %v13809_v0  ;;  %9705 = vmatpush1.bf16.msra.mxu0 %v11694_v30 }
 0x141   : > { %3383 = vmatprep.subr.mxu0 %v11618_v56 }
 0x143   : > { %3316 = vmatmul.mubr.f32.gmra.mrb[24].mxu0 %v11053_v11 }
 0x144   : > { %v11702_v34 = vpop.f32.mrb[0].mxu0  ;;  %v1533_v31 = vpop.f32.mrb[0].mxu1  ;;  %3321 = vmatprep.mubr.f32.mxu0 %v13809_v0  ;;  %3386 = vmatpush1.msra.mxu0 %v11631_v10 }
 0x145   : > { %v3936_v48 = vsel %vm13872_vm7, %v1533_v31, 0  ;;  %v9189_v16 = vpop.f32.mrb[1].mxu0  ;;  %v9303_v52 = vpop.f32.mrb[1].mxu1  ;;  %9707 = vmatprep.subr.msk.bf16.mxu0 %vm11425_vm4, %v13830_v55 }
 0x146   : > { %v11710_v36 = vand.u32 4294901760, %v3936_v48  ;;  %v13884_v16 = vld [vmem:[#allocation15_spill] sm:$0xff]  ;;  %v13885_v52 = vld [vmem:[#allocation16_spill] sm:$0xff] }
 0x147   : > { %3323 = vmatmul.mubr.f32.gmra.mrb[26].mxu0 %v11085_v57 }
 0x148   : > { %4140 = vmatmul.mubr.f32.vlgmr.msra.gmra.mrb[18].mxu1 %v11710_v36  ;;  %3328 = vmatprep.mubr.f32.mxu0 %v13809_v0  ;;  %v11724_v22 = vsub.f32 %v3936_v48, %v11710_v36  ;;  %v13881_v48 = vld [vmem:[#allocation13_spill] sm:$0xff] }
 0x149   : > { %9749 = vmatpush1.bf16.msra.mxu1 %v13873_v7  ;;  %4230 = vmatprep.mubr.f32.mxu1 %v13809_v0 }
 0x14a   : > { %9751 = vmatprep.subr.bf16.mxu1 %v13874_v12  ;;  %v11750_v60 = vand.u32 4294901760, %v11724_v22 }
 0x14b   : > { %3330 = vmatmul.mubr.f32.gmra.mrb[28].mxu0 %v11107_v46 }
 0x14c   : > { %3335 = vmatprep.mubr.f32.mxu0 %v13809_v0 }
 0x14d   : > { %9753 = vmatpush1.bf16.msra.mxu1 %v13875_v59 }
 0x14e   : > { %4172 = vmatprep.subr.mxu1 %v10985_v23 }
 0x14f   : > { %3337 = vmatmul.mubr.f32.gmra.mrb[30].mxu0 %v11125_v9 }
 0x150   : > { %3342 = vmatprep.mubr.f32.mxu0 %v13809_v0 }
 0x151   : > { %4175 = vmatpush1.msra.mxu1 %v11002_v50 }
 0x152   : > { %4233 = vmatmul.mubr.f32.vlgmr.msra.gmra.mrb[18].mxu1 %v11724_v22  ;;  %9755 = vmatprep.subr.msk.bf16.mxu1 %vm11019_vm13, %v13830_v55 }
 0x153   : > { %9757 = vmatpush1.bf16.msk.msra.mxu1 %vm11032_vm14, %v13830_v55  ;;  %3344 = vmatmul.mubr.f32.gmra.mrb[32].mxu0 %v11136_v20 }
 0x154   : > { %9759 = vmatprep.subr.msk.bf16.mxu1 %vm11044_vm15, %v13830_v55  ;;  %3349 = vmatprep.mubr.f32.mxu0 %v13809_v0 }
 0x155   : > { %4313 = vmatprep.mubr.f32.mxu1 %v13809_v0 }
 0x157   : > { %9761 = vmatpush1.bf16.msk.msra.mxu1 %vm11070_vm2, %v13830_v55  ;;  %3351 = vmatmul.mubr.f32.gmra.mrb[34].mxu0 %v11147_v13 }
 0x158   : > { %8742 = vmatprep.subr.msk.mxu1 %vm10931_vm10, %v13838_v19  ;;  %3441 = vmatprep.mubr.f32.mxu0 %v13809_v0 }
 0x15b   : > { %8743 = vmatpush1.msk.msra.mxu1 %vm10960_vm12, %v13838_v19  ;;  %3444 = vmatmul.mubr.f32.vlgmr.msra.gmra.mrb[20].mxu0 %v11007_v26 }
 0x15c   : > { %4317 = vmatmul.mubr.f32.vlgmr.msra.gmra.mrb[18].mxu1 %v11750_v60  ;;  %9763 = vmatprep.subr.bf16.mxu1 %v11100_v54 }
 0x15d   : > { %9765 = vmatpush1.bf16.msra.mxu1 %v11179_v61  ;;  %3449 = vmatprep.mubr.f32.mxu0 %v13809_v0 }
 0x15e   : > { %9767 = vmatprep.subr.bf16.mxu1 %v11185_v62  ;;  %4417 = vmatprep.mubr.f32.mxu1 %v13809_v0 }
 0x15f   : > { %3452 = vmatmul.mubr.f32.gmra.mrb[22].mxu0 %v11051_v15  ;;  %v13877_v15 = vld [vmem:[#allocation23_spill] sm:$0xff] }
 0x160   : > { %3457 = vmatprep.mubr.f32.mxu0 %v13809_v0  ;;  %9709 = vmatpush1.bf16.msk.msra.mxu0 %vm11494_vm9, %v13830_v55 }
 0x161   : > { %9769 = vmatpush1.bf16.msra.mxu1 %v11201_v6  ;;  %9711 = vmatprep.subr.msk.bf16.mxu0 %vm11510_vm0, %v13830_v55  ;;  %v13892_v6 = vld [vmem:[#allocation18_spill] sm:$0xff] }
 0x162   : > { %4358 = vmatprep.subr.mxu1 %v11205_v4 }
 0x163   : > { %3460 = vmatmul.mubr.f32.gmra.mrb[24].mxu0 %v11083_v49  ;;  %v13879_v49 = vand.u32 4294901760, %v11467_v35 }
 0x164   : > { %3465 = vmatprep.mubr.f32.mxu0 %v13809_v0  ;;  %9713 = vmatpush1.bf16.msk.msra.mxu0 %vm11528_vm11, %v13830_v55 }
 0x165   : > { %4362 = vmatpush1.msra.mxu1 %v13877_v15  ;;  %8712 = vmatprep.subr.msk.mxu0 %vm11534_vm8, %v13838_v19  ;;  %v11789_v31 = vpack.c.bf16 %v13880_v53, %v13879_v49  ;;  %v4016_v49 = vsub.f32 %v11724_v22, %v11750_v60  ;;  %v13886_v53 = vld [vmem:[#allocation17_spill] sm:$0xff] }
 0x166   : > { %4419 = vmatmul.mubr.f32.vlgmr.msra.gmra.mrb[18].mxu1 %v11710_v36  ;;  %9771 = vmatprep.subr.msk.bf16.mxu1 %vm11019_vm13, %v13830_v55  ;;  %v13889_v15 = vld [vmem:[#allocation37_spill] sm:$0xff] }
 0x167   : > { %9773 = vmatpush1.bf16.msk.msra.mxu1 %vm11032_vm14, %v13830_v55  ;;  %3468 = vmatmul.mubr.f32.gmra.mrb[26].mxu0 %v13881_v48  ;;  %v11839_v48 = vand.u32 4294901760, %v4016_v49  ;;  %v13891_v49 = vand.u32 4294901760, %v11581_v5  ;;  %v13895_v5 = vld [vmem:[#allocation19_spill] sm:$0xff] }
 0x168   : > { %9775 = vmatprep.subr.msk.bf16.mxu1 %vm11044_vm15, %v13830_v55  ;;  %3473 = vmatprep.mubr.f32.mxu0 %v13809_v0 }
 0x169   : > { %4499 = vmatprep.mubr.f32.mxu1 %v13809_v0  ;;  %8713 = vmatpush1.msk.msra.mxu0 %vm11547_vm1, %v13838_v19 }
 0x16a   : > { %9715 = vmatprep.subr.bf16.mxu0 %v11789_v31 }
 0x16b   : > { %9777 = vmatpush1.bf16.msk.msra.mxu1 %vm11070_vm2, %v13830_v55  ;;  %3476 = vmatmul.mubr.f32.gmra.mrb[28].mxu0 %v13883_v45  ;;  %v13887_v45 = vand.u32 4294901760, %v11574_v63  ;;  %v13893_v63 = vand.u32 4294901760, %v11593_v44  ;;  %v13897_v44 = vld [vmem:[#allocation24_spill] sm:$0xff] }
 0x16c   : > { %8752 = vmatprep.subr.msk.mxu1 %vm10931_vm10, %v13838_v19  ;;  %3481 = vmatprep.mubr.f32.mxu0 %v13809_v0 }
 0x16f   : > { %8753 = vmatpush1.msk.msra.mxu1 %vm10960_vm12, %v13838_v19  ;;  %3484 = vmatmul.mubr.f32.gmra.mrb[30].mxu0 %v13884_v16  ;;  %v13888_v16 = vand.u32 4294901760, %v11577_v40 }
 0x170   : > { %4501 = vmatmul.mubr.f32.vlgmr.msra.gmra.mrb[18].mxu1 %v11710_v36  ;;  %9779 = vmatprep.subr.msk.bf16.mxu1 %vm11425_vm4, %v13830_v55 }
 0x171   : > { %9781 = vmatpush1.bf16.msk.msra.mxu1 %vm11494_vm9, %v13830_v55  ;;  %3489 = vmatprep.mubr.f32.mxu0 %v13809_v0 }
 0x172   : > { %9783 = vmatprep.subr.msk.bf16.mxu1 %vm11510_vm0, %v13830_v55  ;;  %4581 = vmatprep.mubr.f32.mxu1 %v13809_v0 }
 0x173   : > { %3492 = vmatmul.mubr.f32.gmra.mrb[32].mxu0 %v13885_v52  ;;  %v11849_v52 = vpack.c.bf16 %v13888_v16, %v13887_v45  ;;  %v13899_v45 = vld [vmem:[#allocation26_spill] sm:$0xff]  ;;  %v13901_v16 = vld [vmem:[#allocation28_spill] sm:$0xff] }
 0x174   : > { %3497 = vmatprep.mubr.f32.mxu0 %v13809_v0 }
 0x175   : > { %9785 = vmatpush1.bf16.msk.msra.mxu1 %vm11528_vm11, %v13830_v55 }
 0x176   : > { %8762 = vmatprep.subr.msk.mxu1 %vm11534_vm8, %v13838_v19 }
 0x177   : > { %3500 = vmatmul.mubr.f32.gmra.mrb[34].mxu0 %v13886_v53  ;;  %v13890_v53 = vand.u32 4294901760, %v11579_v43  ;;  %v13894_v43 = vand.u32 4294901760, %v11595_v41  ;;  %v13898_v41 = vld [vmem:[#allocation25_spill] sm:$0xff] }
 0x178   : > { %3580 = vmatprep.mubr.f32.mxu0 %v13809_v0 }
 0x179   : > { %8763 = vmatpush1.msk.msra.mxu1 %vm11547_vm1, %v13838_v19  ;;  %v11857_v4 = vpack.c.bf16 %v13891_v49, %v13890_v53  ;;  %v11869_v40 = vpack.c.bf16 %v13894_v43, %v13893_v63 }
 0x17a   : > { %4587 = vmatmul.mubr.f32.vlgmr.msra.gmra.mrb[20].mxu1 %v11839_v48  ;;  %9787 = vmatprep.subr.bf16.mxu1 %v13889_v15 }
 0x17b   : > { %9789 = vmatpush1.bf16.msra.mxu1 %v11638_v25  ;;  %3584 = vmatmul.mubr.f32.vlgmr.msra.gmra.mrb[20].mxu0 %v13892_v6  ;;  %v13896_v6 = vld [vmem:[#allocation22_spill] sm:$0xff] }
 0x17c   : > { %9791 = vmatprep.subr.bf16.mxu1 %v11643_v3  ;;  %3589 = vmatprep.mubr.f32.mxu0 %v13809_v0 }
 0x17d   : > { %4707 = vmatprep.mubr.f32.mxu1 %v13809_v0  ;;  %9717 = vmatpush1.bf16.msra.mxu0 %v11849_v52 }
 0x17e   : > { %9719 = vmatprep.subr.bf16.mxu0 %v11857_v4 }
 0x17f   : > { %9793 = vmatpush1.bf16.msra.mxu1 %v11650_v18  ;;  %3593 = vmatmul.mubr.f32.gmra.mrb[22].mxu0 %v13895_v5 }
 0x180   : > { %4646 = vmatprep.subr.mxu1 %v11655_v32  ;;  %3598 = vmatprep.mubr.f32.mxu0 %v13809_v0 }
 0x181   : > { %9721 = vmatpush1.bf16.msra.mxu0 %v11869_v40 }
 0x182   : > { %3688 = vmatprep.subr.mxu0 %v11634_v39 }
 0x183   : > { %4652 = vmatpush1.msra.mxu1 %v11660_v8  ;;  %3602 = vmatmul.mubr.f32.gmra.mrb[24].mxu0 %v13896_v6 }
 0x184   : > { %4709 = vmatmul.mubr.f32.vlgmr.msra.gmra.mrb[20].mxu1 %v11710_v36  ;;  %9795 = vmatprep.subr.bf16.mxu1 %v11665_v47 }
 0x185   : > { %9797 = vmatpush1.bf16.msra.mxu1 %v11683_v29  ;;  %3607 = vmatprep.mubr.f32.mxu0 %v13809_v0 }
 0x186   : > { %9799 = vmatprep.subr.bf16.mxu1 %v11687_v37  ;;  %4799 = vmatprep.mubr.f32.mxu1 %v13809_v0 }
 0x187   : > { %3611 = vmatmul.mubr.f32.gmra.mrb[26].mxu0 %v13897_v44 }
 0x188   : > { %3616 = vmatprep.mubr.f32.mxu0 %v13809_v0  ;;  %3692 = vmatpush1.msra.mxu0 %v11641_v42 }
 0x189   : > { %9801 = vmatpush1.bf16.msra.mxu1 %v11694_v30  ;;  %9723 = vmatprep.subr.msk.bf16.mxu0 %vm11425_vm4, %v13830_v55 }
 0x18a   : > { %4741 = vmatprep.subr.mxu1 %v11618_v56 }
 0x18b   : > { %3620 = vmatmul.mubr.f32.gmra.mrb[28].mxu0 %v13898_v41 }
 0x18c   : > { %3625 = vmatprep.mubr.f32.mxu0 %v13809_v0 }
 0x18d   : > { %4744 = vmatpush1.msra.mxu1 %v11631_v10 }
 0x18e   : > { %4802 = vmatmul.mubr.f32.vlgmr.msra.gmra.mrb[20].mxu1 %v11724_v22  ;;  %9803 = vmatprep.subr.msk.bf16.mxu1 %vm11425_vm4, %v13830_v55  ;;  %v13900_v22 = vld [vmem:[#allocation27_spill] sm:$0xff] }
 0x18f   : > { %9805 = vmatpush1.bf16.msk.msra.mxu1 %vm11494_vm9, %v13830_v55  ;;  %3629 = vmatmul.mubr.f32.gmra.mrb[30].mxu0 %v13899_v45 }
 0x190   : > { %9807 = vmatprep.subr.msk.bf16.mxu1 %vm11510_vm0, %v13830_v55  ;;  %3634 = vmatprep.mubr.f32.mxu0 %v13809_v0 }
 0x191   : > { %4882 = vmatprep.mubr.f32.mxu1 %v13809_v0 }
 0x193   : > { %9809 = vmatpush1.bf16.msk.msra.mxu1 %vm11528_vm11, %v13830_v55  ;;  %3638 = vmatmul.mubr.f32.gmra.mrb[32].mxu0 %v13900_v22 }
 0x194   : > { %8772 = vmatprep.subr.msk.mxu1 %vm11534_vm8, %v13838_v19  ;;  %3643 = vmatprep.mubr.f32.mxu0 %v13809_v0 }
 0x197   : > { %8773 = vmatpush1.msk.msra.mxu1 %vm11547_vm1, %v13838_v19  ;;  %3647 = vmatmul.mubr.f32.gmra.mrb[34].mxu0 %v13901_v16 }
 0x198   : > { %4886 = vmatmul.mubr.f32.vlgmr.msra.gmra.mrb[20].mxu1 %v11750_v60  ;;  %9811 = vmatprep.subr.bf16.mxu1 %v11789_v31 }
 0x199   : > { %9813 = vmatpush1.bf16.msra.mxu1 %v11849_v52  ;;  %3747 = vmatprep.mubr.f32.mxu0 %v13809_v0 }
 0x19a   : > { %9815 = vmatprep.subr.bf16.mxu1 %v11857_v4  ;;  %4986 = vmatprep.mubr.f32.mxu1 %v13809_v0 }
 0x19b   : > { %3749 = vmatmul.mubr.f32.vlgmr.msra.gmra.mrb[20].mxu0 %v10990_v51 }
 0x19c   : > { %3754 = vmatprep.mubr.f32.mxu0 %v13809_v0  ;;  %9725 = vmatpush1.bf16.msk.msra.mxu0 %vm11494_vm9, %v13830_v55 }
 0x19d   : > { %9817 = vmatpush1.bf16.msra.mxu1 %v11869_v40  ;;  %9727 = vmatprep.subr.msk.bf16.mxu0 %vm11510_vm0, %v13830_v55 }
 0x19e   : > { %4927 = vmatprep.subr.mxu1 %v11634_v39 }
 0x19f   : > { %3756 = vmatmul.mubr.f32.gmra.mrb[22].mxu0 %v11009_v1 }
 0x1a0   : > { %3761 = vmatprep.mubr.f32.mxu0 %v13809_v0  ;;  %9729 = vmatpush1.bf16.msk.msra.mxu0 %vm11528_vm11, %v13830_v55 }
 0x1a1   : > { %4931 = vmatpush1.msra.mxu1 %v11641_v42  ;;  %8722 = vmatprep.subr.msk.mxu0 %vm11534_vm8, %v13838_v19 }
 0x1a2   : > { %4988 = vmatmul.mubr.f32.vlgmr.msra.gmra.mrb[20].mxu1 %v11710_v36  ;;  %9819 = vmatprep.subr.msk.bf16.mxu1 %vm11425_vm4, %v13830_v55 }
 0x1a3   : > { %9821 = vmatpush1.bf16.msk.msra.mxu1 %vm11494_vm9, %v13830_v55  ;;  %3763 = vmatmul.mubr.f32.gmra.mrb[24].mxu0 %v11053_v11 }
 0x1a4   : > { %v2082_v60 = vpop.f32.mrb[2].mxu0  ;;  %9823 = vmatprep.subr.msk.bf16.mxu1 %vm11510_vm0, %v13830_v55  ;;  %3768 = vmatprep.mubr.f32.mxu0 %v13809_v0 }
 0x1a5   : > { %v5077_v53 = vsel %vm13902_vm3, %v2082_v60, 0  ;;  %v9417_v49 = vpop.f32.mrb[3].mxu0  ;;  %5068 = vmatprep.mubr.f32.mxu1 %v13809_v0  ;;  %8723 = vmatpush1.msk.msra.mxu0 %vm11547_vm1, %v13838_v19 }
 0x1a6   : > { %v11964_v63 = vand.u32 4294901760, %v5077_v53  ;;  %9731 = vmatprep.subr.msk.bf16.mxu0 %vm11019_vm13, %v13830_v55 }
 0x1a7   : > { %9825 = vmatpush1.bf16.msk.msra.mxu1 %vm11528_vm11, %v13830_v55  ;;  %3770 = vmatmul.mubr.f32.gmra.mrb[26].mxu0 %v11085_v57 }
 0x1a8   : > { %v11974_v43 = vsub.f32 %v5077_v53, %v11964_v63  ;;  %8782 = vmatprep.subr.msk.mxu1 %vm11534_vm8, %v13838_v19  ;;  %3775 = vmatprep.mubr.f32.mxu0 %v13809_v0 }
 0x1aa   : > { %v11985_v5 = vand.u32 4294901760, %v11974_v43 }
 0x1ab   : > { %8783 = vmatpush1.msk.msra.mxu1 %vm11547_vm1, %v13838_v19  ;;  %3777 = vmatmul.mubr.f32.gmra.mrb[28].mxu0 %v11107_v46 }
 0x1ac   : > { %5070 = vmatmul.mubr.f32.vlgmr.msra.gmra.mrb[20].mxu1 %v11710_v36  ;;  %9875 = vmatprep.subr.msk.bf16.mxu1 %vm11425_vm4, %v13830_v55  ;;  %v5157_v36 = vsub.f32 %v11974_v43, %v11985_v5 }
 0x1ad   : > { %9877 = vmatpush1.bf16.msk.msra.mxu1 %vm11494_vm9, %v13830_v55  ;;  %3782 = vmatprep.mubr.f32.mxu0 %v13809_v0 }
 0x1ae   : > { %v11995_v6 = vpop.f32.mrb[2].mxu1  ;;  %9879 = vmatprep.subr.msk.bf16.mxu1 %vm11510_vm0, %v13830_v55  ;;  %5722 = vmatprep.mubr.f32.mxu1 %v13809_v0  ;;  %v12018_v22 = vand.u32 4294901760, %v5157_v36 }
 0x1af   : > { %v12001_v44 = vpop.f32.mrb[3].mxu1  ;;  %3784 = vmatmul.mubr.f32.gmra.mrb[30].mxu0 %v11125_v9 }
 0x1b0   : > { %3789 = vmatprep.mubr.f32.mxu0 %v13809_v0 }
 0x1b1   : > { %9881 = vmatpush1.bf16.msk.msra.mxu1 %vm11528_vm11, %v13830_v55 }
 0x1b2   : > { %v12010_v41 = vpop.f32.mrb[4].mxu1  ;;  %8822 = vmatprep.subr.msk.mxu1 %vm11534_vm8, %v13838_v19 }
 0x1b3   : > { %v12015_v45 = vpop.f32.mrb[5].mxu1  ;;  %3791 = vmatmul.mubr.f32.gmra.mrb[32].mxu0 %v11136_v20 }
 0x1b4   : > { %3796 = vmatprep.mubr.f32.mxu0 %v13809_v0 }
 0x1b5   : > { %8823 = vmatpush1.msk.msra.mxu1 %vm11547_vm1, %v13838_v19 }
 0x1b6   : > { %5728 = vmatmul.mubr.f32.vlgmr.msra.gmra.mrb[22].mxu1 %v12018_v22  ;;  %9883 = vmatprep.subr.bf16.mxu1 %v13889_v15  ;;  %v12026_v16 = vpop.f32.mrb[6].mxu1 }
 0x1b7   : > { %9885 = vmatpush1.bf16.msra.mxu1 %v11638_v25  ;;  %v12029_v60 = vpop.f32.mrb[7].mxu1  ;;  %3798 = vmatmul.mubr.f32.gmra.mrb[34].mxu0 %v11147_v13 }
 0x1b8   : > { %9887 = vmatprep.subr.bf16.mxu1 %v11643_v3  ;;  %3878 = vmatprep.mubr.f32.mxu0 %v13809_v0 }
 0x1b9   : > { %5848 = vmatprep.mubr.f32.mxu1 %v13809_v0 }
 0x1ba   : > { %v12035_v53 = vpop.f32.mrb[8].mxu1 }
 0x1bb   : > { %9889 = vmatpush1.bf16.msra.mxu1 %v11650_v18  ;;  %v12038_v49 = vpop.f32.mrb[9].mxu1  ;;  %3880 = vmatmul.mubr.f32.vlgmr.msra.gmra.mrb[20].mxu0 %v10990_v51 }
 0x1bc   : > { %5787 = vmatprep.subr.mxu1 %v11655_v32  ;;  %3885 = vmatprep.mubr.f32.mxu0 %v13809_v0 }
 0x1bd   : > { %9733 = vmatpush1.bf16.msk.msra.mxu0 %vm11032_vm14, %v13830_v55 }
 0x1be   : > { %v12046_v3 = vpop.f32.mrb[10].mxu1  ;;  %9735 = vmatprep.subr.msk.bf16.mxu0 %vm11044_vm15, %v13830_v55 }
 0x1bf   : > { %5793 = vmatpush1.msra.mxu1 %v11660_v8  ;;  %v12052_v25 = vpop.f32.mrb[11].mxu1  ;;  %3887 = vmatmul.mubr.f32.gmra.mrb[22].mxu0 %v11009_v1 }
 0x1c0   : > { %5850 = vmatmul.mubr.f32.vlgmr.msra.gmra.mrb[22].mxu1 %v11964_v63  ;;  %9891 = vmatprep.subr.bf16.mxu1 %v11665_v47 }
 0x1c1   : > { %9893 = vmatpush1.bf16.msra.mxu1 %v11683_v29  ;;  %3892 = vmatprep.mubr.f32.mxu0 %v13809_v0 }
 0x1c2   : > { %v12059_v51 = vpop.f32.mrb[12].mxu1  ;;  %9895 = vmatprep.subr.bf16.mxu1 %v11687_v37  ;;  %5940 = vmatprep.mubr.f32.mxu1 %v13809_v0  ;;  %v12117_v37 = vld [vmem:[%s10795_s25] sm:$0xff] }
 0x1c3   : > { %v12063_v18 = vpop.f32.mrb[13].mxu1  ;;  %3894 = vmatmul.mubr.f32.gmra.mrb[24].mxu0 %v11053_v11 }
 0x1c4   : > { %3899 = vmatprep.mubr.f32.mxu0 %v13809_v0  ;;  %9737 = vmatpush1.bf16.msk.msra.mxu0 %vm11070_vm2, %v13830_v55 }
 0x1c5   : > { %9897 = vmatpush1.bf16.msra.mxu1 %v11694_v30  ;;  %8732 = vmatprep.subr.msk.mxu0 %vm10931_vm10, %v13838_v19 }
 0x1c6   : > { %v12074_v1 = vpop.f32.mrb[14].mxu1  ;;  %5882 = vmatprep.subr.mxu1 %v11618_v56  ;;  %v13903_v56 = vld [vmem:[#allocation2_spill] sm:$0xff] }
 0x1c7   : > { %v12077_v32 = vpop.f32.mrb[15].mxu1  ;;  %3901 = vmatmul.mubr.f32.gmra.mrb[26].mxu0 %v11085_v57  ;;  %v12106_v8 = vsub.s32 1, %v13903_v56 }
 0x1c8   : > { %3906 = vmatprep.mubr.f32.mxu0 %v13809_v0  ;;  %8733 = vmatpush1.msk.msra.mxu0 %vm10960_vm12, %v13838_v19 }
 0x1c9   : > { %5885 = vmatpush1.msra.mxu1 %v11631_v10  ;;  %9827 = vmatprep.subr.msk.bf16.mxu0 %vm11019_vm13, %v13830_v55  ;;  %v360_v10 = vsub.s32 3, %v13903_v56  ;;  %13904 = vst [vmem:[#allocation9_spill] sm:$0xff] %v12106_v8 }
 0x1ca   : > { %5943 = vmatmul.mubr.f32.vlgmr.msra.gmra.mrb[22].mxu1 %v11974_v43  ;;  %9899 = vmatprep.subr.msk.bf16.mxu1 %vm11425_vm4, %v13830_v55  ;;  %v12092_v11 = vpop.f32.mrb[16].mxu1 }
 0x1cb   : > { %9901 = vmatpush1.bf16.msk.msra.mxu1 %vm11494_vm9, %v13830_v55  ;;  %v12097_v57 = vpop.f32.mrb[17].mxu1  ;;  %3908 = vmatmul.mubr.f32.gmra.mrb[28].mxu0 %v11107_v46  ;;  %v361_v30 = vrot.slane %v12117_v37, %v360_v10 }
 0x1cc   : > { %9903 = vmatprep.subr.msk.bf16.mxu1 %vm11510_vm0, %v13830_v55  ;;  %3913 = vmatprep.mubr.f32.mxu0 %v13809_v0 }
 0x1cd   : > { %6023 = vmatprep.mubr.f32.mxu1 %v13809_v0 }
 0x1ce   : > { %v2391_v47 = vpop.f32.mrb[4].mxu0 }
 0x1cf   : > { %v12110_v29 = vadd.f32 %v11995_v6, %v2391_v47  ;;  %9905 = vmatpush1.bf16.msk.msra.mxu1 %vm11528_vm11, %v13830_v55  ;;  %v2393_v46 = vpop.f32.mrb[5].mxu0  ;;  %3915 = vmatmul.mubr.f32.gmra.mrb[30].mxu0 %v11125_v9  ;;  %v357_v6 = vrot.slane %v12117_v37, %v12106_v8 }
 0x1d0   : > { %v12121_v15 = vadd.f32 %v12001_v44, %v2393_v46  ;;  %8832 = vmatprep.subr.msk.mxu1 %vm11534_vm8, %v13838_v19  ;;  %3920 = vmatprep.mubr.f32.mxu0 %v13809_v0  ;;  %v12137_v44 = vrot.slane %v361_v30, %v12106_v8  ;;  %v13915_v30 = vld [vmem:[#allocation6_spill] sm:$0xff] }
 0x1d1   : > { %13905 = vst [vmem:[#allocation10_spill] sm:$0xff] %v12110_v29 }
 0x1d2   : > { %13906 = vst [vmem:[#allocation11_spill] sm:$0xff] %v12121_v15  ;;  %v2398_v36 = vpop.f32.mrb[6].mxu0  ;;  %vm13914_vm6 = vcmp.eq.s32.totalorder %v13903_v56, %v12137_v44  ;;  %vm399_vm7 = vcmp.eq.s32.totalorder %v13915_v30, %v12137_v44 }
 0x1d3   : > { %v12130_v47 = vadd.f32 %v12010_v41, %v2398_v36  ;;  %8833 = vmatpush1.msk.msra.mxu1 %vm11547_vm1, %v13838_v19  ;;  %v2400_v9 = vpop.f32.mrb[7].mxu0  ;;  %3922 = vmatmul.mubr.f32.gmra.mrb[32].mxu0 %v11136_v20  ;;  %v12145_v41 = vrot.slane %v357_v6, %v12106_v8 }
 0x1d4   : > { %v12140_v10 = vadd.f32 %v12015_v45, %v2400_v9  ;;  %6027 = vmatmul.mubr.f32.vlgmr.msra.gmra.mrb[22].mxu1 %v11985_v5  ;;  %9907 = vmatprep.subr.bf16.mxu1 %v11789_v31 }
 0x1d5   : > { %13907 = vst [vmem:[#allocation34_spill] sm:$0xff] %v12130_v47  ;;  %9909 = vmatpush1.bf16.msra.mxu1 %v11849_v52  ;;  %3927 = vmatprep.mubr.f32.mxu0 %v13809_v0  ;;  %v13911_v52 = vld [vmem:[#allocation4_spill] sm:$0xff]  ;;  %vm13918_vm13 = vcmp.eq.s32.totalorder %v13903_v56, %v12145_v41 }
 0x1d6   : > { %13908 = vst [vmem:[#allocation35_spill] sm:$0xff] %v12140_v10  ;;  %v2405_v46 = vpop.f32.mrb[8].mxu0  ;;  %9911 = vmatprep.subr.bf16.mxu1 %v11857_v4  ;;  %6127 = vmatprep.mubr.f32.mxu1 %v13809_v0  ;;  %vm390_vm3 = vcmp.eq.s32.totalorder %v13911_v52, %v12145_v41  ;;  %v6218_v4 = vsel %vm13913_vm5, %v11702_v34, 0  ;;  %vm13917_vm5 = vcmp.eq.s32.totalorder %v13911_v52, %v12137_v44  ;;  %v13947_v47 = vld [vmem:[#allocation32_spill] sm:$0xff] }
 0x1d7   : > { %v12152_v20 = vadd.f32 %v12026_v16, %v2405_v46  ;;  %v2407_v45 = vpop.f32.mrb[9].mxu0  ;;  %3929 = vmatmul.mubr.f32.gmra.mrb[34].mxu0 %v11147_v13  ;;  %v13912_v13 = vld [vmem:[#allocation5_spill] sm:$0xff]  ;;  %v8649_v34 = vsel %vm13917_vm5, 1.0, %v13809_v0  ;;  %v8648_v36 = vsel %vm390_vm3, 1.0, %v13809_v0  ;;  %v12208_v9 = vand.u32 4294901760, %v6218_v4 }
 0x1d8   : > { %v12158_v31 = vadd.f32 %v12029_v60, %v2407_v45  ;;  %4012 = vmatprep.mubr.f32.mxu0 %v13809_v0  ;;  %v8645_v60 = vsel %vm13914_vm6, 1.0, %v13809_v0  ;;  %vm13920_vm6 = vcmp.eq.s32.totalorder %v13912_v13, %v12137_v44  ;;  %v8657_v46 = vsel %vm399_vm7, 1.0, %v13809_v0 }
 0x1d9   : > { %13909 = vst [vmem:[#allocation13_spill] sm:$0xff] %v12152_v20  ;;  %9913 = vmatpush1.bf16.msra.mxu1 %v11869_v40  ;;  %vm398_vm5 = vcmp.eq.s32.totalorder %v13915_v30, %v12145_v41  ;;  %v12226_v45 = vsub.f32 %v8649_v34, %v8649_v34  ;;  %v12254_v33 = vsub.f32 %v8657_v46, %v8657_v46 }
 0x1da   : > { %13910 = vst [vmem:[#allocation36_spill] sm:$0xff] %v12158_v31  ;;  %v2412_v16 = vpop.f32.mrb[10].mxu0  ;;  %6068 = vmatprep.subr.mxu1 %v11634_v39  ;;  %v8644_v39 = vsel %vm13918_vm13, 1.0, %v13809_v0  ;;  %vm394_vm13 = vcmp.eq.s32.totalorder %v13912_v13, %v12145_v41 }
 0x1db   : > { %v12180_v6 = vadd.f32 %v12035_v53, %v2412_v16  ;;  %v2414_v40 = vpop.f32.mrb[11].mxu0  ;;  %4018 = vmatmul.mubr.f32.vlgmr.msra.gmra.mrb[36].mxu0 %v11839_v48  ;;  %v8653_v48 = vsel %vm13920_vm6, 1.0, %v13809_v0  ;;  %v12228_v16 = vsub.f32 %v8644_v39, %v8644_v39  ;;  %v8652_v58 = vsel %vm394_vm13, 1.0, %v13809_v0 }
 0x1dc   : > { %v12196_v53 = vadd.f32 %v12038_v49, %v2414_v40  ;;  %9829 = vmatpush1.bf16.msk.msra.mxu0 %vm11032_vm14, %v13830_v55  ;;  %5153 = vmatprep.mubr.f32.mxu0 %v13809_v0  ;;  %v12214_v49 = vsub.f32 %v8645_v60, %v8645_v60  ;;  %v12230_v60 = vsub.f32 %v8648_v36, %v8648_v36 }
 0x1dd   : > { %13916 = vst [vmem:[#allocation14_spill] sm:$0xff] %v12180_v6  ;;  %6072 = vmatpush1.msra.mxu1 %v11641_v42  ;;  %9831 = vmatprep.subr.msk.bf16.mxu0 %vm11044_vm15, %v13830_v55  ;;  %v12239_v31 = vsub.f32 %v8653_v48, %v8653_v48  ;;  %v12261_v39 = vsub.f32 %v6218_v4, %v12208_v9  ;;  %v13769_v48 = vand.u32 4294901760, %v12226_v45  ;;  %v13768_v46 = vand.u32 4294901760, %v12228_v16 }
 0x1de   : > { %13919 = vst [vmem:[#allocation15_spill] sm:$0xff] %v12196_v53  ;;  %6129 = vmatmul.mubr.f32.vlgmr.msra.gmra.mrb[22].mxu1 %v11964_v63  ;;  %9915 = vmatprep.subr.msk.bf16.mxu1 %vm11425_vm4, %v13830_v55  ;;  %v2419_v42 = vpop.f32.mrb[12].mxu0  ;;  %vm13933_vm6 = vcmp.eq.s32.totalorder %v13903_v56, %v12145_v41 }
 0x1df   : > { %v12233_v40 = vadd.f32 %v12046_v3, %v2419_v42  ;;  %9917 = vmatpush1.bf16.msk.msra.mxu1 %vm11494_vm9, %v13830_v55  ;;  %v2421_v53 = vpop.f32.mrb[13].mxu0  ;;  %6209 = vmatprep.mubr.f32.mxu1 %v13809_v0  ;;  %v8656_v3 = vsel %vm398_vm5, 1.0, %v13809_v0  ;;  %v13767_v42 = vand.u32 4294901760, %v12230_v60  ;;  %vm13928_vm9 = vcmp.eq.s32.totalorder %v13911_v52, %v12137_v44 }
 0x1e0   : > { %v12246_v34 = vadd.f32 %v12052_v25, %v2421_v53  ;;  %9833 = vmatpush1.bf16.msk.msra.mxu0 %vm11070_vm2, %v13830_v55  ;;  %9919 = vmatprep.subr.msk.bf16.mxu1 %vm11510_vm0, %v13830_v55  ;;  %v13923_v25 = vld [vmem:[#allocation7_spill] sm:$0xff]  ;;  %v12269_v53 = vsub.f32 %v8652_v58, %v8652_v58  ;;  %v12280_v10 = vsub.f32 %v8656_v3, %v8656_v3  ;;  %v13931_v3 = vand.u32 4294901760, %v12214_v49 }
 0x1e1   : > { %13921 = vst [vmem:[#allocation16_spill] sm:$0xff] %v12233_v40  ;;  %8792 = vmatprep.subr.msk.mxu0 %vm10931_vm10, %v13838_v19  ;;  %vm13766_vm4 = vcmp.eq.s32.totalorder %v13923_v25, %v12137_v44  ;;  %v13937_v40 = vld [vmem:[#allocation31_spill] sm:$0xff] }
 0x1e2   : > { %13922 = vst [vmem:[#allocation17_spill] sm:$0xff] %v12246_v34  ;;  %v2426_v36 = vpop.f32.mrb[14].mxu0  ;;  %v8661_v26 = vsel %vm13766_vm4, 1.0, %v13809_v0  ;;  %vm12324_vm4 = vmpackc.low %vm390_vm3, %vm13933_vm6  ;;  %vm13938_vm3 = vcmp.eq.s32.totalorder %v13912_v13, %v12137_v44  ;;  %v13948_v13 = vand.u32 4294901760, %v12269_v53  ;;  %v13949_v52 = vand.u32 4294901760, %v12280_v10 }
 0x1e3   : > { %v12275_v4 = vadd.f32 %v12059_v51, %v2426_v36  ;;  %9921 = vmatpush1.bf16.msk.msra.mxu1 %vm11528_vm11, %v13830_v55  ;;  %v2428_v34 = vpop.f32.mrb[15].mxu0  ;;  %vm402_vm11 = vcmp.eq.s32.totalorder %v13923_v25, %v12145_v41  ;;  %v6309_v36 = vsub.f32 %v12214_v49, %v13931_v3  ;;  %v13932_v51 = vld [vmem:[#allocation30_spill] sm:$0xff]  ;;  %v6327_v3 = vsub.f32 %v12230_v60, %v13767_v42 }
 0x1e4   : > { %v12284_v58 = vadd.f32 %v12063_v18, %v2428_v34  ;;  %8793 = vmatpush1.msk.msra.mxu0 %vm10960_vm12, %v13838_v19  ;;  %8842 = vmatprep.subr.msk.mxu1 %vm11534_vm8, %v13838_v19  ;;  %v12300_v18 = vand.u32 4294901760, %v12261_v39  ;;  %v13926_v34 = vld [vmem:[#allocation29_spill] sm:$0xff]  ;;  %vm13927_vm8 = vcmp.eq.s32.totalorder %v13903_v56, %v12137_v44  ;;  %v8660_v35 = vsel %vm402_vm11, 1.0, %v13809_v0 }
 0x1e5   : > { %13924 = vst [vmem:[#allocation37_spill] sm:$0xff] %v12275_v4  ;;  %5159 = vmatmul.mubr.f32.vlgmr.msra.gmra.mrb[38].mxu0 %v12018_v22  ;;  %9835 = vmatprep.subr.bf16.mxu0 %v13926_v34  ;;  %vm12310_vm0 = vmpackc.low %vm13928_vm9, %vm13927_vm8  ;;  %v6321_v34 = vsub.f32 %v12226_v45, %v13769_v48  ;;  %v13943_v48 = vand.u32 4294901760, %v12254_v33  ;;  %v6328_v29 = vand.u32 4294901760, %v6327_v3  ;;  %v6339_v30 = vsub.f32 %v12269_v53, %v13948_v13 }
 0x1e6   : > { %13925 = vst [vmem:[#allocation18_spill] sm:$0xff] %v12284_v58  ;;  %9837 = vmatpush1.bf16.msra.mxu0 %v13932_v51  ;;  %v2433_v17 = vpop.f32.mrb[16].mxu0  ;;  %5279 = vmatprep.mubr.f32.mxu0 %v13809_v0  ;;  %v6315_v51 = vsub.f32 %v12228_v16, %v13768_v46  ;;  %vm12352_vm8 = vmpackc.low %vm399_vm7, %vm13938_vm3  ;;  %v12356_v46 = vsub.f32 %v8661_v26, %v8661_v26 }
 0x1e7   : > { %v12340_v4 = vadd.f32 %v12074_v1, %v2433_v17  ;;  %8843 = vmatpush1.msk.msra.mxu1 %vm11547_vm1, %v13838_v19  ;;  %v2435_v15 = vpop.f32.mrb[17].mxu0  ;;  %9839 = vmatprep.subr.bf16.mxu0 %v13937_v40  ;;  %v13942_v17 = vand.u32 4294901760, %v12239_v31  ;;  %v6345_v58 = vsub.f32 %v12254_v33, %v13943_v48  ;;  %vm12392_vm1 = vmpackc.low %vm398_vm5, %vm394_vm13  ;;  %v6351_v8 = vsub.f32 %v12280_v10, %v13949_v52 }
 0x1e8   : > { %v12364_v40 = vadd.f32 %v12077_v32, %v2435_v15  ;;  %6211 = vmatmul.mubr.f32.vlgmr.msra.gmra.mrb[22].mxu1 %v11964_v63  ;;  %9923 = vmatprep.subr.msk.bf16.mxu1 %vm12310_vm0, %v13830_v55  ;;  %v6298_v32 = vsub.f32 %v12261_v39, %v12300_v18  ;;  %v13944_v15 = vld [vmem:[#allocation12_spill] sm:$0xff]  ;;  %vm13951_vm7 = vcmp.eq.s32.totalorder %v13923_v25, %v12137_v44  ;;  %v6340_v52 = vand.u32 4294901760, %v6339_v30 }
 0x1e9   : > { %13936 = vst [vmem:[#allocation19_spill] sm:$0xff] %v12340_v4  ;;  %v6333_v26 = vsub.f32 %v12239_v31, %v13942_v17  ;;  %9925 = vmatpush1.bf16.msk.msra.mxu1 %vm12324_vm4, %v13830_v55  ;;  %6294 = vmatprep.mubr.f32.mxu1 %v13809_v0  ;;  %v12396_v17 = vsub.f32 %v8660_v35, %v8660_v35  ;;  %v6322_v4 = vand.u32 4294901760, %v6321_v34  ;;  %v6346_v34 = vand.u32 4294901760, %v6345_v58  ;;  %vm13957_vm5 = vmmov %vm13951_vm7 }
 0x1ea   : > { %13941 = vst [vmem:[#allocation22_spill] sm:$0xff] %v12364_v40  ;;  %9841 = vmatpush1.bf16.msra.mxu0 %v13944_v15  ;;  %v2440_v1 = vpop.f32.mrb[18].mxu0  ;;  %9927 = vmatprep.subr.msk.bf16.mxu1 %vm12352_vm8, %v13830_v55  ;;  %v6310_v40 = vand.u32 4294901760, %v6309_v36  ;;  %v6316_v15 = vand.u32 4294901760, %v6315_v51  ;;  %v6352_v58 = vand.u32 4294901760, %v6351_v8  ;;  %v12424_v3 = vand.u32 4294901760, %v6298_v32 }
 0x1eb   : > { %v12399_v6 = vadd.f32 %v12092_v11, %v2440_v1  ;;  %v2442_v20 = vpop.f32.mrb[19].mxu0  ;;  %5218 = vmatprep.subr.mxu0 %v13947_v47  ;;  %v6334_v36 = vand.u32 4294901760, %v6333_v26  ;;  %v6356_v11 = vand.u32 4294901760, %v12356_v46  ;;  %v13950_v47 = vld [vmem:[#allocation33_spill] sm:$0xff]  ;;  %v6362_v51 = vand.u32 4294901760, %v12396_v17 }
 0x1ec   : > { %v12409_v35 = vadd.f32 %v12097_v57, %v2442_v20  ;;  %v9930_v13 = vpack.c.bf16 %v6322_v4, %v6310_v40  ;;  %v13952_v57 = vld [vmem:[#allocation8_spill] sm:$0xff]  ;;  %v9932_v20 = vpack.c.bf16 %v6328_v29, %v6316_v15  ;;  %vm13953_vm13 = vnez %v13804_v14  ;;  %v13964_v14 = vld [vmem:[#allocation9_spill] sm:$0xff] }
 0x1ed   : > { %9929 = vmatpush1.bf16.msk.msra.mxu1 %vm12392_vm1, %v13830_v55  ;;  %v9934_v1 = vpack.c.bf16 %v6346_v34, %v6334_v36  ;;  %v6357_v4 = vsub.f32 %v12356_v46, %v6356_v11  ;;  %v6363_v8 = vsub.f32 %v12396_v17, %v6362_v51  ;;  %v13958_v40 = vand.u32 4294901760, %v12214_v49 }
 0x1ee   : > { %5224 = vmatpush1.msra.mxu0 %v13950_v47  ;;  %8852 = vmatprep.subr.msk.mxu1 %vm13951_vm7, %v13838_v19  ;;  %v13959_v26 = vand.u32 4294901760, %v12226_v45  ;;  %v13960_v36 = vand.u32 4294901760, %v12228_v16  ;;  %v13961_v34 = vand.u32 4294901760, %v12230_v60 }
 0x1ef   : > { %5281 = vmatmul.mubr.f32.vlgmr.msra.gmra.mrb[38].mxu0 %v11964_v63  ;;  %9843 = vmatprep.subr.bf16.mxu0 %v13952_v57  ;;  %v6358_v29 = vand.u32 4294901760, %v6357_v4  ;;  %v6364_v30 = vand.u32 4294901760, %v6363_v8 }
 0x1f0   : > { %9845 = vmatpush1.bf16.msra.mxu0 %v13873_v7  ;;  %5371 = vmatprep.mubr.f32.mxu0 %v13809_v0  ;;  %v9936_v7 = vpack.c.bf16 %v6352_v58, %v6340_v52  ;;  %v9954_v32 = vpack.c.bf16 %v13959_v26, %v13958_v40  ;;  %v9956_v47 = vpack.c.bf16 %v13961_v34, %v13960_v36 }
 0x1f1   : > { %8853 = vmatpush1.msk.msra.mxu1 %vm402_vm11, %v13838_v19  ;;  %9847 = vmatprep.subr.bf16.mxu0 %v13874_v12  ;;  %v9938_v12 = vpack.c.bf16 %v12226_v45, %v12214_v49  ;;  %v13962_v49 = vand.u32 4294901760, %v12239_v31  ;;  %v13963_v45 = vand.u32 4294901760, %v12254_v33 }
 0x1f2   : > { %6300 = vmatmul.mubr.f32.vlgmr.msra.gmra.mrb[18].mxu1 %v12424_v3  ;;  %9931 = vmatprep.subr.bf16.mxu1 %v9930_v13 }
 0x1f3   : > { %9933 = vmatpush1.bf16.msra.mxu1 %v9932_v20  ;;  %6420 = vmatprep.mubr.f32.mxu1 %v13809_v0  ;;  %v9958_v57 = vpack.c.bf16 %v13963_v45, %v13962_v49 }
 0x1f4   : > { %9849 = vmatpush1.bf16.msra.mxu0 %v13875_v59  ;;  %9935 = vmatprep.subr.bf16.mxu1 %v9934_v1  ;;  %v9940_v59 = vpack.c.bf16 %v12230_v60, %v12228_v16 }
 0x1f5   : > { %5313 = vmatprep.subr.mxu0 %v10985_v23  ;;  %v9942_v23 = vpack.c.bf16 %v12254_v33, %v12239_v31  ;;  %v13966_v31 = vand.u32 4294901760, %v12280_v10 }
 0x1f7   : > { %9937 = vmatpush1.bf16.msra.mxu1 %v9936_v7 }
 0x1f8   : > { %5316 = vmatpush1.msra.mxu0 %v11002_v50  ;;  %6359 = vmatprep.subr.mxu1 %v6358_v29  ;;  %v9944_v50 = vpack.c.bf16 %v12280_v10, %v12269_v53 }
 0x1f9   : > { %5374 = vmatmul.mubr.f32.vlgmr.msra.gmra.mrb[38].mxu0 %v11974_v43  ;;  %9851 = vmatprep.subr.msk.bf16.mxu0 %vm13953_vm13, %v13830_v55  ;;  %v364_v43 = vsub.s32 5, %v13903_v56 }
 0x1fa   : > { %9853 = vmatpush1.bf16.msk.msra.mxu0 %vm11032_vm14, %v13830_v55  ;;  %5454 = vmatprep.mubr.f32.mxu0 %v13809_v0 }
 0x1fb   : > { %6365 = vmatpush1.msra.mxu1 %v6364_v30  ;;  %9855 = vmatprep.subr.msk.bf16.mxu0 %vm11044_vm15, %v13830_v55  ;;  %v365_v13 = vrot.slane %v12117_v37, %v364_v43 }
 0x1fc   : > { %6422 = vmatmul.mubr.f32.vlgmr.msra.gmra.mrb[18].mxu1 %v12208_v9  ;;  %9939 = vmatprep.subr.bf16.mxu1 %v9938_v12 }
 0x1fd   : > { %9941 = vmatpush1.bf16.msra.mxu1 %v9940_v59  ;;  %6512 = vmatprep.mubr.f32.mxu1 %v13809_v0  ;;  %v12542_v60 = vrot.slane %v365_v13, %v13964_v14 }
 0x1fe   : > { %9857 = vmatpush1.bf16.msk.msra.mxu0 %vm11070_vm2, %v13830_v55  ;;  %9943 = vmatprep.subr.bf16.mxu1 %v9942_v23 }
 0x1ff   : > { %8802 = vmatprep.subr.msk.mxu0 %vm10931_vm10, %v13838_v19  ;;  %vm388_vm9 = vcmp.eq.s32.totalorder %v13903_v56, %v12542_v60  ;;  %vm392_vm6 = vcmp.eq.s32.totalorder %v13967_v27, %v12542_v60  ;;  %vm400_vm3 = vcmp.eq.s32.totalorder %v13969_v24, %v12542_v60 }
 0x200   : > { %v8646_v33 = vsel %vm388_vm9, 1.0, %v13809_v0  ;;  %v8658_v22 = vsel %vm400_vm3, 1.0, %v13809_v0  ;;  %vm12670_vm7 = vmpackc.low %vm392_vm6, %vm388_vm9 }
 0x201   : > { %9945 = vmatpush1.bf16.msra.mxu1 %v9944_v50  ;;  %v12610_v20 = vsub.f32 %v8646_v33, %v8646_v33  ;;  %v12638_v42 = vsub.f32 %v8658_v22, %v8658_v22 }
 0x202   : > { %8803 = vmatpush1.msk.msra.mxu0 %vm10960_vm12, %v13838_v19  ;;  %6454 = vmatprep.subr.mxu1 %v12356_v46 }
 0x203   : > { %5458 = vmatmul.mubr.f32.vlgmr.msra.gmra.mrb[38].mxu0 %v11985_v5  ;;  %9859 = vmatprep.subr.bf16.mxu0 %v11100_v54  ;;  %v13954_v54 = vld [vmem:[#allocation20_spill] sm:$0xff]  ;;  %v13956_v5 = vld [vmem:[#allocation23_spill] sm:$0xff]  ;;  %v6883_v8 = vand.u32 4294901760, %v12610_v20  ;;  %v6919_v43 = vand.u32 4294901760, %v12638_v42 }
 0x204   : > { %9861 = vmatpush1.bf16.msra.mxu0 %v11179_v61  ;;  %5558 = vmatprep.mubr.f32.mxu0 %v13809_v0  ;;  %v368_v61 = vsub.s32 7, %v13903_v56 }
 0x205   : > { %6457 = vmatpush1.msra.mxu1 %v12396_v17  ;;  %9863 = vmatprep.subr.bf16.mxu0 %v11185_v62  ;;  %v13955_v62 = vld [vmem:[#allocation21_spill] sm:$0xff]  ;;  %v6920_v45 = vsub.f32 %v12638_v42, %v6919_v43 }
 0x206   : > { %6515 = vmatmul.mubr.f32.vlgmr.msra.gmra.mrb[18].mxu1 %v12261_v39  ;;  %9947 = vmatprep.subr.msk.bf16.mxu1 %vm12310_vm0, %v13830_v55  ;;  %v369_v15 = vrot.slane %v12117_v37, %v368_v61  ;;  %v13965_v37 = vand.u32 4294901760, %v12269_v53  ;;  %v6884_v61 = vsub.f32 %v12610_v20, %v6883_v8 }
 0x207   : > { %9949 = vmatpush1.bf16.msk.msra.mxu1 %vm12324_vm4, %v13830_v55  ;;  %6595 = vmatprep.mubr.f32.mxu1 %v13809_v0 }
 0x208   : > { %9865 = vmatpush1.bf16.msra.mxu0 %v13954_v54  ;;  %9951 = vmatprep.subr.msk.bf16.mxu1 %vm12352_vm8, %v13830_v55  ;;  %v12534_v2 = vrot.slane %v369_v15, %v13964_v14  ;;  %v9960_v16 = vpack.c.bf16 %v13966_v31, %v13965_v37 }
 0x209   : > { %5499 = vmatprep.subr.mxu0 %v13955_v62 }
 0x20b   : > { %9953 = vmatpush1.bf16.msk.msra.mxu1 %vm12392_vm1, %v13830_v55 }
 0x20c   : > { %5503 = vmatpush1.msra.mxu0 %v13956_v5  ;;  %8862 = vmatprep.subr.msk.mxu1 %vm13957_vm5, %v13838_v19 }
 0x20d   : > { %5560 = vmatmul.mubr.f32.vlgmr.msra.gmra.mrb[38].mxu0 %v11964_v63  ;;  %9867 = vmatprep.subr.msk.bf16.mxu0 %vm13953_vm13, %v13830_v55 }
 0x20e   : > { %9869 = vmatpush1.bf16.msk.msra.mxu0 %vm11032_vm14, %v13830_v55  ;;  %5640 = vmatprep.mubr.f32.mxu0 %v13809_v0  ;;  %vm389_vm14 = vcmp.eq.s32.totalorder %v13903_v56, %v12534_v2 }
 0x20f   : > { %8863 = vmatpush1.msk.msra.mxu1 %vm402_vm11, %v13838_v19  ;;  %9871 = vmatprep.subr.msk.bf16.mxu0 %vm11044_vm15, %v13830_v55  ;;  %vm393_vm15 = vcmp.eq.s32.totalorder %v13967_v27, %v12534_v2  ;;  %v8647_v10 = vsel %vm389_vm14, 1.0, %v13809_v0 }
 0x210   : > { %6599 = vmatmul.mubr.f32.vlgmr.msra.gmra.mrb[18].mxu1 %v12300_v18  ;;  %9955 = vmatprep.subr.bf16.mxu1 %v9954_v32  ;;  %v8651_v28 = vsel %vm393_vm15, 1.0, %v13809_v0  ;;  %v12602_v17 = vsub.f32 %v8647_v10, %v8647_v10 }
 0x211   : > { %9957 = vmatpush1.bf16.msra.mxu1 %v9956_v47  ;;  %6699 = vmatprep.mubr.f32.mxu1 %v13809_v0  ;;  %v6885_v47 = vand.u32 4294901760, %v6884_v61 }
 0x212   : > { %9873 = vmatpush1.bf16.msk.msra.mxu0 %vm11070_vm2, %v13830_v55  ;;  %9959 = vmatprep.subr.bf16.mxu1 %v9958_v57  ;;  %vm401_vm2 = vcmp.eq.s32.totalorder %v13969_v24, %v12534_v2  ;;  %v6877_v4 = vand.u32 4294901760, %v12602_v17  ;;  %v6921_v24 = vand.u32 4294901760, %v6920_v45 }
 0x213   : > { %8812 = vmatprep.subr.msk.mxu0 %vm10931_vm10, %v13838_v19  ;;  %vm397_vm10 = vcmp.eq.s32.totalorder %v13968_v38, %v12534_v2  ;;  %v8659_v46 = vsel %vm401_vm2, 1.0, %v13809_v0 }
 0x214   : > { %v8655_v53 = vsel %vm397_vm10, 1.0, %v13809_v0  ;;  %v6878_v50 = vsub.f32 %v12602_v17, %v6877_v4  ;;  %vm12694_vm13 = vmpackc.low %vm401_vm2, %vm397_vm10  ;;  %vm8356_vm10 = vcmask 7168  }
 0x215   : > { %9961 = vmatpush1.bf16.msra.mxu1 %v9960_v16  ;;  %v12621_v58 = vsub.f32 %v8655_v53, %v8655_v53 }
 0x216   : > { %8813 = vmatpush1.msk.msra.mxu0 %vm10960_vm12, %v13838_v19  ;;  %6640 = vmatprep.subr.mxu1 %v6356_v11  ;;  %vm396_vm12 = vcmp.eq.s32.totalorder %v13968_v38, %v12542_v60  ;;  %v12604_v11 = vsub.f32 %v8651_v28, %v8651_v28  ;;  %v6879_v36 = vand.u32 4294901760, %v6878_v50 }
 0x217   : > { %5642 = vmatmul.mubr.f32.vlgmr.msra.gmra.mrb[38].mxu0 %v11964_v63  ;;  %v8650_v63 = vsel %vm392_vm6, 1.0, %v13809_v0  ;;  %v8654_v21 = vsel %vm396_vm12, 1.0, %v13809_v0  ;;  %v6901_v30 = vand.u32 4294901760, %v12621_v58 }
 0x218   : > { %v12612_v52 = vsub.f32 %v8650_v63, %v8650_v63  ;;  %v12629_v1 = vsub.f32 %v8654_v21, %v8654_v21  ;;  %v6889_v7 = vand.u32 4294901760, %v12604_v11  ;;  %v9986_v22 = vpack.c.bf16 %v12604_v11, %v12602_v17 }
 0x219   : > { %6644 = vmatpush1.msra.mxu1 %v6362_v51  ;;  %v12623_v51 = vsub.f32 %v8659_v46, %v8659_v46  ;;  %v6902_v40 = vsub.f32 %v12621_v58, %v6901_v30 }
 0x21a   : > { %6701 = vmatmul.mubr.f32.vlgmr.msra.gmra.mrb[18].mxu1 %v12208_v9  ;;  %9963 = vmatprep.subr.msk.bf16.mxu1 %vm12310_vm0, %v13830_v55  ;;  %vm404_vm0 = vcmp.eq.s32.totalorder %v13923_v25, %v12542_v60  ;;  %v6895_v29 = vand.u32 4294901760, %v12612_v52  ;;  %v6890_v56 = vsub.f32 %v12604_v11, %v6889_v7  ;;  %v6907_v41 = vand.u32 4294901760, %v12629_v1 }
 0x21b   : > { %9965 = vmatpush1.bf16.msk.msra.mxu1 %vm12324_vm4, %v13830_v55  ;;  %6781 = vmatprep.mubr.f32.mxu1 %v13809_v0  ;;  %vm405_vm4 = vcmp.eq.s32.totalorder %v13923_v25, %v12534_v2  ;;  %v6913_v12 = vand.u32 4294901760, %v12623_v51  ;;  %v8662_v23 = vsel %vm404_vm0, 1.0, %v13809_v0  ;;  %v6903_v57 = vand.u32 4294901760, %v6902_v40 }
 0x21c   : > { %9967 = vmatprep.subr.msk.bf16.mxu1 %vm12352_vm8, %v13830_v55  ;;  %vm13970_vm8 = vmmov %vm13957_vm5  ;;  %v8663_v44 = vsel %vm405_vm4, 1.0, %v13809_v0  ;;  %v6896_v62 = vsub.f32 %v12612_v52, %v6895_v29  ;;  %v12735_v15 = vsub.f32 %v8662_v23, %v8662_v23  ;;  %v6891_v34 = vand.u32 4294901760, %v6890_v56 }
 0x21d   : > { %v12710_v5 = vsub.f32 %v8663_v44, %v8663_v44  ;;  %v6914_v26 = vsub.f32 %v12623_v51, %v6913_v12  ;;  %v6908_v49 = vsub.f32 %v12629_v1, %v6907_v41  ;;  %v9988_v44 = vpack.c.bf16 %v12612_v52, %v12610_v20 }
 0x21e   : > { %v6897_v13 = vand.u32 4294901760, %v6896_v62  ;;  %v9978_v16 = vpack.c.bf16 %v6891_v34, %v6879_v36  ;;  %v6931_v10 = vand.u32 4294901760, %v12735_v15  ;;  %v9992_v23 = vpack.c.bf16 %v12638_v42, %v12629_v1 }
 0x21f   : > { %9969 = vmatpush1.bf16.msk.msra.mxu1 %vm12392_vm1, %v13830_v55  ;;  %vm12656_vm1 = vmpackc.low %vm393_vm15, %vm389_vm14  ;;  %v6915_v37 = vand.u32 4294901760, %v6914_v26  ;;  %v6925_v31 = vand.u32 4294901760, %v12710_v5  ;;  %v6909_v38 = vand.u32 4294901760, %v6908_v49  ;;  %v10004_v50 = vpack.c.bf16 %v6895_v29, %v6883_v8 }
 0x220   : > { %8872 = vmatprep.subr.msk.mxu1 %vm13970_vm8, %v13838_v19  ;;  %v9980_v27 = vpack.c.bf16 %v6897_v13, %v6885_v47  ;;  %v6932_v53 = vsub.f32 %v12735_v15, %v6931_v10  ;;  %v10006_v56 = vpack.c.bf16 %v6913_v12, %v6901_v30  ;;  %v10008_v17 = vpack.c.bf16 %v6919_v43, %v6907_v41 }
 0x221   : > { %v9982_v28 = vpack.c.bf16 %v6915_v37, %v6903_v57  ;;  %v6926_v33 = vsub.f32 %v12710_v5, %v6925_v31  ;;  %v9984_v63 = vpack.c.bf16 %v6921_v24, %v6909_v38  ;;  %vm7362_vm5 = vcmask 1041408   ;;  %v8216_v38 = vld [vmem:[%s13677_s5] sm:$0xff]  ;;  %v8219_v24 = vld [vmem:[%s13677_s5 + $0x18] sm:$0xff] }
 0x222   : > { %v6933_v21 = vand.u32 4294901760, %v6932_v53 }
 0x223   : > { %8873 = vmatpush1.msk.msra.mxu1 %vm402_vm11, %v13838_v19  ;;  %vm12731_vm11 = vmpackc.low %vm400_vm3, %vm396_vm12  ;;  %v6927_v46 = vand.u32 4294901760, %v6926_v33 }
 0x224   : > { %6783 = vmatmul.mubr.f32.vlgmr.msra.gmra.mrb[18].mxu1 %v12208_v9  ;;  %9971 = vmatprep.subr.msk.bf16.mxu1 %vm12656_vm1, %v13830_v55 }
 0x225   : > { %9973 = vmatpush1.bf16.msk.msra.mxu1 %vm12670_vm7, %v13830_v55  ;;  %6863 = vmatprep.mubr.f32.mxu1 %v13809_v0 }
 0x226   : > { %9975 = vmatprep.subr.msk.bf16.mxu1 %vm12694_vm13, %v13830_v55 }
 0x229   : > { %9977 = vmatpush1.bf16.msk.msra.mxu1 %vm12731_vm11, %v13830_v55 }
 0x22a   : > { %8882 = vmatprep.subr.msk.mxu1 %vm405_vm4, %v13838_v19 }
 0x22d   : > { %8883 = vmatpush1.msk.msra.mxu1 %vm404_vm0, %v13838_v19 }
 0x22e   : > { %6869 = vmatmul.mubr.f32.vlgmr.msra.gmra.mrb[20].mxu1 %v12424_v3  ;;  %9979 = vmatprep.subr.bf16.mxu1 %v9978_v16  ;;  %v9990_v3 = vpack.c.bf16 %v12623_v51, %v12621_v58  ;;  %v10434_v16 = vmov 0  }
 0x22f   : > { %9981 = vmatpush1.bf16.msra.mxu1 %v9980_v27  ;;  %6989 = vmatprep.mubr.f32.mxu1 %v13809_v0  ;;  %v8218_v27 = vld [vmem:[%s13677_s5 + $0x10] sm:$0xff] }
 0x230   : > { %9983 = vmatprep.subr.bf16.mxu1 %v9982_v28  ;;  %10287 = vset.pattern.permute.xlu1 %v10434_v16 }
 0x231   : > { %10286 = vset.pattern.permute.xlu0 %v10434_v16  ;;  %8236 = vperm.xlu1 %10287, %v8218_v27  }
 0x232   : > { %8226 = vperm.xlu0 %10286, %v8216_v38  }
 0x233   : > { %9985 = vmatpush1.bf16.msra.mxu1 %v9984_v63 }
 0x234   : > { %6928 = vmatprep.subr.mxu1 %v6927_v46 }
 0x235   : > { %8241 = vperm.xlu1 %10287, %v8219_v24  }
 0x237   : > { %6934 = vmatpush1.msra.mxu1 %v6933_v21 }
 0x238   : > { %6991 = vmatmul.mubr.f32.vlgmr.msra.gmra.mrb[20].mxu1 %v12208_v9  ;;  %9987 = vmatprep.subr.bf16.mxu1 %v9986_v22 }
 0x239   : > { %9989 = vmatpush1.bf16.msra.mxu1 %v9988_v44  ;;  %7081 = vmatprep.mubr.f32.mxu1 %v13809_v0 }
 0x23a   : > { %9991 = vmatprep.subr.bf16.mxu1 %v9990_v3 }
 0x23d   : > { %9993 = vmatpush1.bf16.msra.mxu1 %v9992_v23 }
 0x23e   : > { %7023 = vmatprep.subr.mxu1 %v12710_v5 }
 0x241   : > { %7026 = vmatpush1.msra.mxu1 %v12735_v15 }
 0x242   : > { %7084 = vmatmul.mubr.f32.vlgmr.msra.gmra.mrb[20].mxu1 %v12261_v39  ;;  %9995 = vmatprep.subr.msk.bf16.mxu1 %vm12656_vm1, %v13830_v55  ;;  %v10002_v39 = vpack.c.bf16 %v6889_v7, %v6877_v4 }
 0x243   : > { %9997 = vmatpush1.bf16.msk.msra.mxu1 %vm12670_vm7, %v13830_v55  ;;  %7164 = vmatprep.mubr.f32.mxu1 %v13809_v0 }
 0x244   : > { %9999 = vmatprep.subr.msk.bf16.mxu1 %vm12694_vm13, %v13830_v55 }
 0x247   : > { %10001 = vmatpush1.bf16.msk.msra.mxu1 %vm12731_vm11, %v13830_v55 }
 0x248   : > { %8892 = vmatprep.subr.msk.mxu1 %vm405_vm4, %v13838_v19 }
 0x24b   : > { %8893 = vmatpush1.msk.msra.mxu1 %vm404_vm0, %v13838_v19 }
 0x24c   : > { %7168 = vmatmul.mubr.f32.vlgmr.msra.gmra.mrb[20].mxu1 %v12300_v18  ;;  %10003 = vmatprep.subr.bf16.mxu1 %v10002_v39 }
 0x24d   : > { %10005 = vmatpush1.bf16.msra.mxu1 %v10004_v50  ;;  %7268 = vmatprep.mubr.f32.mxu1 %v13809_v0 }
 0x24e   : > { %10007 = vmatprep.subr.bf16.mxu1 %v10006_v56 }
 0x251   : > { %10009 = vmatpush1.bf16.msra.mxu1 %v10008_v17 }
 0x252   : > { %7209 = vmatprep.subr.mxu1 %v6925_v31 }
 0x255   : > { %7213 = vmatpush1.msra.mxu1 %v6931_v10  ;;  %v8217_v10 = vld [vmem:[%s13677_s5 + $0x8] sm:$0xff] }
 0x256   : > { %7270 = vmatmul.mubr.f32.vlgmr.msra.gmra.mrb[20].mxu1 %v12208_v9  ;;  %10011 = vmatprep.subr.msk.bf16.mxu1 %vm12656_vm1, %v13830_v55 }
 0x257   : > { %10013 = vmatpush1.bf16.msk.msra.mxu1 %vm12670_vm7, %v13830_v55  ;;  %7350 = vmatprep.mubr.f32.mxu1 %v13809_v0 }
 0x258   : > { %10015 = vmatprep.subr.msk.bf16.mxu1 %vm12694_vm13, %v13830_v55  ;;  %8231 = vperm.xlu0 %10286, %v8217_v10  }
 0x25b   : > { %10017 = vmatpush1.bf16.msk.msra.mxu1 %vm12731_vm11, %v13830_v55 }
 0x25c   : > { %8902 = vmatprep.subr.msk.mxu1 %vm405_vm4, %v13838_v19 }
 0x25f   : > { %8903 = vmatpush1.msk.msra.mxu1 %vm404_vm0, %v13838_v19 }
 0x260   : > { %7352 = vmatmul.mubr.f32.vlgmr.msra.gmra.mrb[20].mxu1 %v12208_v9 }
 0x28e   : > { %v12835_v0 = vpop.f32.mrb[20].mxu0 }
 0x28f   : > { %v12837_v18 = vpop.f32.mrb[21].mxu0 }
 0x292   : > { %v12839_v11 = vpop.f32.mrb[22].mxu0 }
 0x293   : > { %v12841_v20 = vpop.f32.mrb[23].mxu0 }
 0x296   : > { %v12843_v55 = vpop.f32.mrb[24].mxu0 }
 0x297   : > { %v12845_v52 = vpop.f32.mrb[25].mxu0 }
 0x29a   : > { %v12847_v2 = vpop.f32.mrb[26].mxu0 }
 0x29b   : > { %v12849_v58 = vpop.f32.mrb[27].mxu0 }
 0x29e   : > { %v12851_v25 = vpop.f32.mrb[28].mxu0 }
 0x29f   : > { %v12853_v19 = vpop.f32.mrb[29].mxu0 }
 0x2a2   : > { %v12855_v9 = vpop.f32.mrb[30].mxu0 }
 0x2a3   : > { %v12857_v60 = vpop.f32.mrb[31].mxu0 }
 0x2a4   : > { %13979 = vst [vmem:[#allocation24_spill] sm:$0xff] %v12857_v60 }
 0x2a6   : > { %v12859_v51 = vpop.f32.mrb[32].mxu0 }
 0x2a7   : > { %13980 = vst [vmem:[#allocation25_spill] sm:$0xff] %v12859_v51  ;;  %v12861_v1 = vpop.f32.mrb[33].mxu0 }
 0x2a8   : > { %13981 = vst [vmem:[#allocation26_spill] sm:$0xff] %v12861_v1 }
 0x2aa   : > { %v12863_v4 = vpop.f32.mrb[34].mxu0 }
 0x2ab   : > { %13982 = vst [vmem:[#allocation27_spill] sm:$0xff] %v12863_v4  ;;  %v12865_v7 = vpop.f32.mrb[35].mxu0 }
 0x2ac   : > { %13983 = vst [vmem:[#allocation28_spill] sm:$0xff] %v12865_v7 }
 0x2ae   : > { %v4019_v42 = vpop.f32.mrb[36].mxu0 }
 0x2af   : > { %v4021_v8 = vpop.f32.mrb[37].mxu0 }
 0x2bb   : > { %v12867_v29 = vpop.f32.mrb[22].mxu1 }
 0x2bc   : > { %v12869_v30 = vpop.f32.mrb[23].mxu1 }
 0x2ea   : > { %v12871_v12 = vpop.f32.mrb[38].mxu0 }
 0x2eb   : > { %v12873_v48 = vpop.f32.mrb[39].mxu0 }
 0x2f7   : > { %v6784_v59 = vpop.f32.mrb[18].mxu1 }
 0x2f8   : > { %v12875_v54 = vadd.f32 %v6784_v59, %v4019_v42  ;;  %v6786_v61 = vpop.f32.mrb[19].mxu1 }
 0x2f9   : > { %v12877_v62 = vadd.f32 %v6786_v61, %v4021_v8 }
 0x2fa   : > { %v7358_v41 = vmul.f32 %v12875_v54, %v12875_v54 }
 0x2fb   : > { %v7359_v43 = vmul.f32 %v12877_v62, %v12877_v62 }
 0x2fc   : > { %v7363_v5 = vsel %vm7362_vm5, %v7358_v41, 0.0 }
 0x2fd   : > { %v7364_v40 = vrot.slane %v7363_v5, 4  ;;  %v7370_v26 = vsel %vm7362_vm5, %v7359_v43, 0.0  ;;  %v8348_v43 = vmul.f32 %v8216_v38, %v8216_v38 }
 0x2fe   : > { %v7371_v32 = vrot.slane %v7370_v26, 4 }
 0x2ff   : > { %v7365_v15 = vadd.f32 %v7364_v40, %v7363_v5  ;;  %v8349_v5 = vmul.f32 %v8217_v10, %v8217_v10 }
 0x300   : > { %v7372_v36 = vadd.f32 %v7371_v32, %v7370_v26  ;;  %v8350_v26 = vmul.f32 %v8218_v27, %v8218_v27  ;;  %v8357_v32 = vsel %vm8356_vm10, %v8348_v43, 0.0  ;;  %v8221_v27 = vld [vmem:[%s13677_s5 + $0x28] sm:$0xff] }
 0x301   : > { %v7366_v34 = vrot.slane %v7365_v15, 2  ;;  %v8353_v10 = vmul.f32 %v8221_v27, %v8221_v27  ;;  %8251 = vperm.xlu1 %10287, %v8221_v27  }
 0x302   : > { %v7373_v47 = vrot.slane %v7372_v36, 2 }
 0x303   : > { %v7367_v13 = vadd.f32 %v7366_v34, %v7365_v15  ;;  %v8358_v15 = vsel %vm8356_vm10, %v8349_v5, 0.0 }
 0x304   : > { %v7374_v49 = vadd.f32 %v7373_v47, %v7372_v36  ;;  %v8359_v36 = vadd.f32 %v8358_v15, %v8357_v32  ;;  %v8360_v47 = vsel %vm8356_vm10, %v8350_v26, 0.0 }
 0x305   : > { %v7368_v45 = vrot.slane %v7367_v13, 1 }
 0x306   : > { %v7375_v57 = vrot.slane %v7374_v49, 1 }
 0x307   : > { %v7369_v37 = vadd.f32 %v7368_v45, %v7367_v13  ;;  %v8351_v13 = vmul.f32 %v8219_v24, %v8219_v24  ;;  %v8361_v45 = vadd.f32 %v8360_v47, %v8359_v36 }
 0x308   : > { %v7376_v31 = vadd.f32 %v7375_v57, %v7374_v49  ;;  %v8220_v57 = vld [vmem:[%s13677_s5 + $0x20] sm:$0xff] }
 0x309   : > { %10288 = vrsqrt.f32 %v7369_v37  ;;  %vm7393_vm14 = vcmp.eq.f32.partialorder %v7369_v37, inf  ;;  %v7396_v53 = vand.u32 2147483648, %v7369_v37  ;;  %vm7395_vm15 = vcmp.eq.f32.partialorder %v7369_v37, 0.0  ;;  %8246 = vperm.xlu0 %10286, %v8220_v57  }
 0x30a   : > { %10290 = vrsqrt.f32 %v7376_v31  ;;  %vm7400_vm9 = vcmp.eq.f32.partialorder %v7376_v31, inf  ;;  %v7403_v22 = vand.u32 2147483648, %v7376_v31  ;;  %vm7402_vm6 = vcmp.eq.f32.partialorder %v7376_v31, 0.0 }
 0x313   : > { %v10289_v28 = vpop.eup %10288 }
 0x314   : > { %v10291_v33 = vpop.eup %10290  ;;  %v7392_v63 = vmul.f32 %v10289_v28, %v7369_v37  ;;  %v8222_v28 = vld [vmem:[%s13677_s5 + $0x30] sm:$0xff] }
 0x315   : > { %v7399_v46 = vmul.f32 %v10291_v33, %v7376_v31  ;;  %v8354_v33 = vmul.f32 %v8222_v28, %v8222_v28  ;;  %8256 = vperm.xlu0 %10286, %v8222_v28  }
 0x316   : > { %v7394_v21 = vsel %vm7393_vm14, %v7369_v37, %v7392_v63  ;;  %v8362_v37 = vsel %vm8356_vm10, %v8351_v13, 0.0  ;;  %v8366_v63 = vsel %vm8356_vm10, %v8353_v10, 0.0 }
 0x317   : > { %v7397_v44 = vsel %vm7395_vm15, %v7396_v53, %v7394_v21  ;;  %v7401_v3 = vsel %vm7400_vm9, %v7376_v31, %v7399_v46  ;;  %v8352_v31 = vmul.f32 %v8220_v57, %v8220_v57  ;;  %v8363_v16 = vadd.f32 %v8362_v37, %v8361_v45  ;;  %v8223_v53 = vld [vmem:[%s13677_s5 + $0x38] sm:$0xff] }
 0x318   : > { %v8904_v23 = vclamps-f32 %v7397_v44, 0.99999  ;;  %v7404_v39 = vsel %vm7402_vm6, %v7403_v22, %v7401_v3  ;;  %v7459_v34 = vmax.f32 %v7397_v44, 1e-06  ;;  %v8368_v44 = vsel %vm8356_vm10, %v8354_v33, 0.0  ;;  %8261 = vperm.xlu1 %10287, %v8223_v53  }
 0x319   : > { %v8905_v50 = vclamps-f32 %v7404_v39, 0.99999  ;;  %v7460_v49 = vmax.f32 %v7404_v39, 1e-06  ;;  %v8364_v38 = vsel %vm8356_vm10, %v8352_v31, 0.0  ;;  %v8355_v3 = vmul.f32 %v8223_v53, %v8223_v53 }
 0x31a   : > { %v7431_v56 = vsub.f32 1.0, %v8904_v23  ;;  %v7427_v42 = vadd.f32 1.0, %v8904_v23  ;;  %v8365_v24 = vadd.f32 %v8364_v38, %v8363_v16 }
 0x31b   : > { %v7432_v17 = vsub.f32 1.0, %v8905_v50  ;;  %v7428_v59 = vadd.f32 1.0, %v8905_v50 }
 0x31c   : > { %10292 = vrcp.f32 %v7431_v56  ;;  %v8367_v46 = vadd.f32 %v8366_v63, %v8365_v24 }
 0x31d   : > { %10294 = vrcp.f32 %v7432_v17 }
 0x31e   : > { %v8369_v17 = vadd.f32 %v8368_v44, %v8367_v46 }
 0x326   : > { %v10293_v8 = vpop.eup %10292 }
 0x327   : > { %v10295_v61 = vpop.eup %10294  ;;  %v7436_v41 = vmul.f32 %v10293_v8, %v7427_v42 }
 0x328   : > { %v7438_v40 = vmul.f32 %v10295_v61, %v7428_v59  ;;  %v8370_v59 = vsel %vm8356_vm10, %v8355_v3, 0.0 }
 0x329   : > { %10296 = vlog2.f32 %v7436_v41  ;;  %v8371_v43 = vadd.f32 %v8370_v59, %v8369_v17 }
 0x32a   : > { %10298 = vlog2.f32 %v7438_v40 }
 0x32b   : > { %10300 = vrcp.f32 %v7459_v34  ;;  %v8372_v36 = vrot.slane %v8371_v43, 4 }
 0x32c   : > { %10302 = vrcp.f32 %v7460_v49 }
 0x32d   : > { %v8373_v37 = vadd.f32 %v8372_v36, %v8371_v43 }
 0x32f   : > { %v8374_v10 = vrot.slane %v8373_v37, 2 }
 0x331   : > { %v8375_v53 = vadd.f32 %v8374_v10, %v8373_v37 }
 0x333   : > { %v10297_v21 = vpop.eup %10296  ;;  %v12915_v22 = vpop.f32.mrb[20].mxu1  ;;  %v8376_v3 = vrot.slane %v8375_v53, 1 }
 0x334   : > { %v10299_v23 = vpop.eup %10298  ;;  %v7444_v39 = vmul.f32 0.6931472, %v10297_v21  ;;  %v7360_v50 = vmul.f32 %v12915_v22, %v12915_v22  ;;  %v12920_v56 = vpop.f32.mrb[21].mxu1 }
 0x335   : > { %v7446_v42 = vmul.f32 0.6931472, %v10299_v23  ;;  %v7361_v8 = vmul.f32 %v12920_v56, %v12920_v56  ;;  %v10301_v34 = vpop.eup %10300 }
 0x336   : > { %v7451_v61 = vmul.f32 0.5, %v7444_v39  ;;  %v7377_v41 = vsel %vm7362_vm5, %v7360_v50, 0.0  ;;  %v10303_v49 = vpop.eup %10302 }
 0x337   : > { %v7452_v5 = vmul.f32 0.5, %v7446_v42  ;;  %v7378_v40 = vrot.slane %v7377_v41, 4  ;;  %v7384_v26 = vsel %vm7362_vm5, %v7361_v8, 0.0  ;;  %v8377_v42 = vadd.f32 %v8376_v3, %v8375_v53 }
 0x338   : > { %v7455_v32 = vmul.f32 %v12875_v54, %v7451_v61  ;;  %v7385_v15 = vrot.slane %v7384_v26, 4  ;;  %v7628_v53 = vmax.f32 %v12873_v48, 0.0 }
 0x339   : > { %v7456_v47 = vmul.f32 %v12877_v62, %v7452_v5  ;;  %v7379_v13 = vadd.f32 %v7378_v40, %v7377_v41  ;;  %8384 = vperm.xlu0 %10286, %v8377_v42  }
 0x33a   : > { %v7464_v45 = vmul.f32 %v10301_v34, %v7455_v32  ;;  %v7386_v57 = vadd.f32 %v7385_v15, %v7384_v26  ;;  %vm7640_vm8 = vcmp.eq.f32.partialorder %v7628_v53, inf  ;;  %vm7642_vm7 = vcmp.eq.f32.partialorder %v7628_v53, 0.0 }
 0x33b   : > { %v7466_v31 = vmul.f32 %v10303_v49, %v7456_v47  ;;  %v7380_v16 = vrot.slane %v7379_v13, 2 }
 0x33c   : > { %v7471_v27 = vsel %vm7362_vm5, %v7464_v45, -inf  ;;  %v7387_v38 = vrot.slane %v7386_v57, 2 }
 0x33d   : > { %v7472_v24 = vrot.slane %v7471_v27, 4  ;;  %v7478_v28 = vsel %vm7362_vm5, %v7466_v31, -inf  ;;  %v7381_v54 = vadd.f32 %v7380_v16, %v7379_v13 }
 0x33e   : > { %v7479_v33 = vrot.slane %v7478_v28, 4  ;;  %v7388_v63 = vadd.f32 %v7387_v38, %v7386_v57 }
 0x33f   : > { %v7473_v46 = vmax.f32 %v7471_v27, %v7472_v24  ;;  %v7382_v62 = vrot.slane %v7381_v54, 1 }
 0x340   : > { %v7480_v21 = vmax.f32 %v7478_v28, %v7479_v33  ;;  %v7389_v44 = vrot.slane %v7388_v63, 1  ;;  %v7627_v33 = vmax.f32 %v12871_v12, 0.0 }
 0x341   : > { %v7474_v23 = vrot.slane %v7473_v46, 2  ;;  %v7383_v39 = vadd.f32 %v7382_v62, %v7381_v54 }
 0x342   : > { %v7481_v50 = vrot.slane %v7480_v21, 2  ;;  %v7390_v17 = vadd.f32 %v7389_v44, %v7388_v63  ;;  %vm7633_vm0 = vcmp.eq.f32.partialorder %v7627_v33, inf  ;;  %vm7635_vm1 = vcmp.eq.f32.partialorder %v7627_v33, 0.0 }
 0x343   : > { %v7475_v8 = vmax.f32 %v7473_v46, %v7474_v23  ;;  %10304 = vrsqrt.f32 %v7383_v39  ;;  %vm7407_vm2 = vcmp.eq.f32.partialorder %v7383_v39, inf  ;;  %v7410_v13 = vand.u32 2147483648, %v7383_v39 }
 0x344   : > { %v7482_v59 = vmax.f32 %v7480_v21, %v7481_v50  ;;  %10306 = vrsqrt.f32 %v7390_v17  ;;  %vm7409_vm12 = vcmp.eq.f32.partialorder %v7383_v39, 0.0  ;;  %vm7414_vm3 = vcmp.eq.f32.partialorder %v7390_v17, inf }
 0x345   : > { %v7476_v61 = vrot.slane %v7475_v8, 1  ;;  %v7417_v37 = vand.u32 2147483648, %v7390_v17  ;;  %vm7416_vm4 = vcmp.eq.f32.partialorder %v7390_v17, 0.0 }
 0x346   : > { %v7483_v41 = vrot.slane %v7482_v59, 1 }
 0x347   : > { %v7477_v43 = vmax.f32 %v7475_v8, %v7476_v61 }
 0x348   : > { %v7484_v5 = vmax.f32 %v7482_v59, %v7483_v41 }
 0x349   : > { %v7499_v40 = vsub.f32 %v7464_v45, %v7477_v43 }
 0x34a   : > { %v7500_v26 = vsub.f32 %v7466_v31, %v7484_v5 }
 0x34b   : > { %v7503_v32 = vmul.f32 1.442695, %v7499_v40 }
 0x34c   : > { %v7505_v15 = vmul.f32 1.442695, %v7500_v26 }
 0x34d   : > { %v10305_v36 = vpop.eup %10304  ;;  %10308 = vpow2.f32 %v7503_v32 }
 0x34e   : > { %v10307_v34 = vpop.eup %10306  ;;  %10310 = vpow2.f32 %v7505_v15  ;;  %v7406_v47 = vmul.f32 %v10305_v36, %v7383_v39 }
 0x34f   : > { %v7413_v49 = vmul.f32 %v10307_v34, %v7390_v17 }
 0x350   : > { %v7408_v57 = vsel %vm7407_vm2, %v7383_v39, %v7406_v47 }
 0x351   : > { %v7411_v16 = vsel %vm7409_vm12, %v7410_v13, %v7408_v57  ;;  %v7415_v27 = vsel %vm7414_vm3, %v7390_v17, %v7413_v49 }
 0x352   : > { %v8906_v38 = vclamps-f32 %v7411_v16, 0.99999  ;;  %v7418_v45 = vsel %vm7416_vm4, %v7417_v37, %v7415_v27  ;;  %v7461_v26 = vmax.f32 %v7411_v16, 1e-06  ;;  %v7636_v37 = vand.u32 2147483648, %v7627_v33 }
 0x353   : > { %v8907_v31 = vclamps-f32 %v7418_v45, 0.99999  ;;  %v7462_v15 = vmax.f32 %v7418_v45, 1e-06 }
 0x354   : > { %v7433_v10 = vsub.f32 1.0, %v8906_v38  ;;  %v7429_v17 = vadd.f32 1.0, %v8906_v38 }
 0x355   : > { %v7434_v24 = vsub.f32 1.0, %v8907_v31  ;;  %v7430_v59 = vadd.f32 1.0, %v8907_v31 }
 0x356   : > { %10312 = vrcp.f32 %v7433_v10  ;;  %v7643_v10 = vand.u32 2147483648, %v7628_v53 }
 0x357   : > { %v10309_v28 = vpop.eup %10308  ;;  %10314 = vrcp.f32 %v7434_v24 }
 0x358   : > { %v10311_v54 = vpop.eup %10310  ;;  %v7511_v63 = vsel %vm7362_vm5, %v10309_v28, 0.0  ;;  %10316 = vrsqrt.f32 %v7627_v33 }
 0x359   : > { %v7512_v46 = vrot.slane %v7511_v63, 4  ;;  %v7518_v62 = vsel %vm7362_vm5, %v10311_v54, 0.0  ;;  %10318 = vrsqrt.f32 %v7628_v53 }
 0x35a   : > { %v7519_v21 = vrot.slane %v7518_v62, 4 }
 0x35b   : > { %v7513_v44 = vadd.f32 %v7512_v46, %v7511_v63 }
 0x35c   : > { %v7520_v3 = vadd.f32 %v7519_v21, %v7518_v62 }
 0x35d   : > { %v7514_v23 = vrot.slane %v7513_v44, 2 }
 0x35e   : > { %v7521_v39 = vrot.slane %v7520_v3, 2 }
 0x35f   : > { %v7515_v50 = vadd.f32 %v7514_v23, %v7513_v44 }
 0x360   : > { %v10313_v42 = vpop.eup %10312  ;;  %v7522_v8 = vadd.f32 %v7521_v39, %v7520_v3 }
 0x361   : > { %v10315_v12 = vpop.eup %10314  ;;  %v7516_v61 = vrot.slane %v7515_v50, 1  ;;  %v7440_v41 = vmul.f32 %v10313_v42, %v7429_v17 }
 0x362   : > { %v7523_v43 = vrot.slane %v7522_v8, 1  ;;  %v7442_v48 = vmul.f32 %v10315_v12, %v7430_v59  ;;  %v10317_v32 = vpop.eup %10316 }
 0x363   : > { %v7517_v5 = vadd.f32 %v7516_v61, %v7515_v50  ;;  %10320 = vlog2.f32 %v7440_v41  ;;  %v10319_v36 = vpop.eup %10318  ;;  %v7632_v34 = vmul.f32 %v10317_v32, %v7627_v33 }
 0x364   : > { %v7524_v40 = vadd.f32 %v7523_v43, %v7522_v8  ;;  %10322 = vlog2.f32 %v7442_v48  ;;  %v7639_v47 = vmul.f32 %v10319_v36, %v7628_v53 }
 0x365   : > { %10324 = vrcp.f32 %v7517_v5  ;;  %v7634_v49 = vsel %vm7633_vm0, %v7627_v33, %v7632_v34  ;;  %vm14016_vm0 = vcmask 523264  }
 0x366   : > { %10326 = vrcp.f32 %v7524_v40  ;;  %v7641_v27 = vsel %vm7640_vm8, %v7628_v53, %v7639_v47  ;;  %v12935_v63 = vsel %vm7635_vm1, %v7636_v37, %v7634_v49  ;;  %vm14017_vm8 = vmmov %vm14016_vm0 }
 0x367   : > { %10328 = vrcp.f32 %v7461_v26  ;;  %v12939_v62 = vsel %vm7642_vm7, %v7643_v10, %v7641_v27  ;;  %v8908_v39 = vclamps-f32 %v12935_v63, 0.99999  ;;  %vm14018_vm1 = vmmov %vm14016_vm0 }
 0x368   : > { %10330 = vrcp.f32 %v7462_v15  ;;  %v8909_v17 = vclamps-f32 %v12939_v62, 0.99999  ;;  %vm14019_vm7 = vmmov %vm14016_vm0 }
 0x369   : > { %v7671_v41 = vsub.f32 1.0, %v8908_v39 }
 0x36a   : > { %v7672_v40 = vsub.f32 1.0, %v8909_v17 }
 0x36b   : > { %10332 = vrcp.f32 %v7671_v41 }
 0x36c   : > { %10334 = vrcp.f32 %v7672_v40 }
 0x36d   : > { %v10321_v13 = vpop.eup %10320 }
 0x36e   : > { %v10323_v57 = vpop.eup %10322  ;;  %v7448_v38 = vmul.f32 0.6931472, %v10321_v13 }
 0x36f   : > { %v10325_v31 = vpop.eup %10324  ;;  %v7450_v16 = vmul.f32 0.6931472, %v10323_v57 }
 0x370   : > { %v10327_v24 = vpop.eup %10326  ;;  %v12937_v45 = vmul.f32 %v10325_v31, %v10309_v28  ;;  %v7453_v46 = vmul.f32 0.5, %v7448_v38 }
 0x371   : > { %v12941_v21 = vmul.f32 %v10327_v24, %v10311_v54  ;;  %v7454_v44 = vmul.f32 0.5, %v7450_v16  ;;  %v10329_v33 = vpop.eup %10328 }
 0x372   : > { %v7547_v3 = vmul.f32 %v12937_v45, %v12937_v45  ;;  %v7457_v23 = vmul.f32 %v7453_v46, %v12915_v22  ;;  %v10331_v53 = vpop.eup %10330 }
 0x373   : > { %v7548_v50 = vmul.f32 %v12941_v21, %v12941_v21  ;;  %v7458_v28 = vmul.f32 %v7454_v44, %v12920_v56 }
 0x374   : > { %v7551_v54 = vsel %vm7362_vm5, %v7547_v3, 0.0  ;;  %v7468_v42 = vmul.f32 %v10329_v33, %v7457_v23 }
 0x375   : > { %v7552_v8 = vrot.slane %v7551_v54, 4  ;;  %v7558_v59 = vsel %vm7362_vm5, %v7548_v50, 0.0  ;;  %v7470_v12 = vmul.f32 %v10331_v53, %v7458_v28  ;;  %v10333_v23 = vpop.eup %10332  ;;  %v7667_v53 = vadd.f32 1.0, %v8908_v39 }
 0x376   : > { %v7559_v61 = vrot.slane %v7558_v59, 4  ;;  %v7485_v22 = vsel %vm7362_vm5, %v7468_v42, -inf  ;;  %v10335_v28 = vpop.eup %10334 }
 0x377   : > { %v7553_v43 = vadd.f32 %v7552_v8, %v7551_v54  ;;  %v7486_v48 = vrot.slane %v7485_v22, 4  ;;  %v7492_v5 = vsel %vm7362_vm5, %v7470_v12, -inf  ;;  %v12956_v54 = vmax.f32 %v12867_v29, 0.0 }
 0x378   : > { %v7560_v56 = vadd.f32 %v7559_v61, %v7558_v59  ;;  %v7493_v26 = vrot.slane %v7492_v5, 4  ;;  %v7668_v8 = vadd.f32 1.0, %v8909_v17 }
 0x379   : > { %v7554_v32 = vrot.slane %v7553_v43, 2  ;;  %v7487_v15 = vmax.f32 %v7485_v22, %v7486_v48  ;;  %v7676_v22 = vmul.f32 %v10333_v23, %v7667_v53  ;;  %v12960_v48 = vmax.f32 %v12869_v30, 0.0 }
 0x37a   : > { %v7561_v36 = vrot.slane %v7560_v56, 2  ;;  %v7494_v34 = vmax.f32 %v7492_v5, %v7493_v26  ;;  %v7678_v41 = vmul.f32 %v10335_v28, %v7668_v8  ;;  %vm7647_vm9 = vcmp.eq.f32.partialorder %v12956_v54, inf }
 0x37b   : > { %v7555_v47 = vadd.f32 %v7554_v32, %v7553_v43  ;;  %v7488_v13 = vrot.slane %v7487_v15, 2  ;;  %vm7654_vm6 = vcmp.eq.f32.partialorder %v12960_v48, inf  ;;  %vm7649_vm10 = vcmp.eq.f32.partialorder %v12956_v54, 0.0 }
 0x37c   : > { %v7562_v49 = vadd.f32 %v7561_v36, %v7560_v56  ;;  %v7495_v57 = vrot.slane %v7494_v34, 2  ;;  %vm7656_vm2 = vcmp.eq.f32.partialorder %v12960_v48, 0.0 }
 0x37d   : > { %v7556_v37 = vrot.slane %v7555_v47, 1  ;;  %v7489_v27 = vmax.f32 %v7487_v15, %v7488_v13 }
 0x37e   : > { %v7563_v38 = vrot.slane %v7562_v49, 1  ;;  %v7496_v31 = vmax.f32 %v7494_v34, %v7495_v57 }
 0x37f   : > { %v7557_v10 = vadd.f32 %v7556_v37, %v7555_v47  ;;  %v7490_v16 = vrot.slane %v7489_v27, 1 }
 0x380   : > { %v7564_v24 = vadd.f32 %v7563_v38, %v7562_v49  ;;  %v7497_v46 = vrot.slane %v7496_v31, 1 }
 0x381   : > { %10336 = vrsqrt.f32 %v7557_v10  ;;  %v7491_v44 = vmax.f32 %v7489_v27, %v7490_v16  ;;  %vm7581_vm13 = vcmp.eq.f32.partialorder %v7557_v10, inf  ;;  %v7584_v29 = vand.u32 2147483648, %v7557_v10 }
 0x382   : > { %10338 = vrsqrt.f32 %v7564_v24  ;;  %v7498_v3 = vmax.f32 %v7496_v31, %v7497_v46  ;;  %vm7583_vm11 = vcmp.eq.f32.partialorder %v7557_v10, 0.0  ;;  %vm7588_vm14 = vcmp.eq.f32.partialorder %v7564_v24, inf }
 0x383   : > { %v7501_v33 = vsub.f32 %v7468_v42, %v7491_v44  ;;  %v7591_v5 = vand.u32 2147483648, %v7564_v24  ;;  %vm7590_vm15 = vcmp.eq.f32.partialorder %v7564_v24, 0.0 }
 0x384   : > { %v7502_v50 = vsub.f32 %v7470_v12, %v7498_v3 }
 0x385   : > { %v7507_v59 = vmul.f32 1.442695, %v7501_v33 }
 0x386   : > { %v7509_v61 = vmul.f32 1.442695, %v7502_v50  ;;  %v7703_v50 = vmax.f32 %v12935_v63, 1e-06 }
 0x387   : > { %10340 = vpow2.f32 %v7507_v59 }
 0x388   : > { %10342 = vpow2.f32 %v7509_v61  ;;  %v7704_v61 = vmax.f32 %v12939_v62, 1e-06 }
 0x389   : > { %10344 = vrsqrt.f32 %v12956_v54 }
 0x38a   : > { %10346 = vlog2.f32 %v7676_v22 }
 0x38b   : > { %v10337_v43 = vpop.eup %10336  ;;  %10348 = vlog2.f32 %v7678_v41 }
 0x38c   : > { %v10339_v42 = vpop.eup %10338  ;;  %v7580_v12 = vmul.f32 %v10337_v43, %v7557_v10  ;;  %10350 = vrsqrt.f32 %v12960_v48 }
 0x38d   : > { %v7587_v39 = vmul.f32 %v10339_v42, %v7564_v24  ;;  %v7650_v42 = vand.u32 2147483648, %v12956_v54 }
 0x38e   : > { %v7582_v17 = vsel %vm7581_vm13, %v7557_v10, %v7580_v12  ;;  %vm14020_vm13 = vmmov %vm14016_vm0 }
 0x38f   : > { %v7585_v40 = vsel %vm7583_vm11, %v7584_v29, %v7582_v17  ;;  %v7589_v56 = vsel %vm7588_vm14, %v7564_v24, %v7587_v39  ;;  %vm14021_vm11 = vmmov %vm14016_vm0 }
 0x390   : > { %10352 = vtanh.f32 %v7585_v40  ;;  %v7615_v26 = vmax.f32 %v7585_v40, 1e-06  ;;  %v7592_v30 = vsel %vm7590_vm15, %v7591_v5, %v7589_v56  ;;  %vm14022_vm14 = vmmov %vm14016_vm0 }
 0x391   : > { %10354 = vtanh.f32 %v7592_v30  ;;  %v7616_v32 = vmax.f32 %v7592_v30, 1e-06  ;;  %v12963_v15 = vpop.eup %10340  ;;  %v7657_v30 = vand.u32 2147483648, %v12960_v48  ;;  %vm14023_vm15 = vmmov %vm14016_vm0 }
 0x392   : > { %10356 = vrcp.f32 %v7615_v26  ;;  %v12965_v36 = vpop.eup %10342  ;;  %v7525_v34 = vsel %vm7362_vm5, %v12963_v15, 0.0 }
 0x393   : > { %10358 = vrcp.f32 %v7616_v32  ;;  %v10345_v47 = vpop.eup %10344  ;;  %v7526_v13 = vrot.slane %v7525_v34, 4  ;;  %v7532_v49 = vsel %vm7362_vm5, %v12965_v36, 0.0 }
 0x394   : > { %v10347_v57 = vpop.eup %10346  ;;  %v7533_v37 = vrot.slane %v7532_v49, 4  ;;  %v7646_v33 = vmul.f32 %v10345_v47, %v12956_v54  ;;  %10360 = vrcp.f32 %v7703_v50 }
 0x395   : > { %v10349_v27 = vpop.eup %10348  ;;  %v7527_v38 = vadd.f32 %v7526_v13, %v7525_v34  ;;  %v7684_v16 = vmul.f32 0.6931472, %v10347_v57  ;;  %10362 = vrcp.f32 %v7704_v61 }
 0x396   : > { %v7534_v31 = vadd.f32 %v7533_v37, %v7532_v49  ;;  %v10351_v10 = vpop.eup %10350  ;;  %v7686_v44 = vmul.f32 0.6931472, %v10349_v27  ;;  %v7648_v5 = vsel %vm7647_vm9, %v12956_v54, %v7646_v33  ;;  %vm14024_vm9 = vmmov %vm14016_vm0 }
 0x397   : > { %v7528_v24 = vrot.slane %v7527_v38, 2  ;;  %v7653_v59 = vmul.f32 %v10351_v10, %v12960_v48  ;;  %v7691_v29 = vmul.f32 0.5, %v7684_v16  ;;  %v12986_v32 = vsel %vm7649_vm10, %v7650_v42, %v7648_v5  ;;  %vm14026_vm10 = vmmov %vm14016_vm0 }
 0x398   : > { %v7535_v3 = vrot.slane %v7534_v31, 2  ;;  %v7692_v17 = vmul.f32 0.5, %v7686_v44  ;;  %v8910_v47 = vclamps-f32 %v12986_v32, 0.99999 }
 0x399   : > { %v7529_v53 = vadd.f32 %v7528_v24, %v7527_v38 }
 0x39a   : > { %v10353_v46 = vpop.eup %10352  ;;  %v7536_v41 = vadd.f32 %v7535_v3, %v7534_v31  ;;  %v7673_v57 = vsub.f32 1.0, %v8910_v47  ;;  %v12995_v24 = vadd.f32 1.0, %v8910_v47 }
 0x39b   : > { %v10355_v23 = vpop.eup %10354  ;;  %v7611_v28 = vmul.f32 %v10353_v46, %v12937_v45  ;;  %v7530_v39 = vrot.slane %v7529_v53, 1  ;;  %v13984_v46 = vld [vmem:[#allocation3_spill] sm:$0xff] }
 0x39c   : > { %v10357_v8 = vpop.eup %10356  ;;  %v7612_v22 = vmul.f32 %v10355_v23, %v12941_v21  ;;  %v7537_v45 = vrot.slane %v7536_v41, 1  ;;  %v7655_v21 = vsel %vm7654_vm6, %v12960_v48, %v7653_v59  ;;  %v13986_v59 = vld [vmem:[#allocation34_spill] sm:$0xff]  ;;  %vm14025_vm6 = vmmov %vm14016_vm0 }
 0x39d   : > { %v10359_v43 = vpop.eup %10358  ;;  %v7620_v12 = vmul.f32 %v10357_v8, %v7611_v28  ;;  %v7531_v40 = vadd.f32 %v7530_v39, %v7529_v53  ;;  %v12989_v34 = vsel %vm7656_vm2, %v7657_v30, %v7655_v21  ;;  %v13985_v53 = vld [vmem:[#allocation10_spill] sm:$0xff]  ;;  %vm14027_vm2 = vmmov %vm14016_vm0 }
 0x39e   : > { %v7622_v63 = vmul.f32 %v10359_v43, %v7612_v22  ;;  %v7538_v26 = vadd.f32 %v7537_v45, %v7536_v41  ;;  %v13775_v13 = vclamps-f32 %v12989_v34, 0.99999  ;;  %v10361_v49 = vpop.eup %10360  ;;  %v13987_v22 = vld [vmem:[#allocation13_spill] sm:$0xff]  ;;  %v13988_v43 = vld [vmem:[#allocation14_spill] sm:$0xff] }
 0x39f   : > { %v7695_v62 = vmul.f32 %v7691_v29, %v7620_v12  ;;  %v10363_v37 = vpop.eup %10362  ;;  %v13989_v12 = vld [vmem:[#allocation16_spill] sm:$0xff] }
 0x3a0   : > { %v7696_v56 = vmul.f32 %v7692_v17, %v7622_v63  ;;  %v7674_v54 = vsub.f32 1.0, %v13775_v13  ;;  %v13992_v17 = vld [vmem:[#allocation36_spill] sm:$0xff] }
 0x3a1   : > { %10364 = vtanh.f32 %v7695_v62 }
 0x3a2   : > { %10366 = vtanh.f32 %v7696_v56 }
 0x3a3   : > { %10368 = vrcp.f32 %v7531_v40 }
 0x3a4   : > { %10370 = vrcp.f32 %v7538_v26 }
 0x3a5   : > { %10372 = vrcp.f32 %v7673_v57  ;;  %v13993_v57 = vld [vmem:[#allocation15_spill] sm:$0xff] }
 0x3a6   : > { %10374 = vrcp.f32 %v7674_v54 }
 0x3ab   : > { %v10365_v27 = vpop.eup %10364 }
 0x3ac   : > { %v10367_v38 = vpop.eup %10366  ;;  %v7708_v31 = vmul.f32 %v10365_v27, %v10361_v49 }
 0x3ad   : > { %v10369_v10 = vpop.eup %10368  ;;  %v7710_v48 = vmul.f32 %v10367_v38, %v10363_v37 }
 0x3ae   : > { %v10371_v16 = vpop.eup %10370  ;;  %v7718_v44 = vrot.slane %v7708_v31, %v13984_v46  ;;  %v12999_v3 = vrot.slane %v7708_v31, %v13964_v14  ;;  %v13006_v50 = vmul.f32 %v10369_v10, %v12963_v15  ;;  %v13990_v15 = vld [vmem:[#allocation11_spill] sm:$0xff] }
 0x3af   : > { %v7722_v23 = vrot.slane %v7710_v48, %v13984_v46  ;;  %v13003_v33 = vrot.slane %v7710_v48, %v13964_v14  ;;  %v13009_v28 = vmul.f32 %v10371_v16, %v12965_v36  ;;  %v13991_v36 = vld [vmem:[#allocation35_spill] sm:$0xff] }
 0x3b0   : > { %v13012_v8 = vmul.f32 %v13985_v53, %v7718_v44  ;;  %v13015_v61 = vmul.f32 %v13986_v59, %v7718_v44  ;;  %v13018_v41 = vmul.f32 %v13987_v22, %v7718_v44  ;;  %v13021_v42 = vmul.f32 %v13988_v43, %v7718_v44  ;;  %v10373_v59 = vpop.eup %10372 }
 0x3b1   : > { %v13025_v29 = vmul.f32 %v13989_v12, %v12999_v3  ;;  %v13028_v39 = vmul.f32 %v13990_v15, %v7722_v23  ;;  %v13031_v63 = vmul.f32 %v13991_v36, %v7722_v23  ;;  %v13034_v45 = vmul.f32 %v13992_v17, %v7722_v23  ;;  %v13994_v15 = vld [vmem:[#allocation17_spill] sm:$0xff]  ;;  %v10375_v17 = vpop.eup %10374 }
 0x3b2   : > { %v7747_v5 = vmul.f32 0.0, %v13012_v8  ;;  %v7751_v62 = vmul.f32 0.0, %v13015_v61  ;;  %v7755_v40 = vmul.f32 0.0, %v13018_v41  ;;  %v7759_v21 = vmul.f32 0.0, %v13021_v42 }
 0x3b3   : > { %v7799_v56 = vmul.f32 %v13012_v8, %v13012_v8  ;;  %v7803_v26 = vmul.f32 %v13015_v61, %v13015_v61  ;;  %v7807_v30 = vmul.f32 %v13018_v41, %v13018_v41  ;;  %v7811_v47 = vmul.f32 %v13021_v42, %v13021_v42 }
 0x3b4   : > { %v7763_v49 = vadd.f32 %v7751_v62, %v7747_v5  ;;  %v13049_v37 = vmul.f32 %v13993_v57, %v7722_v23  ;;  %v7748_v54 = vmul.f32 0.0, %v13028_v39  ;;  %v7752_v27 = vmul.f32 0.0, %v13031_v63 }
 0x3b5   : > { %v7815_v38 = vadd.f32 %v7803_v26, %v7799_v56  ;;  %v7756_v31 = vmul.f32 0.0, %v13034_v45  ;;  %v7800_v10 = vmul.f32 %v13028_v39, %v13028_v39  ;;  %v7804_v48 = vmul.f32 %v13031_v63, %v13031_v63 }
 0x3b6   : > { %v7764_v16 = vadd.f32 %v7763_v49, %v7755_v40  ;;  %v7760_v44 = vmul.f32 0.0, %v13049_v37  ;;  %v7772_v53 = vadd.f32 %v7752_v27, %v7748_v54  ;;  %v7808_v23 = vmul.f32 %v13034_v45, %v13034_v45  ;;  %v13996_v54 = vld [vmem:[#allocation18_spill] sm:$0xff] }
 0x3b7   : > { %v7816_v22 = vadd.f32 %v7815_v38, %v7807_v30  ;;  %v7812_v43 = vmul.f32 %v13049_v37, %v13049_v37  ;;  %v7824_v12 = vadd.f32 %v7804_v48, %v7800_v10  ;;  %v13065_v36 = vmul.f32 %v13994_v15, %v13003_v33  ;;  %v13995_v30 = vld [vmem:[#allocation37_spill] sm:$0xff] }
 0x3b8   : > { %v7765_v5 = vadd.f32 %v7764_v16, %v7759_v21  ;;  %v7773_v62 = vadd.f32 %v7772_v53, %v7756_v31  ;;  %v7549_v40 = vmul.f32 %v13006_v50, %v13006_v50  ;;  %v7550_v56 = vmul.f32 %v13009_v28, %v13009_v28 }
 0x3b9   : > { %v7817_v26 = vadd.f32 %v7816_v22, %v7811_v47  ;;  %v7825_v49 = vadd.f32 %v7824_v12, %v7808_v23  ;;  %v13073_v57 = vmul.f32 %v13995_v30, %v12999_v3  ;;  %v13077_v27 = vmul.f32 %v13996_v54, %v13003_v33  ;;  %v13997_v22 = vld [vmem:[#allocation19_spill] sm:$0xff]  ;;  %v13998_v30 = vld [vmem:[#allocation22_spill] sm:$0xff] }
 0x3ba   : > { %v7766_v38 = vrot.slane %v7765_v5, 4  ;;  %v7774_v10 = vadd.f32 %v7773_v62, %v7760_v44  ;;  %v7565_v21 = vsel %vm7362_vm5, %v7549_v40, 0.0  ;;  %v7572_v31 = vsel %vm7362_vm5, %v7550_v56, 0.0 }
 0x3bb   : > { %v7818_v48 = vrot.slane %v7817_v26, 4  ;;  %v7826_v16 = vadd.f32 %v7825_v49, %v7812_v43  ;;  %v7566_v53 = vrot.slane %v7565_v21, 4  ;;  %v7573_v15 = vrot.slane %v7572_v31, 4 }
 0x3bc   : > { %v7767_v47 = vadd.f32 %v7766_v38, %v7765_v5  ;;  %v7775_v23 = vrot.slane %v7774_v10, 4  ;;  %v13083_v12 = vmul.f32 %v13997_v22, %v12999_v3  ;;  %v13087_v54 = vmul.f32 %v13998_v30, %v13003_v33 }
 0x3bd   : > { %v7819_v13 = vadd.f32 %v7818_v48, %v7817_v26  ;;  %v7827_v44 = vrot.slane %v7826_v16, 4  ;;  %v7567_v62 = vadd.f32 %v7566_v53, %v7565_v21  ;;  %v7574_v40 = vadd.f32 %v7573_v15, %v7572_v31 }
 0x3be   : > { %v7768_v7 = vrot.slane %v7767_v47, 2  ;;  %v7776_v56 = vadd.f32 %v7775_v23, %v7774_v10  ;;  %v13091_v43 = vmul.f32 %v12399_v6, %v12999_v3  ;;  %v13095_v5 = vmul.f32 %v12409_v35, %v13003_v33 }
 0x3bf   : > { %v7820_v49 = vrot.slane %v7819_v13, 2  ;;  %v7828_v38 = vadd.f32 %v7827_v44, %v7826_v16  ;;  %v7568_v22 = vrot.slane %v7567_v62, 2  ;;  %v7575_v4 = vrot.slane %v7574_v40, 2 }
 0x3c0   : > { %13999 = vst [vmem:[#allocation2_spill] sm:$0xff] %v13095_v5  ;;  %v7680_v30 = vmul.f32 %v10373_v59, %v12995_v24  ;;  %v7769_v26 = vadd.f32 %v7768_v7, %v7767_v47  ;;  %v7777_v48 = vrot.slane %v7776_v56, 2  ;;  %v14000_v15 = vclamps-f32 %v12989_v34, 0.99999 }
 0x3c1   : > { %v7821_v21 = vadd.f32 %v7820_v49, %v7819_v13  ;;  %v7829_v31 = vrot.slane %v7828_v38, 2  ;;  %v7569_v53 = vadd.f32 %v7568_v22, %v7567_v62  ;;  %v7576_v10 = vadd.f32 %v7575_v4, %v7574_v40 }
 0x3c2   : > { %v7670_v6 = vadd.f32 1.0, %v14000_v15  ;;  %v7770_v3 = vrot.slane %v7769_v26, 1  ;;  %v7778_v23 = vadd.f32 %v7777_v48, %v7776_v56  ;;  %10376 = vlog2.f32 %v7680_v30 }
 0x3c3   : > { %v7822_v1 = vrot.slane %v7821_v21, 1  ;;  %v7830_v35 = vadd.f32 %v7829_v31, %v7828_v38  ;;  %v7570_v33 = vrot.slane %v7569_v53, 1  ;;  %v7577_v51 = vrot.slane %v7576_v10, 1 }
 0x3c4   : > { %v7682_v16 = vmul.f32 %v10375_v17, %v7670_v6  ;;  %v7771_v44 = vadd.f32 %v7770_v3, %v7769_v26  ;;  %v7779_v60 = vrot.slane %v7778_v23, 1  ;;  %v8068_v62 = vmul.f32 %v13025_v29, %v13025_v29 }
 0x3c5   : > { %v7823_v24 = vadd.f32 %v7822_v1, %v7821_v21  ;;  %v7831_v7 = vrot.slane %v7830_v35, 1  ;;  %v7571_v59 = vadd.f32 %v7570_v33, %v7569_v53  ;;  %v13100_v13 = vadd.f32 %v7577_v51, %v7576_v10 }
 0x3c6   : > { %v7851_v47 = vmul.f32 2.0, %v7771_v44  ;;  %v7780_v4 = vadd.f32 %v7779_v60, %v7778_v23  ;;  %v8069_v40 = vmul.f32 %v13065_v36, %v13065_v36  ;;  %v8072_v17 = vmul.f32 %v13073_v57, %v13073_v57 }
 0x3c7   : > { %v7832_v56 = vadd.f32 %v7831_v7, %v7830_v35  ;;  %10378 = vrsqrt.f32 %v7571_v59  ;;  %v8073_v1 = vmul.f32 %v13077_v27, %v13077_v27  ;;  %v7900_v51 = vmul.f32 0.0, %v7823_v24 }
 0x3c8   : > { %10380 = vlog2.f32 %v7682_v16  ;;  %v7855_v49 = vadd.f32 1.0, %v7851_v47  ;;  %v7852_v38 = vmul.f32 2.0, %v7780_v4  ;;  %v8076_v48 = vmul.f32 %v13083_v12, %v13083_v12 }
 0x3c9   : > { %10382 = vrsqrt.f32 %v13100_v13  ;;  %v7901_v26 = vmul.f32 0.0, %v7832_v56  ;;  %v8077_v21 = vmul.f32 %v13087_v54, %v13087_v54  ;;  %v8084_v31 = vadd.f32 %v8072_v17, %v8068_v62 }
 0x3ca   : > { %v7859_v60 = vadd.f32 %v7855_v49, %v7823_v24  ;;  %v7904_v22 = vadd.f32 %v7900_v51, %v7855_v49  ;;  %v7856_v30 = vadd.f32 1.0, %v7852_v38  ;;  %v8093_v53 = vadd.f32 %v8073_v1, %v8069_v40 }
 0x3cb   : > { %v8080_v23 = vmul.f32 %v13091_v43, %v13091_v43  ;;  %v8081_v35 = vmul.f32 %v13095_v5, %v13095_v5  ;;  %v8085_v33 = vadd.f32 %v8084_v31, %v8076_v48  ;;  %vm7595_vm5 = vcmp.eq.f32.partialorder %v7571_v59, inf }
 0x3cc   : > { %v7863_v10 = vmul.f32 0.0, %v7859_v60  ;;  %v7908_v15 = vmax.f32 %v7904_v22, 1e-06  ;;  %v7860_v6 = vadd.f32 %v7856_v30, %v7832_v56  ;;  %v7905_v3 = vadd.f32 %v7901_v26, %v7856_v30  ;;  %v10377_v44 = vpop.eup %10376 }
 0x3cd   : > { %v8094_v16 = vadd.f32 %v8093_v53, %v8077_v21  ;;  %v8086_v56 = vadd.f32 %v8085_v33, %v8080_v23  ;;  %v7598_v22 = vand.u32 2147483648, %v7571_v59  ;;  %vm7597_vm12 = vcmp.eq.f32.partialorder %v7571_v59, 0.0 }
 0x3ce   : > { %v7884_v24 = vadd.f32 %v7863_v10, %v13012_v8  ;;  %v7888_v7 = vadd.f32 %v7863_v10, %v13015_v61  ;;  %v7892_v47 = vadd.f32 %v7863_v10, %v13018_v41  ;;  %v7896_v4 = vadd.f32 %v7863_v10, %v13021_v42 }
 0x3cf   : > { %10384 = vrcp.f32 %v7908_v15  ;;  %v7864_v62 = vmul.f32 0.0, %v7860_v6  ;;  %v7909_v40 = vmax.f32 %v7905_v3, 1e-06  ;;  %v8095_v17 = vadd.f32 %v8094_v16, %v8081_v35 }
 0x3d0   : > { %v7705_v42 = vmax.f32 %v12986_v32, 1e-06  ;;  %v8087_v48 = vrot.slane %v8086_v56, 4  ;;  %vm7602_vm3 = vcmp.eq.f32.partialorder %v13100_v13, inf  ;;  %vm7604_vm4 = vcmp.eq.f32.partialorder %v13100_v13, 0.0 }
 0x3d1   : > { %v10379_v1 = vpop.eup %10378  ;;  %v7885_v49 = vadd.f32 %v7864_v62, %v13028_v39  ;;  %v7889_v51 = vadd.f32 %v7864_v62, %v13031_v63  ;;  %v7893_v38 = vadd.f32 %v7864_v62, %v13034_v45  ;;  %v7897_v8 = vadd.f32 %v7864_v62, %v13049_v37 }
 0x3d2   : > { %v10381_v60 = vpop.eup %10380  ;;  %10386 = vrcp.f32 %v7909_v40  ;;  %v7594_v61 = vmul.f32 %v10379_v1, %v7571_v59  ;;  %v7605_v63 = vand.u32 2147483648, %v13100_v13  ;;  %v8096_v21 = vrot.slane %v8095_v17, 4 }
 0x3d3   : > { %v10383_v41 = vpop.eup %10382  ;;  %v7688_v35 = vmul.f32 0.6931472, %v10377_v44 }
 0x3d4   : > { %v7596_v30 = vsel %vm7595_vm5, %v7571_v59, %v7594_v61  ;;  %v7601_v26 = vmul.f32 %v10383_v41, %v13100_v13  ;;  %v8088_v59 = vadd.f32 %v8087_v48, %v8086_v56  ;;  %v8097_v33 = vadd.f32 %v8096_v21, %v8095_v17  ;;  %vm14028_vm5 = vmmov %vm14016_vm0 }
 0x3d5   : > { %v7599_v39 = vsel %vm7597_vm12, %v7598_v22, %v7596_v30  ;;  %vm14029_vm12 = vmmov %vm14016_vm0 }
 0x3d6   : > { %10388 = vtanh.f32 %v7599_v39  ;;  %v7617_v45 = vmax.f32 %v7599_v39, 1e-06  ;;  %v7603_v37 = vsel %vm7602_vm3, %v13100_v13, %v7601_v26  ;;  %v7690_v13 = vmul.f32 0.6931472, %v10381_v60  ;;  %vm14030_vm3 = vmmov %vm14016_vm0 }
 0x3d7   : > { %10390 = vrcp.f32 %v7705_v42  ;;  %v7606_v32 = vsel %vm7604_vm4, %v7605_v63, %v7603_v37  ;;  %vm14031_vm4 = vmmov %vm14016_vm0 }
 0x3d8   : > { %10392 = vrcp.f32 %v7617_v45  ;;  %v7618_v31 = vmax.f32 %v7606_v32, 1e-06 }
 0x3d9   : > { %v10385_v53 = vpop.eup %10384  ;;  %10394 = vtanh.f32 %v7606_v32 }
 0x3da   : > { %v13134_v15 = vmul.f32 %v10385_v53, %v7884_v24  ;;  %v13136_v6 = vmul.f32 %v10385_v53, %v7888_v7  ;;  %v13138_v3 = vmul.f32 %v10385_v53, %v7892_v47  ;;  %v13140_v23 = vmul.f32 %v10385_v53, %v7896_v4 }
 0x3db   : > { %10396 = vrcp.f32 %v7618_v31  ;;  %v8089_v7 = vrot.slane %v8088_v59, 2  ;;  %v7693_v31 = vmul.f32 0.5, %v7688_v35 }
 0x3dc   : > { %14001 = vst [vmem:[#allocation7_spill] sm:$0xff] %v13138_v3  ;;  %14002 = vst [vmem:[#allocation29_spill] sm:$0xff] %v13140_v23  ;;  %v10387_v16 = vpop.eup %10386  ;;  %v8016_v62 = vmul.f32 %v13134_v15, %v13134_v15  ;;  %v8020_v40 = vmul.f32 %v13136_v6, %v13136_v6  ;;  %v8024_v24 = vmul.f32 %v13138_v3, %v13138_v3 }
 0x3dd   : > { %v13148_v56 = vmul.f32 %v10387_v16, %v7885_v49  ;;  %v13150_v47 = vmul.f32 %v10387_v16, %v7889_v51  ;;  %v13152_v4 = vmul.f32 %v10387_v16, %v7893_v38  ;;  %v13154_v44 = vmul.f32 %v10387_v16, %v7897_v8 }
 0x3de   : > { %v8032_v17 = vadd.f32 %v8020_v40, %v8016_v62  ;;  %v7964_v1 = vmul.f32 %v13025_v29, %v13134_v15  ;;  %v7968_v60 = vmul.f32 %v13073_v57, %v13136_v6  ;;  %v7972_v61 = vmul.f32 %v13083_v12, %v13138_v3 }
 0x3df   : > { %14003 = vst [vmem:[#allocation30_spill] sm:$0xff] %v13152_v4  ;;  %v8028_v49 = vmul.f32 %v13140_v23, %v13140_v23  ;;  %v8017_v51 = vmul.f32 %v13148_v56, %v13148_v56  ;;  %v8021_v38 = vmul.f32 %v13150_v47, %v13150_v47  ;;  %v8025_v8 = vmul.f32 %v13152_v4, %v13152_v4 }
 0x3e0   : > { %v10389_v41 = vpop.eup %10388  ;;  %v8033_v42 = vadd.f32 %v8032_v17, %v8024_v24  ;;  %v7965_v22 = vmul.f32 %v13065_v36, %v13148_v56  ;;  %v7969_v30 = vmul.f32 %v13077_v27, %v13150_v47  ;;  %v7973_v26 = vmul.f32 %v13087_v54, %v13152_v4 }
 0x3e1   : > { %v10391_v48 = vpop.eup %10390  ;;  %v8041_v39 = vadd.f32 %v8021_v38, %v8017_v51  ;;  %v7613_v63 = vmul.f32 %v10389_v41, %v13006_v50  ;;  %v7976_v45 = vmul.f32 %v13091_v43, %v13140_v23  ;;  %v7977_v37 = vmul.f32 %v13095_v5, %v13154_v44 }
 0x3e2   : > { %v10393_v32 = vpop.eup %10392  ;;  %v8034_v21 = vadd.f32 %v8033_v42, %v8028_v49  ;;  %v7980_v53 = vadd.f32 %v7968_v60, %v7964_v1  ;;  %v7989_v16 = vadd.f32 %v7969_v30, %v7965_v22  ;;  %v8029_v40 = vmul.f32 %v13154_v44, %v13154_v44 }
 0x3e3   : > { %v10395_v62 = vpop.eup %10394  ;;  %v8042_v24 = vadd.f32 %v8041_v39, %v8025_v8  ;;  %v7624_v17 = vmul.f32 %v10393_v32, %v7613_v63  ;;  %v7694_v51 = vmul.f32 0.5, %v7690_v13  ;;  %v8090_v3 = vadd.f32 %v8089_v7, %v8088_v59 }
 0x3e4   : > { %v8035_v38 = vrot.slane %v8034_v21, 4  ;;  %v7614_v50 = vmul.f32 %v10395_v62, %v13009_v28  ;;  %v7981_v41 = vadd.f32 %v7980_v53, %v7972_v61  ;;  %v7990_v10 = vadd.f32 %v7989_v16, %v7973_v26 }
 0x3e5   : > { %v10397_v23 = vpop.eup %10396  ;;  %v8043_v4 = vadd.f32 %v8042_v24, %v8029_v40  ;;  %v7697_v5 = vmul.f32 %v7693_v31, %v7624_v17  ;;  %v8098_v49 = vrot.slane %v8097_v33, 2  ;;  %v14004_v63 = vmax.f32 %v12989_v34, 1e-06 }
 0x3e6   : > { %v8036_v35 = vadd.f32 %v8035_v38, %v8034_v21  ;;  %v7626_v1 = vmul.f32 %v10397_v23, %v7614_v50  ;;  %v7982_v60 = vadd.f32 %v7981_v41, %v7976_v45  ;;  %v7991_v42 = vadd.f32 %v7990_v10, %v7977_v37 }
 0x3e7   : > { %v8044_v22 = vrot.slane %v8043_v4, 4  ;;  %10398 = vtanh.f32 %v7697_v5  ;;  %v8091_v61 = vrot.slane %v8090_v3, 1  ;;  %v8099_v26 = vadd.f32 %v8098_v49, %v8097_v33 }
 0x3e8   : > { %v8037_v30 = vrot.slane %v8036_v35, 2  ;;  %v7698_v8 = vmul.f32 %v7694_v51, %v7626_v1  ;;  %v7983_v39 = vrot.slane %v7982_v60, 4  ;;  %v7992_v13 = vrot.slane %v7991_v42, 4 }
 0x3e9   : > { %10400 = vrcp.f32 %v14004_v63  ;;  %v8045_v28 = vadd.f32 %v8044_v22, %v8043_v4  ;;  %v8100_v5 = vrot.slane %v8099_v26, 1  ;;  %v13186_v62 = vadd.f32 %v8091_v61, %v8090_v3 }
 0x3ea   : > { %v8038_v32 = vadd.f32 %v8037_v30, %v8036_v35  ;;  %10402 = vtanh.f32 %v7698_v8  ;;  %v7984_v59 = vadd.f32 %v7983_v39, %v7982_v60  ;;  %v7993_v7 = vadd.f32 %v7992_v13, %v7991_v42 }
 0x3eb   : > { %v8046_v21 = vrot.slane %v8045_v28, 2  ;;  %v13193_v38 = vadd.f32 %v8100_v5, %v8099_v26 }
 0x3ec   : > { %v8039_v23 = vrot.slane %v8038_v32, 1  ;;  %v7985_v45 = vrot.slane %v7984_v59, 2  ;;  %v7994_v10 = vrot.slane %v7993_v7, 2 }
 0x3ed   : > { %v8047_v37 = vadd.f32 %v8046_v21, %v8045_v28 }
 0x3ee   : > { %v8040_v31 = vadd.f32 %v8039_v23, %v8038_v32  ;;  %v7986_v53 = vadd.f32 %v7985_v45, %v7984_v59  ;;  %v7995_v16 = vadd.f32 %v7994_v10, %v7993_v7 }
 0x3ef   : > { %v8048_v34 = vrot.slane %v8047_v37, 1 }
 0x3f0   : > { %v8148_v40 = vsub.f32 1.0, %v8040_v31  ;;  %v7987_v4 = vrot.slane %v7986_v53, 1  ;;  %v7996_v24 = vrot.slane %v7995_v16, 1  ;;  %v13189_v33 = vmul.f32 %v13186_v62, %v8040_v31 }
 0x3f1   : > { %v10399_v17 = vpop.eup %10398  ;;  %v13191_v51 = vadd.f32 %v8048_v34, %v8047_v37 }
 0x3f2   : > { %v13196_v50 = vmul.f32 %v8148_v40, %v13025_v29  ;;  %v7712_v41 = vmul.f32 %v10399_v17, %v10391_v48  ;;  %v7988_v49 = vadd.f32 %v7987_v4, %v7986_v53  ;;  %v7997_v35 = vadd.f32 %v7996_v24, %v7995_v16  ;;  %v14005_v4 = vld [vmem:[#allocation24_spill] sm:$0xff]  ;;  %v14006_v17 = vld [vmem:[#allocation25_spill] sm:$0xff] }
 0x3f3   : > { %v10401_v3 = vpop.eup %10400  ;;  %v13199_v1 = vsub.f32 1.0, %v13191_v51  ;;  %v13202_v60 = vmul.f32 %v8148_v40, %v13073_v57  ;;  %v13205_v42 = vmul.f32 %v8148_v40, %v13083_v12  ;;  %v13208_v22 = vmul.f32 %v8148_v40, %v13091_v43 }
 0x3f4   : > { %v10403_v30 = vpop.eup %10402  ;;  %v7726_v29 = vrot.slane %v7712_v41, %v13984_v46  ;;  %v7943_v48 = vrot.slane %v7712_v41, %v13964_v14  ;;  %v13212_v8 = vmul.f32 2.0, %v7988_v49  ;;  %v13214_v39 = vmul.f32 2.0, %v7997_v35  ;;  %v14007_v49 = vld [vmem:[#allocation26_spill] sm:$0xff] }
 0x3f5   : > { %v13218_v13 = vmul.f32 %v13199_v1, %v13065_v36  ;;  %v7714_v57 = vmul.f32 %v10403_v30, %v10401_v3  ;;  %v13222_v12 = vmul.f32 %v13199_v1, %v13077_v27  ;;  %v13226_v43 = vmul.f32 %v13199_v1, %v13087_v54 }
 0x3f6   : > { %v13229_v63 = vmul.f32 %v7726_v29, %v12843_v55  ;;  %v13232_v28 = vmul.f32 %v7726_v29, %v12847_v2  ;;  %v13235_v61 = vmul.f32 %v7726_v29, %v12835_v0  ;;  %v13238_v36 = vmul.f32 %v7726_v29, %v12839_v11 }
 0x3f7   : > { %v7730_v26 = vrot.slane %v7714_v57, %v13984_v46  ;;  %v7947_v27 = vrot.slane %v7714_v57, %v13964_v14  ;;  %v13243_v32 = vmul.f32 %v7943_v48, %v12851_v25  ;;  %v13246_v54 = vmul.f32 %v7943_v48, %v12855_v9  ;;  %v14008_v57 = vld [vmem:[#allocation27_spill] sm:$0xff] }
 0x3f8   : > { %v7757_v55 = vmul.f32 0.0, %v13229_v63  ;;  %v7761_v2 = vmul.f32 0.0, %v13232_v28  ;;  %v7809_v0 = vmul.f32 %v13229_v63, %v13229_v63  ;;  %v7813_v11 = vmul.f32 %v13232_v28, %v13232_v28 }
 0x3f9   : > { %v13255_v46 = vmul.f32 %v7730_v26, %v12837_v18  ;;  %v13258_v14 = vmul.f32 %v7730_v26, %v12841_v20  ;;  %v13261_v25 = vmul.f32 %v7730_v26, %v12845_v52  ;;  %v13264_v9 = vmul.f32 %v7730_v26, %v12849_v58 }
 0x3fa   : > { %v7749_v59 = vmul.f32 0.0, %v13235_v61  ;;  %v7753_v7 = vmul.f32 0.0, %v13238_v36  ;;  %v7801_v21 = vmul.f32 %v13235_v61, %v13235_v61  ;;  %v7805_v18 = vmul.f32 %v13238_v36, %v13238_v36 }
 0x3fb   : > { %v7750_v23 = vmul.f32 0.0, %v13255_v46  ;;  %v7754_v20 = vmul.f32 0.0, %v13258_v14  ;;  %v7758_v52 = vmul.f32 0.0, %v13261_v25  ;;  %v7762_v45 = vmul.f32 0.0, %v13264_v9 }
 0x3fc   : > { %v7802_v58 = vmul.f32 %v13255_v46, %v13255_v46  ;;  %v7806_v10 = vmul.f32 %v13258_v14, %v13258_v14  ;;  %v7810_v37 = vmul.f32 %v13261_v25, %v13261_v25  ;;  %v7814_v5 = vmul.f32 %v13264_v9, %v13264_v9 }
 0x3fd   : > { %v7790_v31 = vadd.f32 %v7754_v20, %v7750_v23  ;;  %v7781_v53 = vadd.f32 %v7753_v7, %v7749_v59  ;;  %v7833_v16 = vadd.f32 %v7805_v18, %v7801_v21  ;;  %v13285_v34 = vmul.f32 %v7947_v27, %v12853_v19  ;;  %v14010_v7 = vld [vmem:[#allocation28_spill] sm:$0xff] }
 0x3fe   : > { %v7842_v40 = vadd.f32 %v7806_v10, %v7802_v58  ;;  %v13288_v24 = vmul.f32 %v7947_v27, %v14005_v4  ;;  %v13291_v41 = vmul.f32 %v7943_v48, %v14006_v17  ;;  %v13294_v35 = vmul.f32 %v7947_v27, %v14007_v49 }
 0x3ff   : > { %v7791_v3 = vadd.f32 %v7790_v31, %v7758_v52  ;;  %v7782_v30 = vadd.f32 %v7781_v53, %v7757_v55  ;;  %v7834_v29 = vadd.f32 %v7833_v16, %v7809_v0  ;;  %v13297_v26 = vmul.f32 %v7943_v48, %v14008_v57 }
 0x400   : > { %v7843_v59 = vadd.f32 %v7842_v40, %v7810_v37  ;;  %v13300_v19 = vmul.f32 %v7947_v27, %v14010_v7  ;;  %v8070_v21 = vmul.f32 %v13243_v32, %v13243_v32  ;;  %v8071_v18 = vmul.f32 %v13285_v34, %v13285_v34 }
 0x401   : > { %14009 = vst [vmem:[#allocation31_spill] sm:$0xff] %v13297_v26  ;;  %v7792_v23 = vadd.f32 %v7791_v3, %v7762_v45  ;;  %v7783_v20 = vadd.f32 %v7782_v30, %v7761_v2  ;;  %v7835_v58 = vadd.f32 %v7834_v29, %v7813_v11  ;;  %v8074_v55 = vmul.f32 %v13246_v54, %v13246_v54 }
 0x402   : > { %v7844_v0 = vadd.f32 %v7843_v59, %v7814_v5  ;;  %v8075_v48 = vmul.f32 %v13288_v24, %v13288_v24  ;;  %v8078_v27 = vmul.f32 %v13291_v41, %v13291_v41  ;;  %v8079_v52 = vmul.f32 %v13294_v35, %v13294_v35 }
 0x403   : > { %v7793_v10 = vrot.slane %v7792_v23, 4  ;;  %v7784_v37 = vrot.slane %v7783_v20, 4  ;;  %v7836_v31 = vrot.slane %v7835_v58, 4  ;;  %v8082_v2 = vmul.f32 %v13297_v26, %v13297_v26 }
 0x404   : > { %v7845_v11 = vrot.slane %v7844_v0, 4  ;;  %v8083_v45 = vmul.f32 %v13300_v19, %v13300_v19  ;;  %v8102_v5 = vadd.f32 %v8074_v55, %v8070_v21  ;;  %v8111_v53 = vadd.f32 %v8075_v48, %v8071_v18 }
 0x405   : > { %v7794_v16 = vadd.f32 %v7793_v10, %v7792_v23  ;;  %v7785_v40 = vadd.f32 %v7784_v37, %v7783_v20  ;;  %v7837_v4 = vadd.f32 %v7836_v31, %v7835_v58  ;;  %v13319_v17 = vadd.f32 1.0, %v13212_v8 }
 0x406   : > { %v7846_v49 = vadd.f32 %v7845_v11, %v7844_v0  ;;  %v8103_v3 = vadd.f32 %v8102_v5, %v8078_v27  ;;  %v8112_v30 = vadd.f32 %v8111_v53, %v8079_v52  ;;  %v13322_v29 = vadd.f32 1.0, %v13214_v39  ;;  %v14011_v5 = vld [vmem:[#allocation7_spill] sm:$0xff] }
 0x407   : > { %v7795_v57 = vrot.slane %v7794_v16, 2  ;;  %v7786_v59 = vrot.slane %v7785_v40, 2  ;;  %v7838_v7 = vrot.slane %v7837_v4, 2  ;;  %v8128_v26 = vadd.f32 %v13319_v17, %v13186_v62 }
 0x408   : > { %v7847_v21 = vrot.slane %v7846_v49, 2  ;;  %v8104_v18 = vadd.f32 %v8103_v3, %v8082_v2  ;;  %v8113_v23 = vadd.f32 %v8112_v30, %v8083_v45  ;;  %v8129_v20 = vadd.f32 %v13322_v29, %v13193_v38 }
 0x409   : > { %v7796_v8 = vadd.f32 %v7795_v57, %v7794_v16  ;;  %v7787_v58 = vadd.f32 %v7786_v59, %v7785_v40  ;;  %v7839_v55 = vadd.f32 %v7838_v7, %v7837_v4  ;;  %v8132_v0 = vmul.f32 %v8128_v26, %v13134_v15  ;;  %v14012_v40 = vld [vmem:[#allocation30_spill] sm:$0xff] }
 0x40a   : > { %v7848_v48 = vadd.f32 %v7847_v21, %v7846_v49  ;;  %v8133_v39 = vmul.f32 %v8129_v20, %v13148_v56  ;;  %v8136_v37 = vmul.f32 %v8128_v26, %v13136_v6  ;;  %v8137_v31 = vmul.f32 %v8129_v20, %v13150_v47  ;;  %v14013_v56 = vld [vmem:[#allocation29_spill] sm:$0xff] }
 0x40b   : > { %v7797_v27 = vrot.slane %v7796_v8, 1  ;;  %v7788_v52 = vrot.slane %v7787_v58, 1  ;;  %v7840_v10 = vrot.slane %v7839_v55, 1  ;;  %v8140_v53 = vmul.f32 %v8128_v26, %v14011_v5 }
 0x40c   : > { %v7849_v62 = vrot.slane %v7848_v48, 1  ;;  %v8141_v4 = vmul.f32 %v8129_v20, %v14012_v40  ;;  %v8105_v3 = vrot.slane %v8104_v18, 4  ;;  %v8144_v30 = vmul.f32 %v8128_v26, %v14013_v56 }
 0x40d   : > { %v7798_v2 = vadd.f32 %v7797_v27, %v7796_v8  ;;  %v7789_v11 = vadd.f32 %v7788_v52, %v7787_v58  ;;  %v7841_v45 = vadd.f32 %v7840_v10, %v7839_v55  ;;  %v8114_v7 = vrot.slane %v8113_v23, 4  ;;  %v14014_v8 = vld [vmem:[#allocation2_spill] sm:$0xff] }
 0x40e   : > { %v7850_v16 = vadd.f32 %v7849_v62, %v7848_v48  ;;  %v8145_v6 = vmul.f32 %v8129_v20, %v13154_v44  ;;  %v8165_v58 = vmul.f32 %v13199_v1, %v14014_v8  ;;  %v13339_v55 = vadd.f32 %v13196_v50, %v8132_v0 }
 0x40f   : > { %v7854_v15 = vmul.f32 2.0, %v7798_v2  ;;  %v7853_v49 = vmul.f32 2.0, %v7789_v11  ;;  %v7902_v59 = vmul.f32 0.0, %v7841_v45  ;;  %v13342_v48 = vadd.f32 %v13218_v13, %v8133_v39 }
 0x410   : > { %v7903_v57 = vmul.f32 0.0, %v7850_v16  ;;  %v13345_v27 = vadd.f32 %v13202_v60, %v8136_v37  ;;  %v8106_v2 = vadd.f32 %v8105_v3, %v8104_v18  ;;  %v8115_v44 = vadd.f32 %v8114_v7, %v8113_v23 }
 0x411   : > { %v7858_v21 = vadd.f32 1.0, %v7854_v15  ;;  %v7857_v47 = vadd.f32 1.0, %v7853_v49  ;;  %v13348_v20 = vadd.f32 %v13222_v12, %v8137_v31  ;;  %v13351_v1 = vadd.f32 %v13205_v42, %v8140_v53 }
 0x412   : > { %v13354_v39 = vadd.f32 %v13226_v43, %v8141_v4  ;;  %v13357_v60 = vadd.f32 %v13208_v22, %v8144_v30  ;;  %v13359_v37 = vadd.f32 %v8165_v58, %v8145_v6  ;;  %v8185_v18 = vmul.f32 %v13193_v38, %v13191_v51 }
 0x413   : > { %v7907_v26 = vadd.f32 %v7903_v57, %v7858_v21  ;;  %v7861_v52 = vadd.f32 %v7857_v47, %v7841_v45  ;;  %v7862_v10 = vadd.f32 %v7858_v21, %v7850_v16  ;;  %v7906_v62 = vadd.f32 %v7902_v59, %v7857_v47  ;;  %v14015_v47 = vld [vmem:[#allocation31_spill] sm:$0xff] }
 0x414   : > { %v8188_v51 = vadd.f32 %v13189_v33, %v13319_v17  ;;  %v8189_v38 = vadd.f32 %v8185_v18, %v13322_v29 }
 0x415   : > { %v7911_v50 = vmax.f32 %v7907_v26, 1e-06  ;;  %v7865_v0 = vmul.f32 0.0, %v7861_v52  ;;  %v7866_v11 = vmul.f32 0.0, %v7862_v10  ;;  %v7910_v13 = vmax.f32 %v7906_v62, 1e-06 }
 0x416   : > { %v8192_v53 = vmax.f32 %v8188_v51, 1e-06 }
 0x417   : > { %10404 = vrcp.f32 %v7911_v50  ;;  %v7886_v12 = vadd.f32 %v7865_v0, %v13235_v61  ;;  %v7887_v42 = vadd.f32 %v7866_v11, %v13255_v46  ;;  %v7890_v23 = vadd.f32 %v7865_v0, %v13238_v36 }
 0x418   : > { %v7891_v31 = vadd.f32 %v7866_v11, %v13258_v14  ;;  %v7894_v43 = vadd.f32 %v7865_v0, %v13229_v63  ;;  %v7895_v45 = vadd.f32 %v7866_v11, %v13261_v25  ;;  %v7898_v22 = vadd.f32 %v7865_v0, %v13232_v28 }
 0x419   : > { %v7899_v5 = vadd.f32 %v7866_v11, %v13264_v9  ;;  %10406 = vrcp.f32 %v7910_v13  ;;  %v8107_v61 = vrot.slane %v8106_v2, 2  ;;  %v8116_v46 = vrot.slane %v8115_v44, 2 }
 0x41a   : > { %v8193_v36 = vmax.f32 %v8189_v38, 1e-06  ;;  %10408 = vrcp.f32 %v8192_v53 }
 0x41b   : > { %v13374_v14 = vadd.f32 %v8107_v61, %v8106_v2  ;;  %v13376_v63 = vadd.f32 %v8116_v46, %v8115_v44 }
 0x41c   : > { %10410 = vrcp.f32 %v8193_v36 }
 0x41d   : > { %v8109_v29 = vrot.slane %v13374_v14, 1  ;;  %v8118_v40 = vrot.slane %v13376_v63, 1 }
 0x421   : > { %v10405_v25 = vpop.eup %10404 }
 0x422   : > { %v13378_v28 = vmul.f32 %v10405_v25, %v7887_v42  ;;  %v13380_v9 = vmul.f32 %v10405_v25, %v7891_v31  ;;  %v13382_v16 = vmul.f32 %v10405_v25, %v7895_v45  ;;  %v13384_v33 = vmul.f32 %v10405_v25, %v7899_v5 }
 0x423   : > { %v10407_v17 = vpop.eup %10406 }
 0x424   : > { %v13388_v4 = vmul.f32 %v10407_v17, %v7886_v12  ;;  %v13390_v15 = vmul.f32 %v10407_v17, %v7890_v23  ;;  %v13392_v49 = vmul.f32 %v10407_v17, %v7894_v43  ;;  %v13394_v3 = vmul.f32 %v10407_v17, %v7898_v22  ;;  %v10409_v58 = vpop.eup %10408 }
 0x425   : > { %v7967_v56 = vmul.f32 %v13285_v34, %v13378_v28  ;;  %v7971_v30 = vmul.f32 %v13288_v24, %v13380_v9  ;;  %v7975_v57 = vmul.f32 %v13294_v35, %v13382_v16  ;;  %v7979_v59 = vmul.f32 %v13300_v19, %v13384_v33 }
 0x426   : > { %v7966_v7 = vmul.f32 %v13243_v32, %v13388_v4  ;;  %v7970_v6 = vmul.f32 %v13246_v54, %v13390_v15  ;;  %v7974_v21 = vmul.f32 %v13291_v41, %v13392_v49  ;;  %v7978_v8 = vmul.f32 %v14015_v47, %v13394_v3  ;;  %v10411_v2 = vpop.eup %10410 }
 0x427   : > { %v8007_v26 = vadd.f32 %v7971_v30, %v7967_v56  ;;  %v8018_v52 = vmul.f32 %v13388_v4, %v13388_v4  ;;  %v8019_v10 = vmul.f32 %v13378_v28, %v13378_v28  ;;  %v8022_v62 = vmul.f32 %v13390_v15, %v13390_v15 }
 0x428   : > { %v7998_v44 = vadd.f32 %v7970_v6, %v7966_v7  ;;  %v8023_v50 = vmul.f32 %v13380_v9, %v13380_v9  ;;  %v8026_v0 = vmul.f32 %v13392_v49, %v13392_v49  ;;  %v8027_v11 = vmul.f32 %v13382_v16, %v13382_v16 }
 0x429   : > { %v8008_v13 = vadd.f32 %v8007_v26, %v7975_v57  ;;  %v8030_v18 = vmul.f32 %v13394_v3, %v13394_v3  ;;  %v8031_v12 = vmul.f32 %v13384_v33, %v13384_v33  ;;  %v8050_v42 = vadd.f32 %v8022_v62, %v8018_v52  ;;  %v13464_v26 = vpop.permute.xlu1 %8236 }
 0x42a   : > { %v7999_v23 = vadd.f32 %v7998_v44, %v7974_v21  ;;  %v8059_v31 = vadd.f32 %v8023_v50, %v8019_v10  ;;  %v13429_v43 = vmul.f32 %v10409_v58, %v13339_v55  ;;  %v13432_v45 = vmul.f32 %v10411_v2, %v13342_v48 }
 0x42b   : > { %v8009_v22 = vadd.f32 %v8008_v13, %v7979_v59  ;;  %v8051_v5 = vadd.f32 %v8050_v42, %v8026_v0  ;;  %v13435_v51 = vmul.f32 %v10409_v58, %v13345_v27  ;;  %v13438_v38 = vmul.f32 %v10411_v2, %v13348_v20 }
 0x42c   : > { %v8000_v61 = vadd.f32 %v7999_v23, %v7978_v8  ;;  %v8060_v46 = vadd.f32 %v8059_v31, %v8027_v11  ;;  %v13441_v53 = vmul.f32 %v10409_v58, %v13351_v1  ;;  %v13444_v36 = vmul.f32 %v10411_v2, %v13354_v39  ;;  %v13456_v39 = vpop.permute.xlu0 %8226 }
 0x42d   : > { %v8010_v55 = vrot.slane %v8009_v22, 4  ;;  %v8052_v25 = vadd.f32 %v8051_v5, %v8030_v18  ;;  %v13447_v48 = vmul.f32 %v10409_v58, %v13357_v60  ;;  %v13450_v17 = vmul.f32 %v10411_v2, %v13359_v37 }
 0x42e   : > { %v8001_v27 = vrot.slane %v8000_v61, 4  ;;  %v8061_v56 = vadd.f32 %v8060_v46, %v8031_v12  ;;  %v8306_v57 = vmul.f32 %v13429_v43, %v13429_v43  ;;  %v8307_v1 = vmul.f32 %v13432_v45, %v13432_v45 }
 0x42f   : > { %v8011_v20 = vadd.f32 %v8010_v55, %v8009_v22  ;;  %v8053_v30 = vrot.slane %v8052_v25, 4  ;;  %v8308_v60 = vmul.f32 %v13435_v51, %v13435_v51  ;;  %v8309_v37 = vmul.f32 %v13438_v38, %v13438_v38 }
 0x430   : > { %v8002_v59 = vadd.f32 %v8001_v27, %v8000_v61  ;;  %v8062_v7 = vrot.slane %v8061_v56, 4  ;;  %v8110_v8 = vadd.f32 %v8109_v29, %v13374_v14  ;;  %v8119_v58 = vadd.f32 %v8118_v40, %v13376_v63  ;;  %v13474_v23 = vpop.permute.xlu0 %8231 }
 0x431   : > { %v8012_v6 = vrot.slane %v8011_v20, 2  ;;  %v8054_v21 = vadd.f32 %v8053_v30, %v8052_v25  ;;  %v8310_v62 = vmul.f32 %v13441_v53, %v13441_v53  ;;  %v8311_v2 = vmul.f32 %v13444_v36, %v13444_v36  ;;  %v13484_v30 = vpop.permute.xlu1 %8241 }
 0x432   : > { %v8003_v52 = vrot.slane %v8002_v59, 2  ;;  %v8063_v10 = vadd.f32 %v8062_v7, %v8061_v56  ;;  %v8322_v0 = vadd.f32 %v8308_v60, %v8306_v57  ;;  %v8335_v11 = vadd.f32 %v8309_v37, %v8307_v1 }
 0x433   : > { %v8013_v44 = vadd.f32 %v8012_v6, %v8011_v20  ;;  %v8055_v50 = vrot.slane %v8054_v21, 2  ;;  %v8312_v14 = vmul.f32 %v13447_v48, %v13447_v48  ;;  %v8313_v63 = vmul.f32 %v13450_v17, %v13450_v17 }
 0x434   : > { %v8004_v13 = vadd.f32 %v8003_v52, %v8002_v59  ;;  %v8064_v18 = vrot.slane %v8063_v10, 2  ;;  %v8323_v12 = vadd.f32 %v8322_v0, %v8310_v62  ;;  %v8336_v42 = vadd.f32 %v8335_v11, %v8311_v2 }
 0x435   : > { %v8014_v29 = vrot.slane %v8013_v44, 1  ;;  %v8056_v40 = vadd.f32 %v8055_v50, %v8054_v21  ;;  %v8264_v5 = vmul.f32 %v13456_v39, %v13429_v43  ;;  %v8265_v61 = vmul.f32 %v13456_v39, %v13432_v45 }
 0x436   : > { %v8005_v31 = vrot.slane %v8004_v13, 1  ;;  %v8065_v22 = vadd.f32 %v8064_v18, %v8063_v10  ;;  %v13480_v25 = vadd.f32 %v8323_v12, %v8312_v14  ;;  %v13482_v27 = vadd.f32 %v8336_v42, %v8313_v63 }
 0x437   : > { %v8015_v46 = vadd.f32 %v8014_v29, %v8013_v44  ;;  %v8057_v55 = vrot.slane %v8056_v40, 1  ;;  %v8266_v57 = vmul.f32 %v13474_v23, %v13435_v51  ;;  %v8267_v1 = vmul.f32 %v13474_v23, %v13438_v38 }
 0x438   : > { %v8006_v56 = vadd.f32 %v8005_v31, %v8004_v13  ;;  %v8066_v20 = vrot.slane %v8065_v22, 1  ;;  %v8268_v60 = vmul.f32 %v13464_v26, %v13441_v53  ;;  %v8269_v37 = vmul.f32 %v13464_v26, %v13444_v36 }
 0x439   : > { %v8058_v59 = vadd.f32 %v8057_v55, %v8056_v40  ;;  %v8123_v7 = vmul.f32 2.0, %v8015_v46  ;;  %v8280_v52 = vadd.f32 %v8266_v57, %v8264_v5  ;;  %v8293_v10 = vadd.f32 %v8267_v1, %v8265_v61 }
 0x43a   : > { %v8067_v6 = vadd.f32 %v8066_v20, %v8065_v22  ;;  %v8122_v21 = vmul.f32 2.0, %v8006_v56  ;;  %v8270_v50 = vmul.f32 %v13484_v30, %v13447_v48 }
 0x43b   : > { %v8127_v62 = vadd.f32 1.0, %v8123_v7  ;;  %v8150_v2 = vsub.f32 1.0, %v8058_v59  ;;  %v8186_v44 = vmul.f32 %v8110_v8, %v8058_v59  ;;  %v8281_v18 = vadd.f32 %v8280_v52, %v8268_v60 }
 0x43c   : > { %v8126_v0 = vadd.f32 1.0, %v8122_v21  ;;  %v8151_v11 = vsub.f32 1.0, %v8067_v6  ;;  %v8187_v13 = vmul.f32 %v8119_v58, %v8067_v6 }
 0x43d   : > { %v8131_v14 = vadd.f32 %v8127_v62, %v8119_v58  ;;  %v8154_v63 = vmul.f32 %v8150_v2, %v13243_v32  ;;  %v8158_v29 = vmul.f32 %v8150_v2, %v13246_v54  ;;  %v8162_v40 = vmul.f32 %v8150_v2, %v13291_v41 }
 0x43e   : > { %v8130_v12 = vadd.f32 %v8126_v0, %v8110_v8  ;;  %v8155_v42 = vmul.f32 %v8151_v11, %v13285_v34  ;;  %v8159_v31 = vmul.f32 %v8151_v11, %v13288_v24  ;;  %v8163_v22 = vmul.f32 %v8151_v11, %v13294_v35 }
 0x43f   : > { %v8135_v5 = vmul.f32 %v8131_v14, %v13378_v28  ;;  %v8139_v61 = vmul.f32 %v8131_v14, %v13380_v9  ;;  %v8143_v46 = vmul.f32 %v8131_v14, %v13382_v16  ;;  %v8147_v58 = vmul.f32 %v8131_v14, %v13384_v33 }
 0x440   : > { %v8134_v32 = vmul.f32 %v8130_v12, %v13388_v4  ;;  %v8138_v54 = vmul.f32 %v8130_v12, %v13390_v15  ;;  %v8142_v41 = vmul.f32 %v8130_v12, %v13392_v49  ;;  %v8146_v34 = vmul.f32 %v8130_v12, %v13394_v3 }
 0x441   : > { %v8166_v24 = vmul.f32 %v8150_v2, %v14015_v47  ;;  %v8167_v35 = vmul.f32 %v8151_v11, %v13300_v19  ;;  %v8171_v8 = vadd.f32 %v8155_v42, %v8135_v5  ;;  %v8175_v28 = vadd.f32 %v8159_v31, %v8139_v61 }
 0x442   : > { %v8170_v55 = vadd.f32 %v8154_v63, %v8134_v32  ;;  %v8174_v9 = vadd.f32 %v8158_v29, %v8138_v54  ;;  %v8178_v56 = vadd.f32 %v8162_v40, %v8142_v41  ;;  %v8179_v16 = vadd.f32 %v8163_v22, %v8143_v46 }
 0x443   : > { %v8182_v20 = vadd.f32 %v8166_v24, %v8146_v34  ;;  %v8183_v33 = vadd.f32 %v8167_v35, %v8147_v58  ;;  %v8190_v57 = vadd.f32 %v8186_v44, %v8126_v0  ;;  %v8191_v4 = vadd.f32 %v8187_v13, %v8127_v62  ;;  %v13522_v62 = vpop.permute.xlu0 %8246  ;;  %v13534_v0 = vpop.permute.xlu1 %8251 }
 0x444   : > { %v8271_v15 = vmul.f32 %v13484_v30, %v13450_v17  ;;  %v8294_v49 = vadd.f32 %v8293_v10, %v8269_v37  ;;  %v8282_v1 = vadd.f32 %v8281_v18, %v8270_v50 }
 0x445   : > { %v8194_v3 = vmax.f32 %v8190_v57, 1e-06  ;;  %v8195_v59 = vmax.f32 %v8191_v4, 1e-06 }
 0x446   : > { %v8295_v47 = vadd.f32 %v8294_v49, %v8271_v15 }
 0x447   : > { %10412 = vrcp.f32 %v8194_v3  ;;  %v13552_v5 = vpop.permute.xlu0 %8256  ;;  %v8262_v35 = vpop.permute.xlu1 %8261 }
 0x448   : > { %10414 = vrcp.f32 %v8195_v59 }
 0x451   : > { %v10413_v19 = vpop.eup %10412 }
 0x452   : > { %v10415_v7 = vpop.eup %10414  ;;  %v13514_v60 = vmul.f32 %v10413_v19, %v8170_v55  ;;  %v13516_v6 = vmul.f32 %v10413_v19, %v8174_v9  ;;  %v13518_v21 = vmul.f32 %v10413_v19, %v8178_v56  ;;  %v13520_v52 = vmul.f32 %v10413_v19, %v8182_v20 }
 0x453   : > { %v13524_v2 = vmul.f32 %v10415_v7, %v8171_v8  ;;  %v13526_v37 = vmul.f32 %v10415_v7, %v8175_v28  ;;  %v13528_v10 = vmul.f32 %v10415_v7, %v8179_v16  ;;  %v13530_v44 = vmul.f32 %v10415_v7, %v8183_v33 }
 0x454   : > { %v8314_v50 = vmul.f32 %v13514_v60, %v13514_v60  ;;  %v8316_v13 = vmul.f32 %v13516_v6, %v13516_v6  ;;  %v8272_v14 = vmul.f32 %v13522_v62, %v13514_v60  ;;  %v8318_v40 = vmul.f32 %v13518_v21, %v13518_v21 }
 0x455   : > { %v8315_v11 = vmul.f32 %v13524_v2, %v13524_v2  ;;  %v8273_v63 = vmul.f32 %v13522_v62, %v13524_v2  ;;  %v8317_v29 = vmul.f32 %v13526_v37, %v13526_v37  ;;  %v8274_v42 = vmul.f32 %v13534_v0, %v13516_v6 }
 0x456   : > { %v8325_v18 = vadd.f32 %v13480_v25, %v8314_v50  ;;  %v8283_v22 = vadd.f32 %v8282_v1, %v8272_v14  ;;  %v8275_v61 = vmul.f32 %v13534_v0, %v13526_v37  ;;  %v8319_v46 = vmul.f32 %v13528_v10, %v13528_v10 }
 0x457   : > { %v8338_v12 = vadd.f32 %v13482_v27, %v8315_v11  ;;  %v8296_v25 = vadd.f32 %v8295_v47, %v8273_v63  ;;  %v8320_v58 = vmul.f32 %v13520_v52, %v13520_v52  ;;  %v8276_v27 = vmul.f32 %v13552_v5, %v13518_v21 }
 0x458   : > { %v8326_v31 = vadd.f32 %v8325_v18, %v8316_v13  ;;  %v8277_v41 = vmul.f32 %v13552_v5, %v13528_v10  ;;  %v8284_v34 = vadd.f32 %v8283_v22, %v8274_v42  ;;  %v8321_v8 = vmul.f32 %v13530_v44, %v13530_v44 }
 0x459   : > { %v8339_v32 = vadd.f32 %v8338_v12, %v8317_v29  ;;  %v8297_v24 = vadd.f32 %v8296_v25, %v8275_v61  ;;  %v8278_v55 = vmul.f32 %v8262_v35, %v13520_v52  ;;  %v8279_v56 = vmul.f32 %v8262_v35, %v13530_v44 }
 0x45a   : > { %v8327_v54 = vadd.f32 %v8326_v31, %v8318_v40  ;;  %v8285_v16 = vadd.f32 %v8284_v34, %v8276_v27 }
 0x45b   : > { %v8340_v28 = vadd.f32 %v8339_v32, %v8319_v46  ;;  %v8298_v20 = vadd.f32 %v8297_v24, %v8277_v41 }
 0x45c   : > { %v8328_v9 = vadd.f32 %v8327_v54, %v8320_v58  ;;  %v8286_v4 = vadd.f32 %v8285_v16, %v8278_v55  ;;  %v8385_v54 = vpop.permute.xlu0 %8384 }
 0x45d   : > { %v8341_v33 = vadd.f32 %v8340_v28, %v8321_v8  ;;  %v8299_v15 = vadd.f32 %v8298_v20, %v8279_v56 }
 0x45e   : > { %v8329_v57 = vrot.slane %v8328_v9, 4  ;;  %v8287_v3 = vrot.slane %v8286_v4, 4 }
 0x45f   : > { %v8342_v49 = vrot.slane %v8341_v33, 4  ;;  %v8300_v59 = vrot.slane %v8299_v15, 4 }
 0x460   : > { %v8330_v1 = vadd.f32 %v8329_v57, %v8328_v9  ;;  %v8288_v7 = vadd.f32 %v8287_v3, %v8286_v4 }
 0x461   : > { %v8343_v47 = vadd.f32 %v8342_v49, %v8341_v33  ;;  %v8301_v50 = vadd.f32 %v8300_v59, %v8299_v15 }
 0x462   : > { %v8331_v19 = vrot.slane %v8330_v1, 2  ;;  %v8289_v18 = vrot.slane %v8288_v7, 2 }
 0x463   : > { %v8344_v11 = vrot.slane %v8343_v47, 2  ;;  %v8302_v14 = vrot.slane %v8301_v50, 2 }
 0x464   : > { %v8332_v13 = vadd.f32 %v8331_v19, %v8330_v1  ;;  %v8290_v40 = vadd.f32 %v8289_v18, %v8288_v7 }
 0x465   : > { %v8345_v63 = vadd.f32 %v8344_v11, %v8343_v47  ;;  %v8303_v12 = vadd.f32 %v8302_v14, %v8301_v50 }
 0x466   : > { %v8333_v29 = vrot.slane %v8332_v13, 1  ;;  %v8291_v22 = vrot.slane %v8290_v40, 1 }
 0x467   : > { %v8346_v42 = vrot.slane %v8345_v63, 1  ;;  %v8304_v25 = vrot.slane %v8303_v12, 1 }
 0x468   : > { %v8334_v31 = vadd.f32 %v8333_v29, %v8332_v13  ;;  %v8292_v58 = vadd.f32 %v8291_v22, %v8290_v40 }
 0x469   : > { %v8347_v61 = vadd.f32 %v8346_v42, %v8345_v63  ;;  %v8305_v32 = vadd.f32 %v8304_v25, %v8303_v12 }
 0x46a   : > { %v8405_v46 = vsub.f32 1.0, %v8334_v31  ;;  %v8439_v41 = vmul.f32 %v8385_v54, %v8334_v31  ;;  %v8378_v8 = vmul.f32 2.0, %v8292_v58 }
 0x46b   : > { %v8406_v27 = vsub.f32 1.0, %v8347_v61  ;;  %v8440_v24 = vmul.f32 %v8385_v54, %v8347_v61  ;;  %v8379_v28 = vmul.f32 2.0, %v8305_v32 }
 0x46c   : > { %v8411_v34 = vmul.f32 %v8405_v46, %v13464_v26  ;;  %v8407_v9 = vmul.f32 %v8405_v46, %v13456_v39  ;;  %v8413_v56 = vmul.f32 %v8405_v46, %v13484_v30  ;;  %v8409_v16 = vmul.f32 %v8405_v46, %v13474_v23 }
 0x46d   : > { %v8412_v55 = vmul.f32 %v8406_v27, %v13464_v26  ;;  %v8408_v20 = vmul.f32 %v8406_v27, %v13456_v39  ;;  %v8414_v33 = vmul.f32 %v8406_v27, %v13484_v30  ;;  %v8380_v57 = vadd.f32 1.0, %v8378_v8 }
 0x46e   : > { %v8381_v4 = vadd.f32 1.0, %v8379_v28  ;;  %v8410_v15 = vmul.f32 %v8406_v27, %v13474_v23  ;;  %v8415_v49 = vmul.f32 %v8405_v46, %v13522_v62  ;;  %v8416_v1 = vmul.f32 %v8406_v27, %v13522_v62 }
 0x46f   : > { %v8419_v26 = vmul.f32 %v8405_v46, %v13552_v5  ;;  %v8387_v3 = vadd.f32 %v8385_v54, %v8380_v57  ;;  %v8441_v47 = vadd.f32 %v8439_v41, %v8380_v57  ;;  %v8417_v7 = vmul.f32 %v8405_v46, %v13534_v0 }
 0x470   : > { %v8388_v59 = vadd.f32 %v8385_v54, %v8381_v4  ;;  %v8442_v19 = vadd.f32 %v8440_v24, %v8381_v4  ;;  %v8418_v39 = vmul.f32 %v8406_v27, %v13534_v0  ;;  %v8421_v50 = vmul.f32 %v8405_v46, %v8262_v35 }
 0x471   : > { %v8422_v30 = vmul.f32 %v8406_v27, %v8262_v35  ;;  %v8403_v11 = vmul.f32 %v8387_v3, %v13520_v52  ;;  %v8443_v13 = vmax.f32 %v8441_v47, 1e-06  ;;  %v8389_v62 = vmul.f32 %v8387_v3, %v13429_v43 }
 0x472   : > { %v8404_v23 = vmul.f32 %v8388_v59, %v13530_v44  ;;  %v8444_v18 = vmax.f32 %v8442_v19, 1e-06  ;;  %v8390_v14 = vmul.f32 %v8388_v59, %v13432_v45  ;;  %v8391_v63 = vmul.f32 %v8387_v3, %v13435_v51 }
 0x473   : > { %v8392_v29 = vmul.f32 %v8388_v59, %v13438_v38  ;;  %v8437_v40 = vadd.f32 %v8421_v50, %v8403_v11  ;;  %10416 = vrcp.f32 %v8443_v13  ;;  %v8393_v0 = vmul.f32 %v8387_v3, %v13441_v53 }
 0x474   : > { %v8438_v12 = vadd.f32 %v8422_v30, %v8404_v23  ;;  %10418 = vrcp.f32 %v8444_v18  ;;  %v8423_v35 = vadd.f32 %v8407_v9, %v8389_v62  ;;  %v8424_v52 = vadd.f32 %v8408_v20, %v8390_v14 }
 0x475   : > { %v8425_v42 = vadd.f32 %v8409_v16, %v8391_v63  ;;  %v8426_v44 = vadd.f32 %v8410_v15, %v8392_v29  ;;  %v8427_v31 = vadd.f32 %v8411_v34, %v8393_v0  ;;  %v8394_v22 = vmul.f32 %v8388_v59, %v13444_v36 }
 0x476   : > { %v8395_v43 = vmul.f32 %v8387_v3, %v13447_v48  ;;  %v8396_v45 = vmul.f32 %v8388_v59, %v13450_v17  ;;  %v8397_v51 = vmul.f32 %v8387_v3, %v13514_v60  ;;  %v8398_v38 = vmul.f32 %v8388_v59, %v13524_v2 }
 0x477   : > { %v8399_v25 = vmul.f32 %v8387_v3, %v13516_v6  ;;  %v8428_v61 = vadd.f32 %v8412_v55, %v8394_v22  ;;  %v8400_v46 = vmul.f32 %v8388_v59, %v13526_v37  ;;  %v8401_v58 = vmul.f32 %v8387_v3, %v13518_v21 }
 0x478   : > { %v8429_v53 = vadd.f32 %v8413_v56, %v8395_v43  ;;  %v8430_v32 = vadd.f32 %v8414_v33, %v8396_v45  ;;  %v8431_v54 = vadd.f32 %v8415_v49, %v8397_v51  ;;  %v8432_v41 = vadd.f32 %v8416_v1, %v8398_v38 }
 0x479   : > { %v8433_v36 = vadd.f32 %v8417_v7, %v8399_v25  ;;  %v8420_v48 = vmul.f32 %v8406_v27, %v13552_v5  ;;  %v8434_v34 = vadd.f32 %v8418_v39, %v8400_v46  ;;  %v8435_v17 = vadd.f32 %v8419_v26, %v8401_v58 }
 0x47a   : > { %v8402_v60 = vmul.f32 %v8388_v59, %v13528_v10 }
 0x47c   : > { %v8436_v24 = vadd.f32 %v8420_v48, %v8402_v60 }
 0x47d   : > { %v10417_v2 = vpop.eup %10416 }
 0x47e   : > { %v10419_v8 = vpop.eup %10418  ;;  %v8446_v6 = vmul.f32 %v10417_v2, %v8423_v35  ;;  %v8449_v28 = vmul.f32 %v10417_v2, %v8425_v42  ;;  %v8451_v55 = vmul.f32 %v10417_v2, %v8427_v31  ;;  %v8453_v9 = vmul.f32 %v10417_v2, %v8429_v53 }
 0x47f   : > { %v8448_v37 = vmul.f32 %v10419_v8, %v8424_v52  ;;  %v8450_v56 = vmul.f32 %v10419_v8, %v8426_v44  ;;  %v8452_v21 = vmul.f32 %v10419_v8, %v8428_v61  ;;  %v8454_v16 = vmul.f32 %v10419_v8, %v8430_v32 }
 0x480   : > { %8463 = vxpose.xlu1.b32.start [1/8] (short) %v8446_v6, 128  ;;  %v8455_v20 = vmul.f32 %v10417_v2, %v8431_v54  ;;  %v8456_v33 = vmul.f32 %v10419_v8, %v8432_v41  ;;  %v8457_v57 = vmul.f32 %v10417_v2, %v8433_v36  ;;  %v8458_v5 = vmul.f32 %v10419_v8, %v8434_v34 }
 0x481   : > { %8495 = vxpose.xlu0.b32.start [1/8] (short) %v8448_v37, 128  ;;  %v8459_v27 = vmul.f32 %v10417_v2, %v8435_v17  ;;  %v8460_v4 = vmul.f32 %v10419_v8, %v8436_v24  ;;  %v8461_v10 = vmul.f32 %v10417_v2, %v8437_v40  ;;  %v8462_v15 = vmul.f32 %v10419_v8, %v8438_v12 }
 0x484   : > { %8464 = vxpose.xlu1.b32.cont [2/8] (short) %v8449_v28, 128 }
 0x485   : > { %8496 = vxpose.xlu0.b32.cont [2/8] (short) %v8450_v56, 128 }
 0x488   : > { %8465 = vxpose.xlu1.b32.cont [3/8] (short) %v8451_v55, 128 }
 0x489   : > { %8497 = vxpose.xlu0.b32.cont [3/8] (short) %v8452_v21, 128 }
 0x48c   : > { %8466 = vxpose.xlu1.b32.cont [4/8] (short) %v8453_v9, 128 }
 0x48d   : > { %8498 = vxpose.xlu0.b32.cont [4/8] (short) %v8454_v16, 128 }
 0x490   : > { %8467 = vxpose.xlu1.b32.cont [5/8] (short) %v8455_v20, 128 }
 0x491   : > { %8499 = vxpose.xlu0.b32.cont [5/8] (short) %v8456_v33, 128 }
 0x494   : > { %8468 = vxpose.xlu1.b32.cont [6/8] (short) %v8457_v57, 128 }
 0x495   : > { %8500 = vxpose.xlu0.b32.cont [6/8] (short) %v8458_v5, 128 }
 0x498   : > { %8469 = vxpose.xlu1.b32.cont [7/8] (short) %v8459_v27, 128 }
 0x499   : > { %8501 = vxpose.xlu0.b32.cont [7/8] (short) %v8460_v4, 128 }
 0x49c   : > { %8470 = vxpose.xlu1.b32.end [8/8] (short) %v8461_v10, 128 }
 0x49d   : > { %8502 = vxpose.xlu0.b32.end [8/8] (short) %v8462_v15, 128 }
 0x500   : > { %v8479_v49 = vpop.trf.xlu1 }
 0x501   : > { %8527 = vst.msk [vmem:[%s13603_s26] sm:$0xff] %vm14016_vm0, %v8479_v49  ;;  %v8511_v1 = vpop.trf.xlu0 }
 0x502   : > { %8543 = vst.msk [vmem:[%s13603_s26 + $0x80] sm:$0xff] %vm14017_vm8, %v8511_v1  ;;  %vm14032_vm8 = vmmov %vm14016_vm0 }
 0x504   : > { %v8480_v26 = vpop.trf.xlu1 }
 0x505   : > { %8528 = vst.msk [vmem:[%s13603_s26 + $0x8] sm:$0xff] %vm14018_vm1, %v8480_v26  ;;  %v8512_v3 = vpop.trf.xlu0  ;;  %vm14033_vm1 = vmmov %vm14016_vm0 }
 0x506   : > { %8544 = vst.msk [vmem:[%s13603_s26 + $0x88] sm:$0xff] %vm14019_vm7, %v8512_v3  ;;  %vm14034_vm7 = vmmov %vm14016_vm0 }
 0x508   : > { %v8481_v59 = vpop.trf.xlu1 }
 0x509   : > { %8529 = vst.msk [vmem:[%s13603_s26 + $0x10] sm:$0xff] %vm14020_vm13, %v8481_v59  ;;  %v8513_v47 = vpop.trf.xlu0  ;;  %vm14035_vm13 = vmmov %vm14016_vm0 }
 0x50a   : > { %8545 = vst.msk [vmem:[%s13603_s26 + $0x90] sm:$0xff] %vm14021_vm11, %v8513_v47  ;;  %vm14036_vm11 = vmmov %vm14016_vm0 }
 0x50c   : > { %v8482_v19 = vpop.trf.xlu1 }
 0x50d   : > { %8530 = vst.msk [vmem:[%s13603_s26 + $0x18] sm:$0xff] %vm14022_vm14, %v8482_v19  ;;  %v8514_v7 = vpop.trf.xlu0  ;;  %vm14037_vm14 = vmmov %vm14016_vm0 }
 0x50e   : > { %8546 = vst.msk [vmem:[%s13603_s26 + $0x98] sm:$0xff] %vm14023_vm15, %v8514_v7  ;;  %vm14038_vm15 = vmmov %vm14016_vm0 }
 0x510   : > { %v8483_v39 = vpop.trf.xlu1 }
 0x511   : > { %8531 = vst.msk [vmem:[%s13603_s26 + $0x20] sm:$0xff] %vm14024_vm9, %v8483_v39  ;;  %v8515_v50 = vpop.trf.xlu0  ;;  %vm14039_vm9 = vmmov %vm14016_vm0 }
 0x512   : > { %8547 = vst.msk [vmem:[%s13603_s26 + $0xa0] sm:$0xff] %vm14025_vm6, %v8515_v50  ;;  %vm14040_vm6 = vmmov %vm14016_vm0 }
 0x514   : > { %v8484_v30 = vpop.trf.xlu1 }
 0x515   : > { %8532 = vst.msk [vmem:[%s13603_s26 + $0x28] sm:$0xff] %vm14026_vm10, %v8484_v30  ;;  %v8516_v11 = vpop.trf.xlu0  ;;  %vm14041_vm10 = vmmov %vm14016_vm0 }
 0x516   : > { %8548 = vst.msk [vmem:[%s13603_s26 + $0xa8] sm:$0xff] %vm14027_vm2, %v8516_v11  ;;  %vm14042_vm2 = vmmov %vm14016_vm0 }
 0x518   : > { %v8485_v23 = vpop.trf.xlu1 }
 0x519   : > { %8533 = vst.msk [vmem:[%s13603_s26 + $0x30] sm:$0xff] %vm14028_vm5, %v8485_v23  ;;  %v8517_v13 = vpop.trf.xlu0  ;;  %vm14043_vm5 = vmmov %vm14016_vm0 }
 0x51a   : > { %8549 = vst.msk [vmem:[%s13603_s26 + $0xb0] sm:$0xff] %vm14029_vm12, %v8517_v13  ;;  %vm14044_vm12 = vmmov %vm14016_vm0 }
 0x51c   : > { %v8486_v18 = vpop.trf.xlu1 }
 0x51d   : > { %8534 = vst.msk [vmem:[%s13603_s26 + $0x38] sm:$0xff] %vm14030_vm3, %v8486_v18  ;;  %v8518_v62 = vpop.trf.xlu0  ;;  %vm14045_vm3 = vmmov %vm14016_vm0 }
 0x51e   : > { %8550 = vst.msk [vmem:[%s13603_s26 + $0xb8] sm:$0xff] %vm14031_vm4, %v8518_v62  ;;  %vm14046_vm4 = vmmov %vm14016_vm0 }
 0x520   : > { %v8487_v14 = vpop.trf.xlu1 }
 0x521   : > { %8535 = vst.msk [vmem:[%s13603_s26 + $0x40] sm:$0xff] %vm14016_vm0, %v8487_v14  ;;  %v8519_v63 = vpop.trf.xlu0 }
 0x522   : > { %8551 = vst.msk [vmem:[%s13603_s26 + $0xc0] sm:$0xff] %vm14032_vm8, %v8519_v63 }
 0x524   : > { %v8488_v29 = vpop.trf.xlu1 }
 0x525   : > { %8536 = vst.msk [vmem:[%s13603_s26 + $0x48] sm:$0xff] %vm14033_vm1, %v8488_v29  ;;  %v8520_v40 = vpop.trf.xlu0 }
 0x526   : > { %8552 = vst.msk [vmem:[%s13603_s26 + $0xc8] sm:$0xff] %vm14034_vm7, %v8520_v40 }
 0x528   : > { %v8489_v12 = vpop.trf.xlu1 }
 0x529   : > { %8537 = vst.msk [vmem:[%s13603_s26 + $0x50] sm:$0xff] %vm14035_vm13, %v8489_v12  ;;  %v8521_v0 = vpop.trf.xlu0 }
 0x52a   : > { %8553 = vst.msk [vmem:[%s13603_s26 + $0xd0] sm:$0xff] %vm14036_vm11, %v8521_v0 }
 0x52c   : > { %v8490_v35 = vpop.trf.xlu1 }
 0x52d   : > { %8538 = vst.msk [vmem:[%s13603_s26 + $0x58] sm:$0xff] %vm14037_vm14, %v8490_v35  ;;  %v8522_v52 = vpop.trf.xlu0 }
 0x52e   : > { %8554 = vst.msk [vmem:[%s13603_s26 + $0xd8] sm:$0xff] %vm14038_vm15, %v8522_v52 }
 0x530   : > { %v8491_v42 = vpop.trf.xlu1 }
 0x531   : > { %8539 = vst.msk [vmem:[%s13603_s26 + $0x60] sm:$0xff] %vm14039_vm9, %v8491_v42  ;;  %v8523_v44 = vpop.trf.xlu0 }
 0x532   : > { %8555 = vst.msk [vmem:[%s13603_s26 + $0xe0] sm:$0xff] %vm14040_vm6, %v8523_v44 }
 0x534   : > { %v8492_v31 = vpop.trf.xlu1 }
 0x535   : > { %8540 = vst.msk [vmem:[%s13603_s26 + $0x68] sm:$0xff] %vm14041_vm10, %v8492_v31  ;;  %v8524_v22 = vpop.trf.xlu0 }
 0x536   : > { %8556 = vst.msk [vmem:[%s13603_s26 + $0xe8] sm:$0xff] %vm14042_vm2, %v8524_v22 }
 0x538   : > { %v8493_v43 = vpop.trf.xlu1 }
 0x539   : > { %8541 = vst.msk [vmem:[%s13603_s26 + $0x70] sm:$0xff] %vm14043_vm5, %v8493_v43  ;;  %v8525_v45 = vpop.trf.xlu0 }
 0x53a   : > { %8557 = vst.msk [vmem:[%s13603_s26 + $0xf0] sm:$0xff] %vm14044_vm12, %v8525_v45 }
 0x53c   : > { %v8494_v51 = vpop.trf.xlu1 }
 0x53d   : > { %8542 = vst.msk [vmem:[%s13603_s26 + $0x78] sm:$0xff] %vm14045_vm3, %v8494_v51  ;;  %v8526_v38 = vpop.trf.xlu0 }
 0x53e   : > { %8558 = vst.msk [vmem:[%s13603_s26 + $0xf8] sm:$0xff] %vm14046_vm4, %v8526_v38 }
 0x53f PF: > { %s16_s21 = sadd.s32 1, %s10427_s21  }
 0x540   : > { %p13_p5 = scmp.ge.s32.totalorder %s16_s21, 6  }
 0x542   :  { %15 = sbr.rel (!%p13_p5) target bundleno = 1 (0x1), region = 74 }

</bundles_post_ra>
